<compile_context>
chip_gen: v6e
topology: v6e:2x2x1
jax: 0.10.0
libtpu: 0.0.40
codegen_flags: <defaults>
</compile_context>

<pallas_src>
import functools
import math

import jax
import jax.numpy as jnp
from jax.experimental import pallas as pl
from jax.experimental.pallas import tpu as pltpu

HIDDEN = 100                    # embedding_dim of Encoder/Decoder in the reference module
HPAD = 128                      # hidden padded to a full 128-lane tile
MATMUL_DTYPE = jnp.bfloat16     # MXU-native operand dtype (per perf review)


# ---------------------------------------------------------------------------
# Pallas kernel
# ---------------------------------------------------------------------------
def _sigmoid(x):
    # exp on the EUP + approx reciprocal keeps the whole activation off the VPU divide path.
    return pl.reciprocal(1.0 + jnp.exp(-x), approx=True)


def _apply_gates(g, c, Hp):
    """Apply PyTorch-order [i, f, g, o] LSTM gates to fused pre-activations g: (Np, 4*Hp)."""
    i = _sigmoid(g[:, 0 * Hp:1 * Hp])
    f = _sigmoid(g[:, 1 * Hp:2 * Hp])
    gg = jnp.tanh(g[:, 2 * Hp:3 * Hp])
    o = _sigmoid(g[:, 3 * Hp:4 * Hp])
    c_new = f * c + i * gg
    h_new = o * jnp.tanh(c_new)
    return h_new, c_new


def _anonymizer_kernel(x_ref,                            # (T*Np, F) bf16 time-major input
                       wih_e_ref, whh_e_ref, b_e_ref,    # encoder: (F,4Hp) bf16, (Hp,4Hp) bf16, (1,4Hp) f32
                       whh_d_ref, b_d_ref,               # decoder step-1 (inp = 0) weights
                       w_comb_ref, b_comb_ref,           # decoder fused-feedback weights
                       wfc_ref, bfc_ref,                 # fc: (Hp, F) bf16, (1, F) f32
                       out_ref,                          # (T*Np, F) f32
                       xproj_ref,                        # VMEM scratch (T*Np, 4*Hp) f32
                       hs_ref,                           # VMEM scratch (max(T-1,1)*Np, Hp) f32
                       *, T, Np, Hp):
    F = out_ref.shape[-1]
    f32 = jnp.float32
    bf16 = MATMUL_DTYPE

    # Small invariant operands hoisted once; the big recurrent weight refs are read at their
    # use site inside each unrolled step so a 32-vreg weight is never held live across the
    # whole recurrence.
    b_e = b_e_ref[...]
    b_d = b_d_ref[...]
    b_comb = b_comb_ref[...]
    bfc = bfc_ref[...]

    # ---- Encoder input projection hoisted out of the recurrence: one batched matmul, ----
    # ---- result parked in VMEM scratch so per-step reads are aligned 8-row loads.     ----
    xproj_ref[...] = jnp.dot(x_ref[...], wih_e_ref[...],
                             preferred_element_type=f32) + b_e       # (T*Np, 4*Hp) f32

    h = jnp.zeros((Np, Hp), f32)
    c = jnp.zeros((Np, Hp), f32)

    # ---- Encoder recurrence: fully unrolled, one fused (Np,Hp)@(Hp,4Hp) matmul per step. ----
    for t in range(T):
        g = xproj_ref[pl.ds(t * Np, Np), :] + jnp.dot(
            h.astype(bf16), whh_e_ref[...], preferred_element_type=f32)
        h, c = _apply_gates(g, c, Hp)

    # ---- Decoder (autoregressive, teacher_force = False). ----
    if T > 1:
        # Step 1: input is zeros, so only the hidden path contributes (un-fused weights).
        g = jnp.dot(h.astype(bf16), whh_d_ref[...], preferred_element_type=f32) + b_d
        h, c = _apply_gates(g, c, Hp)
        hs_ref[pl.ds(0, Np), :] = h
        # Steps 2..T-1: the fc feedback is algebraically folded into w_comb / b_comb,
        # so each step is a single matmul on the serial path.
        for s in range(1, T - 1):
            g = jnp.dot(h.astype(bf16), w_comb_ref[...], preferred_element_type=f32) + b_comb
            h, c = _apply_gates(g, c, Hp)
            hs_ref[pl.ds(s * Np, Np), :] = h

        # Batched fc off the serial path + two direct slab stores (no concatenates).
        y = jnp.dot(hs_ref[...].astype(bf16), wfc_ref[...],
                    preferred_element_type=f32) + bfc                # ((T-1)*Np, F)
        out_ref[pl.ds(0, Np), :] = jnp.zeros((Np, F), out_ref.dtype)   # outputs[:, 0, :] = 0
        out_ref[pl.ds(Np, (T - 1) * Np), :] = y.astype(out_ref.dtype)
    else:
        out_ref[...] = jnp.zeros_like(out_ref)


# ---------------------------------------------------------------------------
# Wrapper
# ---------------------------------------------------------------------------
def anonymizer_forward(x, packed):
    """x: (N, C, T, V, M) float32 -> (N, C, T, V, M) float32."""
    N, C, T, V, M = x.shape
    F = C * V * M
    Hp = HPAD
    Np = max(8, ((N + 7) // 8) * 8)   # pad batch to a full sublane tile

    # Matches torch: permute(0,2,1,3,4).view(N, T, C*V*M); additionally time-major, batch
    # zero-padded to Np, flattened to 2-D and cast to bf16 (matmul operand dtype).
    # TODO(synk): if xprof shows these tiny 5-D transposes dominating end-to-end time, move
    # the layout change into the caller convention / allow_input_fusion instead of the kernel.
    x3d = jnp.transpose(x, (2, 0, 1, 3, 4)).reshape(T, N, F)
    if Np != N:
        x3d = jnp.pad(x3d, ((0, 0), (0, Np - N), (0, 0)))
    x2d = x3d.reshape(T * Np, F).astype(MATMUL_DTYPE)

    # Advisory cost estimate so XLA schedules the surrounding transposes sensibly.
    steps = T + max(T - 1, 0)
    flops = (2 * (T * Np) * F * (4 * Hp)            # hoisted encoder input projection
             + 2 * steps * Np * Hp * (4 * Hp)       # per-step recurrent matmuls
             + 2 * max(T - 1, 0) * Np * Hp * F)     # batched fc
    trans = 8 * Np * Hp * steps                     # 3 sigmoid (exp+recip) + 2 tanh per step
    weight_bytes = 2 * (F * 4 * Hp + 3 * Hp * 4 * Hp + Hp * F) + 4 * (3 * 4 * Hp + F)
    ce = pl.CostEstimate(flops=flops, transcendentals=trans,
                         bytes_accessed=weight_bytes + 2 * T * Np * F + 4 * T * Np * F)

    vmem = pl.BlockSpec(memory_space=pltpu.MemorySpace.VMEM)
    kernel = functools.partial(_anonymizer_kernel, T=T, Np=Np, Hp=Hp)

    # TODO(synk): when N grows, add a batch grid axis with dimension_semantics=("parallel",)
    # (v7x megacore) and tile x/out with BlockSpecs instead of whole-array VMEM residents.
    out2d = pl.pallas_call(
        kernel,
        out_shape=jax.ShapeDtypeStruct((T * Np, F), jnp.float32),
        in_specs=[vmem] * 10,
        out_specs=vmem,
        scratch_shapes=[
            pltpu.VMEM((T * Np, 4 * Hp), jnp.float32),          # xproj
            pltpu.VMEM((max(T - 1, 1) * Np, Hp), jnp.float32),  # decoder hiddens
        ],
        cost_estimate=ce,
    )(x2d,
      packed["wih_e"], packed["whh_e"], packed["b_e"],
      packed["whh_d"], packed["b_d"],
      packed["w_comb"], packed["b_comb"],
      packed["wfc"], packed["bfc"])

    out = out2d.reshape(T, Np, C, V, M)[:, :N]                  # drop padded batch rows
    return jnp.transpose(out, (1, 2, 0, 3, 4))                  # (N, C, T, V, M)


# ---------------------------------------------------------------------------
# Parameter init (raw PyTorch layout) and packing for the kernel
# ---------------------------------------------------------------------------
def init_params(key, F, H=HIDDEN):
    """Deterministic PyTorch-convention parameters (uniform(-1/sqrt(H), 1/sqrt(H)))."""
    ks = jax.random.split(key, 10)
    s = 1.0 / math.sqrt(H)

    def u(k, shape):
        return jax.random.uniform(k, shape, jnp.float32, -s, s)

    return dict(
        w_ih_e=u(ks[0], (4 * H, F)), w_hh_e=u(ks[1], (4 * H, H)),
        b_ih_e=u(ks[2], (4 * H,)), b_hh_e=u(ks[3], (4 * H,)),
        w_ih_d=u(ks[4], (4 * H, F)), w_hh_d=u(ks[5], (4 * H, H)),
        b_ih_d=u(ks[6], (4 * H,)), b_hh_d=u(ks[7], (4 * H,)),
        w_fc=u(ks[8], (F, H)), b_fc=u(ks[9], (F,)),
    )


def pack_params(raw, F, H=HIDDEN, Hp=HPAD):
    """Fuse the 4 gates per projection into one lane-aligned matrix, zero-pad H -> Hp,
    fold the decoder fc feedback into a combined hidden-path weight (all in f32), and only
    then cast the matmul weight matrices to bf16 (biases stay f32)."""

    def pack_ih(w):  # (4H, F) -> (F, 4*Hp); gate k occupies lanes [k*Hp, k*Hp+H)
        out = jnp.zeros((F, 4 * Hp), jnp.float32)
        for k in range(4):
            out = out.at[:, k * Hp:k * Hp + H].set(w[k * H:(k + 1) * H, :].T)
        return out

    def pack_hh(w):  # (4H, H) -> (Hp, 4*Hp); padded rows/lanes are exactly 0
        out = jnp.zeros((Hp, 4 * Hp), jnp.float32)
        for k in range(4):
            out = out.at[:H, k * Hp:k * Hp + H].set(w[k * H:(k + 1) * H, :].T)
        return out

    def pack_b(bi, bh):  # (4H,) -> (1, 4*Hp); padded lanes exactly 0 so pad h/c stays 0
        b = bi + bh
        out = jnp.zeros((1, 4 * Hp), jnp.float32)
        for k in range(4):
            out = out.at[0, k * Hp:k * Hp + H].set(b[k * H:(k + 1) * H])
        return out

    wih_e = pack_ih(raw["w_ih_e"])
    whh_e = pack_hh(raw["w_hh_e"])
    b_e = pack_b(raw["b_ih_e"], raw["b_hh_e"])

    wih_d = pack_ih(raw["w_ih_d"])
    whh_d = pack_hh(raw["w_hh_d"])
    b_d = pack_b(raw["b_ih_d"], raw["b_hh_d"])

    wfc = jnp.zeros((Hp, F), jnp.float32).at[:H, :].set(raw["w_fc"].T)  # fc = h @ wfc + bfc
    bfc = raw["b_fc"].reshape(1, F)

    # Decoder feedback folded in (f32): for steps t >= 2 (inp = h @ wfc + bfc)
    #   inp @ Wih_d + h @ Whh_d + b_d = h @ (Whh_d + wfc @ Wih_d) + (b_d + bfc @ Wih_d)
    w_comb = whh_d + jnp.dot(wfc, wih_d)
    b_comb = b_d + jnp.dot(bfc, wih_d)

    bf16 = MATMUL_DTYPE
    return dict(wih_e=wih_e.astype(bf16), whh_e=whh_e.astype(bf16), b_e=b_e,
                whh_d=whh_d.astype(bf16), b_d=b_d,
                w_comb=w_comb.astype(bf16), b_comb=b_comb,
                wfc=wfc.astype(bf16), bfc=bfc)


# ---------------------------------------------------------------------------
# Pure-JAX reference (mirrors the PyTorch forward, raw un-fused f32 weights)
# ---------------------------------------------------------------------------
def _lstm_cell_ref(xt, h, c, w_ih, w_hh, b_ih, b_hh):
    gates = xt @ w_ih.T + h @ w_hh.T + b_ih + b_hh
    i, f, g, o = jnp.split(gates, 4, axis=-1)
    c = jax.nn.sigmoid(f) * c + jax.nn.sigmoid(i) * jnp.tanh(g)
    h = jax.nn.sigmoid(o) * jnp.tanh(c)
    return h, c


def reference_forward(x, raw, H=HIDDEN):
    N, C, T, V, M = x.shape
    F = C * V * M
    xs = jnp.transpose(x, (0, 2, 1, 3, 4)).reshape(N, T, F)
    h = jnp.zeros((N, H), jnp.float32)
    c = jnp.zeros((N, H), jnp.float32)
    for t in range(T):
        h, c = _lstm_cell_ref(xs[:, t, :], h, c,
                              raw["w_ih_e"], raw["w_hh_e"], raw["b_ih_e"], raw["b_hh_e"])
    outs = [jnp.zeros((N, F), jnp.float32)]
    inp = jnp.zeros((N, F), jnp.float32)
    for _ in range(1, T):
        h, c = _lstm_cell_ref(inp, h, c,
                              raw["w_ih_d"], raw["w_hh_d"], raw["b_ih_d"], raw["b_hh_d"])
        inp = h @ raw["w_fc"].T + raw["b_fc"]
        outs.append(inp)
    out = jnp.stack(outs, axis=1).reshape(N, T, C, V, M)
    return jnp.transpose(out, (0, 2, 1, 3, 4))


# ---------------------------------------------------------------------------
if __name__ == "__main__":
    key = jax.random.PRNGKey(0)
    # num_point=V=4, num_person=M=2, in_channels=C=3 -> F = 24; N=2, T=8.
    N, C, T, V, M = 2, 3, 8, 4, 2
    F = C * V * M

    kx, kparams = jax.random.split(key)
    x = jax.random.normal(kx, (N, C, T, V, M), jnp.float32)
    raw = init_params(kparams, F)
    packed = pack_params(raw, F)

    out = jax.block_until_ready(anonymizer_forward(x, packed))

    ref = reference_forward(x, raw)
    assert out.shape == (N, C, T, V, M)
    # bf16 matmul operands (per perf review) -> tolerance loosened from the f32 version's
    # 1e-4; accumulation / state / biases are f32, observed error is ~1e-2-scale.
    assert jnp.allclose(out, ref, atol=5e-2, rtol=5e-2), \
        f"max abs diff {jnp.max(jnp.abs(out - ref))}"

    print("KERNEL_OK")
</pallas_src>

<mosaic_0001>
module attributes {stable_mosaic.version = 11 : i64} {
  func.func @_anonymizer_kernel(%arg0: memref<64x24xbf16, #tpu.memory_space<vmem>>, %arg1: memref<24x512xbf16, #tpu.memory_space<vmem>>, %arg2: memref<128x512xbf16, #tpu.memory_space<vmem>>, %arg3: memref<1x512xf32, #tpu.memory_space<vmem>>, %arg4: memref<128x512xbf16, #tpu.memory_space<vmem>>, %arg5: memref<1x512xf32, #tpu.memory_space<vmem>>, %arg6: memref<128x512xbf16, #tpu.memory_space<vmem>>, %arg7: memref<1x512xf32, #tpu.memory_space<vmem>>, %arg8: memref<128x24xbf16, #tpu.memory_space<vmem>>, %arg9: memref<1x24xf32, #tpu.memory_space<vmem>>, %arg10: memref<64x24xf32, #tpu.memory_space<vmem>>, %arg11: memref<64x512xf32, #tpu.memory_space<vmem>>, %arg12: memref<56x128xf32, #tpu.memory_space<vmem>>) attributes {dimension_semantics = [], scalar_prefetch = 0 : i64, scratch_operands = 2 : i64, tpu.core_type = #tpu.core_type<tc>} {
    %c0 = arith.constant 0 : index
    %c0_0 = arith.constant 0 : index
    %0 = vector.load %arg3[%c0, %c0_0] : memref<1x512xf32, #tpu.memory_space<vmem>>, vector<1x512xf32>
    %c0_1 = arith.constant 0 : index
    %c0_2 = arith.constant 0 : index
    %1 = vector.load %arg5[%c0_1, %c0_2] : memref<1x512xf32, #tpu.memory_space<vmem>>, vector<1x512xf32>
    %c0_3 = arith.constant 0 : index
    %c0_4 = arith.constant 0 : index
    %2 = vector.load %arg7[%c0_3, %c0_4] : memref<1x512xf32, #tpu.memory_space<vmem>>, vector<1x512xf32>
    %c0_5 = arith.constant 0 : index
    %c0_6 = arith.constant 0 : index
    %3 = vector.load %arg9[%c0_5, %c0_6] : memref<1x24xf32, #tpu.memory_space<vmem>>, vector<1x24xf32>
    %c0_7 = arith.constant 0 : index
    %c0_8 = arith.constant 0 : index
    %4 = vector.load %arg0[%c0_7, %c0_8] : memref<64x24xbf16, #tpu.memory_space<vmem>>, vector<64x24xbf16>
    %c0_9 = arith.constant 0 : index
    %c0_10 = arith.constant 0 : index
    %5 = vector.load %arg1[%c0_9, %c0_10] : memref<24x512xbf16, #tpu.memory_space<vmem>>, vector<24x512xbf16>
    %cst = arith.constant dense<0.000000e+00> : vector<64x512xf32>
    %6 = tpu.matmul %4, %5, %cst {dimension_numbers = #tpu.dot_dimension_numbers<[1], [0], [0], [1], [0, 0, 1, 1], [], []>} : vector<64x24xbf16>, vector<24x512xbf16>, vector<64x512xf32> -> vector<64x512xf32>
    %7 = vector.broadcast %0 : vector<1x512xf32> to vector<64x512xf32>
    %8 = arith.addf %6, %7 : vector<64x512xf32>
    %c0_11 = arith.constant 0 : index
    %c0_12 = arith.constant 0 : index
    %9 = vector.load %arg11[%c0_11, %c0_12] : memref<64x512xf32, #tpu.memory_space<vmem>>, vector<64x512xf32>
    tpu.vector_store %arg11[%c0_11, %c0_12], %8 {strides = array<i32>} : memref<64x512xf32, #tpu.memory_space<vmem>>, vector<64x512xf32>,
    %cst_13 = arith.constant 0.000000e+00 : f32
    %10 = vector.broadcast %cst_13 : f32 to vector<8x128xf32>
    %cst_14 = arith.constant 0.000000e+00 : f32
    %11 = vector.broadcast %cst_14 : f32 to vector<8x128xf32>
    %c0_15 = arith.constant 0 : index
    %c0_16 = arith.constant 0 : index
    %12 = vector.load %arg11[%c0_15, %c0_16] : memref<64x512xf32, #tpu.memory_space<vmem>>, vector<8x512xf32>
    %13 = arith.truncf %10 : vector<8x128xf32> to vector<8x128xbf16>
    %c0_17 = arith.constant 0 : index
    %c0_18 = arith.constant 0 : index
    %14 = vector.load %arg2[%c0_17, %c0_18] : memref<128x512xbf16, #tpu.memory_space<vmem>>, vector<128x512xbf16>
    %cst_19 = arith.constant dense<0.000000e+00> : vector<8x512xf32>
    %15 = tpu.matmul %13, %14, %cst_19 {dimension_numbers = #tpu.dot_dimension_numbers<[1], [0], [0], [1], [0, 0, 1, 1], [], []>} : vector<8x128xbf16>, vector<128x512xbf16>, vector<8x512xf32> -> vector<8x512xf32>
    %16 = arith.addf %12, %15 : vector<8x512xf32>
    %17 = vector.extract_strided_slice %16 {offsets = [0, 0], sizes = [8, 128], strides = [1, 1]} : vector<8x512xf32> to vector<8x128xf32>
    %cst_20 = arith.constant 0.000000e+00 : f32
    %18 = vector.broadcast %cst_20 : f32 to vector<8x128xf32>
    %19 = arith.subf %18, %17 : vector<8x128xf32>
    %20 = math.exp %19 : vector<8x128xf32>
    %cst_21 = arith.constant 1.000000e+00 : f32
    %21 = vector.broadcast %cst_21 : f32 to vector<8x128xf32>
    %22 = arith.addf %21, %20 : vector<8x128xf32>
    %23 = tpu.reciprocal %22 {approx = true} : vector<8x128xf32> -> vector<8x128xf32>
    %24 = vector.extract_strided_slice %16 {offsets = [0, 128], sizes = [8, 128], strides = [1, 1]} : vector<8x512xf32> to vector<8x128xf32>
    %cst_22 = arith.constant 0.000000e+00 : f32
    %25 = vector.broadcast %cst_22 : f32 to vector<8x128xf32>
    %26 = arith.subf %25, %24 : vector<8x128xf32>
    %27 = math.exp %26 : vector<8x128xf32>
    %cst_23 = arith.constant 1.000000e+00 : f32
    %28 = vector.broadcast %cst_23 : f32 to vector<8x128xf32>
    %29 = arith.addf %28, %27 : vector<8x128xf32>
    %30 = tpu.reciprocal %29 {approx = true} : vector<8x128xf32> -> vector<8x128xf32>
    %31 = vector.extract_strided_slice %16 {offsets = [0, 256], sizes = [8, 128], strides = [1, 1]} : vector<8x512xf32> to vector<8x128xf32>
    %32 = math.tanh %31 : vector<8x128xf32>
    %33 = vector.extract_strided_slice %16 {offsets = [0, 384], sizes = [8, 128], strides = [1, 1]} : vector<8x512xf32> to vector<8x128xf32>
    %cst_24 = arith.constant 0.000000e+00 : f32
    %34 = vector.broadcast %cst_24 : f32 to vector<8x128xf32>
    %35 = arith.subf %34, %33 : vector<8x128xf32>
    %36 = math.exp %35 : vector<8x128xf32>
    %cst_25 = arith.constant 1.000000e+00 : f32
    %37 = vector.broadcast %cst_25 : f32 to vector<8x128xf32>
    %38 = arith.addf %37, %36 : vector<8x128xf32>
    %39 = tpu.reciprocal %38 {approx = true} : vector<8x128xf32> -> vector<8x128xf32>
    %40 = arith.mulf %30, %11 : vector<8x128xf32>
    %41 = arith.mulf %23, %32 : vector<8x128xf32>
    %42 = arith.addf %40, %41 : vector<8x128xf32>
    %43 = math.tanh %42 : vector<8x128xf32>
    %44 = arith.mulf %39, %43 : vector<8x128xf32>
    %c8 = arith.constant 8 : index
    %c0_26 = arith.constant 0 : index
    %45 = vector.load %arg11[%c8, %c0_26] : memref<64x512xf32, #tpu.memory_space<vmem>>, vector<8x512xf32>
    %46 = arith.truncf %44 : vector<8x128xf32> to vector<8x128xbf16>
    %c0_27 = arith.constant 0 : index
    %c0_28 = arith.constant 0 : index
    %47 = vector.load %arg2[%c0_27, %c0_28] : memref<128x512xbf16, #tpu.memory_space<vmem>>, vector<128x512xbf16>
    %cst_29 = arith.constant dense<0.000000e+00> : vector<8x512xf32>
    %48 = tpu.matmul %46, %47, %cst_29 {dimension_numbers = #tpu.dot_dimension_numbers<[1], [0], [0], [1], [0, 0, 1, 1], [], []>} : vector<8x128xbf16>, vector<128x512xbf16>, vector<8x512xf32> -> vector<8x512xf32>
    %49 = arith.addf %45, %48 : vector<8x512xf32>
    %50 = vector.extract_strided_slice %49 {offsets = [0, 0], sizes = [8, 128], strides = [1, 1]} : vector<8x512xf32> to vector<8x128xf32>
    %cst_30 = arith.constant 0.000000e+00 : f32
    %51 = vector.broadcast %cst_30 : f32 to vector<8x128xf32>
    %52 = arith.subf %51, %50 : vector<8x128xf32>
    %53 = math.exp %52 : vector<8x128xf32>
    %cst_31 = arith.constant 1.000000e+00 : f32
    %54 = vector.broadcast %cst_31 : f32 to vector<8x128xf32>
    %55 = arith.addf %54, %53 : vector<8x128xf32>
    %56 = tpu.reciprocal %55 {approx = true} : vector<8x128xf32> -> vector<8x128xf32>
    %57 = vector.extract_strided_slice %49 {offsets = [0, 128], sizes = [8, 128], strides = [1, 1]} : vector<8x512xf32> to vector<8x128xf32>
    %cst_32 = arith.constant 0.000000e+00 : f32
    %58 = vector.broadcast %cst_32 : f32 to vector<8x128xf32>
    %59 = arith.subf %58, %57 : vector<8x128xf32>
    %60 = math.exp %59 : vector<8x128xf32>
    %cst_33 = arith.constant 1.000000e+00 : f32
    %61 = vector.broadcast %cst_33 : f32 to vector<8x128xf32>
    %62 = arith.addf %61, %60 : vector<8x128xf32>
    %63 = tpu.reciprocal %62 {approx = true} : vector<8x128xf32> -> vector<8x128xf32>
    %64 = vector.extract_strided_slice %49 {offsets = [0, 256], sizes = [8, 128], strides = [1, 1]} : vector<8x512xf32> to vector<8x128xf32>
    %65 = math.tanh %64 : vector<8x128xf32>
    %66 = vector.extract_strided_slice %49 {offsets = [0, 384], sizes = [8, 128], strides = [1, 1]} : vector<8x512xf32> to vector<8x128xf32>
    %cst_34 = arith.constant 0.000000e+00 : f32
    %67 = vector.broadcast %cst_34 : f32 to vector<8x128xf32>
    %68 = arith.subf %67, %66 : vector<8x128xf32>
    %69 = math.exp %68 : vector<8x128xf32>
    %cst_35 = arith.constant 1.000000e+00 : f32
    %70 = vector.broadcast %cst_35 : f32 to vector<8x128xf32>
    %71 = arith.addf %70, %69 : vector<8x128xf32>
    %72 = tpu.reciprocal %71 {approx = true} : vector<8x128xf32> -> vector<8x128xf32>
    %73 = arith.mulf %63, %42 : vector<8x128xf32>
    %74 = arith.mulf %56, %65 : vector<8x128xf32>
    %75 = arith.addf %73, %74 : vector<8x128xf32>
    %76 = math.tanh %75 : vector<8x128xf32>
    %77 = arith.mulf %72, %76 : vector<8x128xf32>
    %c16 = arith.constant 16 : index
    %c0_36 = arith.constant 0 : index
    %78 = vector.load %arg11[%c16, %c0_36] : memref<64x512xf32, #tpu.memory_space<vmem>>, vector<8x512xf32>
    %79 = arith.truncf %77 : vector<8x128xf32> to vector<8x128xbf16>
    %c0_37 = arith.constant 0 : index
    %c0_38 = arith.constant 0 : index
    %80 = vector.load %arg2[%c0_37, %c0_38] : memref<128x512xbf16, #tpu.memory_space<vmem>>, vector<128x512xbf16>
    %cst_39 = arith.constant dense<0.000000e+00> : vector<8x512xf32>
    %81 = tpu.matmul %79, %80, %cst_39 {dimension_numbers = #tpu.dot_dimension_numbers<[1], [0], [0], [1], [0, 0, 1, 1], [], []>} : vector<8x128xbf16>, vector<128x512xbf16>, vector<8x512xf32> -> vector<8x512xf32>
    %82 = arith.addf %78, %81 : vector<8x512xf32>
    %83 = vector.extract_strided_slice %82 {offsets = [0, 0], sizes = [8, 128], strides = [1, 1]} : vector<8x512xf32> to vector<8x128xf32>
    %cst_40 = arith.constant 0.000000e+00 : f32
    %84 = vector.broadcast %cst_40 : f32 to vector<8x128xf32>
    %85 = arith.subf %84, %83 : vector<8x128xf32>
    %86 = math.exp %85 : vector<8x128xf32>
    %cst_41 = arith.constant 1.000000e+00 : f32
    %87 = vector.broadcast %cst_41 : f32 to vector<8x128xf32>
    %88 = arith.addf %87, %86 : vector<8x128xf32>
    %89 = tpu.reciprocal %88 {approx = true} : vector<8x128xf32> -> vector<8x128xf32>
    %90 = vector.extract_strided_slice %82 {offsets = [0, 128], sizes = [8, 128], strides = [1, 1]} : vector<8x512xf32> to vector<8x128xf32>
    %cst_42 = arith.constant 0.000000e+00 : f32
    %91 = vector.broadcast %cst_42 : f32 to vector<8x128xf32>
    %92 = arith.subf %91, %90 : vector<8x128xf32>
    %93 = math.exp %92 : vector<8x128xf32>
    %cst_43 = arith.constant 1.000000e+00 : f32
    %94 = vector.broadcast %cst_43 : f32 to vector<8x128xf32>
    %95 = arith.addf %94, %93 : vector<8x128xf32>
    %96 = tpu.reciprocal %95 {approx = true} : vector<8x128xf32> -> vector<8x128xf32>
    %97 = vector.extract_strided_slice %82 {offsets = [0, 256], sizes = [8, 128], strides = [1, 1]} : vector<8x512xf32> to vector<8x128xf32>
    %98 = math.tanh %97 : vector<8x128xf32>
    %99 = vector.extract_strided_slice %82 {offsets = [0, 384], sizes = [8, 128], strides = [1, 1]} : vector<8x512xf32> to vector<8x128xf32>
    %cst_44 = arith.constant 0.000000e+00 : f32
    %100 = vector.broadcast %cst_44 : f32 to vector<8x128xf32>
    %101 = arith.subf %100, %99 : vector<8x128xf32>
    %102 = math.exp %101 : vector<8x128xf32>
    %cst_45 = arith.constant 1.000000e+00 : f32
    %103 = vector.broadcast %cst_45 : f32 to vector<8x128xf32>
    %104 = arith.addf %103, %102 : vector<8x128xf32>
    %105 = tpu.reciprocal %104 {approx = true} : vector<8x128xf32> -> vector<8x128xf32>
    %106 = arith.mulf %96, %75 : vector<8x128xf32>
    %107 = arith.mulf %89, %98 : vector<8x128xf32>
    %108 = arith.addf %106, %107 : vector<8x128xf32>
    %109 = math.tanh %108 : vector<8x128xf32>
    %110 = arith.mulf %105, %109 : vector<8x128xf32>
    %c24 = arith.constant 24 : index
    %c0_46 = arith.constant 0 : index
    %111 = vector.load %arg11[%c24, %c0_46] : memref<64x512xf32, #tpu.memory_space<vmem>>, vector<8x512xf32>
    %112 = arith.truncf %110 : vector<8x128xf32> to vector<8x128xbf16>
    %c0_47 = arith.constant 0 : index
    %c0_48 = arith.constant 0 : index
    %113 = vector.load %arg2[%c0_47, %c0_48] : memref<128x512xbf16, #tpu.memory_space<vmem>>, vector<128x512xbf16>
    %cst_49 = arith.constant dense<0.000000e+00> : vector<8x512xf32>
    %114 = tpu.matmul %112, %113, %cst_49 {dimension_numbers = #tpu.dot_dimension_numbers<[1], [0], [0], [1], [0, 0, 1, 1], [], []>} : vector<8x128xbf16>, vector<128x512xbf16>, vector<8x512xf32> -> vector<8x512xf32>
    %115 = arith.addf %111, %114 : vector<8x512xf32>
    %116 = vector.extract_strided_slice %115 {offsets = [0, 0], sizes = [8, 128], strides = [1, 1]} : vector<8x512xf32> to vector<8x128xf32>
    %cst_50 = arith.constant 0.000000e+00 : f32
    %117 = vector.broadcast %cst_50 : f32 to vector<8x128xf32>
    %118 = arith.subf %117, %116 : vector<8x128xf32>
    %119 = math.exp %118 : vector<8x128xf32>
    %cst_51 = arith.constant 1.000000e+00 : f32
    %120 = vector.broadcast %cst_51 : f32 to vector<8x128xf32>
    %121 = arith.addf %120, %119 : vector<8x128xf32>
    %122 = tpu.reciprocal %121 {approx = true} : vector<8x128xf32> -> vector<8x128xf32>
    %123 = vector.extract_strided_slice %115 {offsets = [0, 128], sizes = [8, 128], strides = [1, 1]} : vector<8x512xf32> to vector<8x128xf32>
    %cst_52 = arith.constant 0.000000e+00 : f32
    %124 = vector.broadcast %cst_52 : f32 to vector<8x128xf32>
    %125 = arith.subf %124, %123 : vector<8x128xf32>
    %126 = math.exp %125 : vector<8x128xf32>
    %cst_53 = arith.constant 1.000000e+00 : f32
    %127 = vector.broadcast %cst_53 : f32 to vector<8x128xf32>
    %128 = arith.addf %127, %126 : vector<8x128xf32>
    %129 = tpu.reciprocal %128 {approx = true} : vector<8x128xf32> -> vector<8x128xf32>
    %130 = vector.extract_strided_slice %115 {offsets = [0, 256], sizes = [8, 128], strides = [1, 1]} : vector<8x512xf32> to vector<8x128xf32>
    %131 = math.tanh %130 : vector<8x128xf32>
    %132 = vector.extract_strided_slice %115 {offsets = [0, 384], sizes = [8, 128], strides = [1, 1]} : vector<8x512xf32> to vector<8x128xf32>
    %cst_54 = arith.constant 0.000000e+00 : f32
    %133 = vector.broadcast %cst_54 : f32 to vector<8x128xf32>
    %134 = arith.subf %133, %132 : vector<8x128xf32>
    %135 = math.exp %134 : vector<8x128xf32>
    %cst_55 = arith.constant 1.000000e+00 : f32
    %136 = vector.broadcast %cst_55 : f32 to vector<8x128xf32>
    %137 = arith.addf %136, %135 : vector<8x128xf32>
    %138 = tpu.reciprocal %137 {approx = true} : vector<8x128xf32> -> vector<8x128xf32>
    %139 = arith.mulf %129, %108 : vector<8x128xf32>
    %140 = arith.mulf %122, %131 : vector<8x128xf32>
    %141 = arith.addf %139, %140 : vector<8x128xf32>
    %142 = math.tanh %141 : vector<8x128xf32>
    %143 = arith.mulf %138, %142 : vector<8x128xf32>
    %c32 = arith.constant 32 : index
    %c0_56 = arith.constant 0 : index
    %144 = vector.load %arg11[%c32, %c0_56] : memref<64x512xf32, #tpu.memory_space<vmem>>, vector<8x512xf32>
    %145 = arith.truncf %143 : vector<8x128xf32> to vector<8x128xbf16>
    %c0_57 = arith.constant 0 : index
    %c0_58 = arith.constant 0 : index
    %146 = vector.load %arg2[%c0_57, %c0_58] : memref<128x512xbf16, #tpu.memory_space<vmem>>, vector<128x512xbf16>
    %cst_59 = arith.constant dense<0.000000e+00> : vector<8x512xf32>
    %147 = tpu.matmul %145, %146, %cst_59 {dimension_numbers = #tpu.dot_dimension_numbers<[1], [0], [0], [1], [0, 0, 1, 1], [], []>} : vector<8x128xbf16>, vector<128x512xbf16>, vector<8x512xf32> -> vector<8x512xf32>
    %148 = arith.addf %144, %147 : vector<8x512xf32>
    %149 = vector.extract_strided_slice %148 {offsets = [0, 0], sizes = [8, 128], strides = [1, 1]} : vector<8x512xf32> to vector<8x128xf32>
    %cst_60 = arith.constant 0.000000e+00 : f32
    %150 = vector.broadcast %cst_60 : f32 to vector<8x128xf32>
    %151 = arith.subf %150, %149 : vector<8x128xf32>
    %152 = math.exp %151 : vector<8x128xf32>
    %cst_61 = arith.constant 1.000000e+00 : f32
    %153 = vector.broadcast %cst_61 : f32 to vector<8x128xf32>
    %154 = arith.addf %153, %152 : vector<8x128xf32>
    %155 = tpu.reciprocal %154 {approx = true} : vector<8x128xf32> -> vector<8x128xf32>
    %156 = vector.extract_strided_slice %148 {offsets = [0, 128], sizes = [8, 128], strides = [1, 1]} : vector<8x512xf32> to vector<8x128xf32>
    %cst_62 = arith.constant 0.000000e+00 : f32
    %157 = vector.broadcast %cst_62 : f32 to vector<8x128xf32>
    %158 = arith.subf %157, %156 : vector<8x128xf32>
    %159 = math.exp %158 : vector<8x128xf32>
    %cst_63 = arith.constant 1.000000e+00 : f32
    %160 = vector.broadcast %cst_63 : f32 to vector<8x128xf32>
    %161 = arith.addf %160, %159 : vector<8x128xf32>
    %162 = tpu.reciprocal %161 {approx = true} : vector<8x128xf32> -> vector<8x128xf32>
    %163 = vector.extract_strided_slice %148 {offsets = [0, 256], sizes = [8, 128], strides = [1, 1]} : vector<8x512xf32> to vector<8x128xf32>
    %164 = math.tanh %163 : vector<8x128xf32>
    %165 = vector.extract_strided_slice %148 {offsets = [0, 384], sizes = [8, 128], strides = [1, 1]} : vector<8x512xf32> to vector<8x128xf32>
    %cst_64 = arith.constant 0.000000e+00 : f32
    %166 = vector.broadcast %cst_64 : f32 to vector<8x128xf32>
    %167 = arith.subf %166, %165 : vector<8x128xf32>
    %168 = math.exp %167 : vector<8x128xf32>
    %cst_65 = arith.constant 1.000000e+00 : f32
    %169 = vector.broadcast %cst_65 : f32 to vector<8x128xf32>
    %170 = arith.addf %169, %168 : vector<8x128xf32>
    %171 = tpu.reciprocal %170 {approx = true} : vector<8x128xf32> -> vector<8x128xf32>
    %172 = arith.mulf %162, %141 : vector<8x128xf32>
    %173 = arith.mulf %155, %164 : vector<8x128xf32>
    %174 = arith.addf %172, %173 : vector<8x128xf32>
    %175 = math.tanh %174 : vector<8x128xf32>
    %176 = arith.mulf %171, %175 : vector<8x128xf32>
    %c40 = arith.constant 40 : index
    %c0_66 = arith.constant 0 : index
    %177 = vector.load %arg11[%c40, %c0_66] : memref<64x512xf32, #tpu.memory_space<vmem>>, vector<8x512xf32>
    %178 = arith.truncf %176 : vector<8x128xf32> to vector<8x128xbf16>
    %c0_67 = arith.constant 0 : index
    %c0_68 = arith.constant 0 : index
    %179 = vector.load %arg2[%c0_67, %c0_68] : memref<128x512xbf16, #tpu.memory_space<vmem>>, vector<128x512xbf16>
    %cst_69 = arith.constant dense<0.000000e+00> : vector<8x512xf32>
    %180 = tpu.matmul %178, %179, %cst_69 {dimension_numbers = #tpu.dot_dimension_numbers<[1], [0], [0], [1], [0, 0, 1, 1], [], []>} : vector<8x128xbf16>, vector<128x512xbf16>, vector<8x512xf32> -> vector<8x512xf32>
    %181 = arith.addf %177, %180 : vector<8x512xf32>
    %182 = vector.extract_strided_slice %181 {offsets = [0, 0], sizes = [8, 128], strides = [1, 1]} : vector<8x512xf32> to vector<8x128xf32>
    %cst_70 = arith.constant 0.000000e+00 : f32
    %183 = vector.broadcast %cst_70 : f32 to vector<8x128xf32>
    %184 = arith.subf %183, %182 : vector<8x128xf32>
    %185 = math.exp %184 : vector<8x128xf32>
    %cst_71 = arith.constant 1.000000e+00 : f32
    %186 = vector.broadcast %cst_71 : f32 to vector<8x128xf32>
    %187 = arith.addf %186, %185 : vector<8x128xf32>
    %188 = tpu.reciprocal %187 {approx = true} : vector<8x128xf32> -> vector<8x128xf32>
    %189 = vector.extract_strided_slice %181 {offsets = [0, 128], sizes = [8, 128], strides = [1, 1]} : vector<8x512xf32> to vector<8x128xf32>
    %cst_72 = arith.constant 0.000000e+00 : f32
    %190 = vector.broadcast %cst_72 : f32 to vector<8x128xf32>
    %191 = arith.subf %190, %189 : vector<8x128xf32>
    %192 = math.exp %191 : vector<8x128xf32>
    %cst_73 = arith.constant 1.000000e+00 : f32
    %193 = vector.broadcast %cst_73 : f32 to vector<8x128xf32>
    %194 = arith.addf %193, %192 : vector<8x128xf32>
    %195 = tpu.reciprocal %194 {approx = true} : vector<8x128xf32> -> vector<8x128xf32>
    %196 = vector.extract_strided_slice %181 {offsets = [0, 256], sizes = [8, 128], strides = [1, 1]} : vector<8x512xf32> to vector<8x128xf32>
    %197 = math.tanh %196 : vector<8x128xf32>
    %198 = vector.extract_strided_slice %181 {offsets = [0, 384], sizes = [8, 128], strides = [1, 1]} : vector<8x512xf32> to vector<8x128xf32>
    %cst_74 = arith.constant 0.000000e+00 : f32
    %199 = vector.broadcast %cst_74 : f32 to vector<8x128xf32>
    %200 = arith.subf %199, %198 : vector<8x128xf32>
    %201 = math.exp %200 : vector<8x128xf32>
    %cst_75 = arith.constant 1.000000e+00 : f32
    %202 = vector.broadcast %cst_75 : f32 to vector<8x128xf32>
    %203 = arith.addf %202, %201 : vector<8x128xf32>
    %204 = tpu.reciprocal %203 {approx = true} : vector<8x128xf32> -> vector<8x128xf32>
    %205 = arith.mulf %195, %174 : vector<8x128xf32>
    %206 = arith.mulf %188, %197 : vector<8x128xf32>
    %207 = arith.addf %205, %206 : vector<8x128xf32>
    %208 = math.tanh %207 : vector<8x128xf32>
    %209 = arith.mulf %204, %208 : vector<8x128xf32>
    %c48 = arith.constant 48 : index
    %c0_76 = arith.constant 0 : index
    %210 = vector.load %arg11[%c48, %c0_76] : memref<64x512xf32, #tpu.memory_space<vmem>>, vector<8x512xf32>
    %211 = arith.truncf %209 : vector<8x128xf32> to vector<8x128xbf16>
    %c0_77 = arith.constant 0 : index
    %c0_78 = arith.constant 0 : index
    %212 = vector.load %arg2[%c0_77, %c0_78] : memref<128x512xbf16, #tpu.memory_space<vmem>>, vector<128x512xbf16>
    %cst_79 = arith.constant dense<0.000000e+00> : vector<8x512xf32>
    %213 = tpu.matmul %211, %212, %cst_79 {dimension_numbers = #tpu.dot_dimension_numbers<[1], [0], [0], [1], [0, 0, 1, 1], [], []>} : vector<8x128xbf16>, vector<128x512xbf16>, vector<8x512xf32> -> vector<8x512xf32>
    %214 = arith.addf %210, %213 : vector<8x512xf32>
    %215 = vector.extract_strided_slice %214 {offsets = [0, 0], sizes = [8, 128], strides = [1, 1]} : vector<8x512xf32> to vector<8x128xf32>
    %cst_80 = arith.constant 0.000000e+00 : f32
    %216 = vector.broadcast %cst_80 : f32 to vector<8x128xf32>
    %217 = arith.subf %216, %215 : vector<8x128xf32>
    %218 = math.exp %217 : vector<8x128xf32>
    %cst_81 = arith.constant 1.000000e+00 : f32
    %219 = vector.broadcast %cst_81 : f32 to vector<8x128xf32>
    %220 = arith.addf %219, %218 : vector<8x128xf32>
    %221 = tpu.reciprocal %220 {approx = true} : vector<8x128xf32> -> vector<8x128xf32>
    %222 = vector.extract_strided_slice %214 {offsets = [0, 128], sizes = [8, 128], strides = [1, 1]} : vector<8x512xf32> to vector<8x128xf32>
    %cst_82 = arith.constant 0.000000e+00 : f32
    %223 = vector.broadcast %cst_82 : f32 to vector<8x128xf32>
    %224 = arith.subf %223, %222 : vector<8x128xf32>
    %225 = math.exp %224 : vector<8x128xf32>
    %cst_83 = arith.constant 1.000000e+00 : f32
    %226 = vector.broadcast %cst_83 : f32 to vector<8x128xf32>
    %227 = arith.addf %226, %225 : vector<8x128xf32>
    %228 = tpu.reciprocal %227 {approx = true} : vector<8x128xf32> -> vector<8x128xf32>
    %229 = vector.extract_strided_slice %214 {offsets = [0, 256], sizes = [8, 128], strides = [1, 1]} : vector<8x512xf32> to vector<8x128xf32>
    %230 = math.tanh %229 : vector<8x128xf32>
    %231 = vector.extract_strided_slice %214 {offsets = [0, 384], sizes = [8, 128], strides = [1, 1]} : vector<8x512xf32> to vector<8x128xf32>
    %cst_84 = arith.constant 0.000000e+00 : f32
    %232 = vector.broadcast %cst_84 : f32 to vector<8x128xf32>
    %233 = arith.subf %232, %231 : vector<8x128xf32>
    %234 = math.exp %233 : vector<8x128xf32>
    %cst_85 = arith.constant 1.000000e+00 : f32
    %235 = vector.broadcast %cst_85 : f32 to vector<8x128xf32>
    %236 = arith.addf %235, %234 : vector<8x128xf32>
    %237 = tpu.reciprocal %236 {approx = true} : vector<8x128xf32> -> vector<8x128xf32>
    %238 = arith.mulf %228, %207 : vector<8x128xf32>
    %239 = arith.mulf %221, %230 : vector<8x128xf32>
    %240 = arith.addf %238, %239 : vector<8x128xf32>
    %241 = math.tanh %240 : vector<8x128xf32>
    %242 = arith.mulf %237, %241 : vector<8x128xf32>
    %c56 = arith.constant 56 : index
    %c0_86 = arith.constant 0 : index
    %243 = vector.load %arg11[%c56, %c0_86] : memref<64x512xf32, #tpu.memory_space<vmem>>, vector<8x512xf32>
    %244 = arith.truncf %242 : vector<8x128xf32> to vector<8x128xbf16>
    %c0_87 = arith.constant 0 : index
    %c0_88 = arith.constant 0 : index
    %245 = vector.load %arg2[%c0_87, %c0_88] : memref<128x512xbf16, #tpu.memory_space<vmem>>, vector<128x512xbf16>
    %cst_89 = arith.constant dense<0.000000e+00> : vector<8x512xf32>
    %246 = tpu.matmul %244, %245, %cst_89 {dimension_numbers = #tpu.dot_dimension_numbers<[1], [0], [0], [1], [0, 0, 1, 1], [], []>} : vector<8x128xbf16>, vector<128x512xbf16>, vector<8x512xf32> -> vector<8x512xf32>
    %247 = arith.addf %243, %246 : vector<8x512xf32>
    %248 = vector.extract_strided_slice %247 {offsets = [0, 0], sizes = [8, 128], strides = [1, 1]} : vector<8x512xf32> to vector<8x128xf32>
    %cst_90 = arith.constant 0.000000e+00 : f32
    %249 = vector.broadcast %cst_90 : f32 to vector<8x128xf32>
    %250 = arith.subf %249, %248 : vector<8x128xf32>
    %251 = math.exp %250 : vector<8x128xf32>
    %cst_91 = arith.constant 1.000000e+00 : f32
    %252 = vector.broadcast %cst_91 : f32 to vector<8x128xf32>
    %253 = arith.addf %252, %251 : vector<8x128xf32>
    %254 = tpu.reciprocal %253 {approx = true} : vector<8x128xf32> -> vector<8x128xf32>
    %255 = vector.extract_strided_slice %247 {offsets = [0, 128], sizes = [8, 128], strides = [1, 1]} : vector<8x512xf32> to vector<8x128xf32>
    %cst_92 = arith.constant 0.000000e+00 : f32
    %256 = vector.broadcast %cst_92 : f32 to vector<8x128xf32>
    %257 = arith.subf %256, %255 : vector<8x128xf32>
    %258 = math.exp %257 : vector<8x128xf32>
    %cst_93 = arith.constant 1.000000e+00 : f32
    %259 = vector.broadcast %cst_93 : f32 to vector<8x128xf32>
    %260 = arith.addf %259, %258 : vector<8x128xf32>
    %261 = tpu.reciprocal %260 {approx = true} : vector<8x128xf32> -> vector<8x128xf32>
    %262 = vector.extract_strided_slice %247 {offsets = [0, 256], sizes = [8, 128], strides = [1, 1]} : vector<8x512xf32> to vector<8x128xf32>
    %263 = math.tanh %262 : vector<8x128xf32>
    %264 = vector.extract_strided_slice %247 {offsets = [0, 384], sizes = [8, 128], strides = [1, 1]} : vector<8x512xf32> to vector<8x128xf32>
    %cst_94 = arith.constant 0.000000e+00 : f32
    %265 = vector.broadcast %cst_94 : f32 to vector<8x128xf32>
    %266 = arith.subf %265, %264 : vector<8x128xf32>
    %267 = math.exp %266 : vector<8x128xf32>
    %cst_95 = arith.constant 1.000000e+00 : f32
    %268 = vector.broadcast %cst_95 : f32 to vector<8x128xf32>
    %269 = arith.addf %268, %267 : vector<8x128xf32>
    %270 = tpu.reciprocal %269 {approx = true} : vector<8x128xf32> -> vector<8x128xf32>
    %271 = arith.mulf %261, %240 : vector<8x128xf32>
    %272 = arith.mulf %254, %263 : vector<8x128xf32>
    %273 = arith.addf %271, %272 : vector<8x128xf32>
    %274 = math.tanh %273 : vector<8x128xf32>
    %275 = arith.mulf %270, %274 : vector<8x128xf32>
    %276 = arith.truncf %275 : vector<8x128xf32> to vector<8x128xbf16>
    %c0_96 = arith.constant 0 : index
    %c0_97 = arith.constant 0 : index
    %277 = vector.load %arg4[%c0_96, %c0_97] : memref<128x512xbf16, #tpu.memory_space<vmem>>, vector<128x512xbf16>
    %cst_98 = arith.constant dense<0.000000e+00> : vector<8x512xf32>
    %278 = tpu.matmul %276, %277, %cst_98 {dimension_numbers = #tpu.dot_dimension_numbers<[1], [0], [0], [1], [0, 0, 1, 1], [], []>} : vector<8x128xbf16>, vector<128x512xbf16>, vector<8x512xf32> -> vector<8x512xf32>
    %279 = vector.broadcast %1 : vector<1x512xf32> to vector<8x512xf32>
    %280 = arith.addf %278, %279 : vector<8x512xf32>
    %281 = vector.extract_strided_slice %280 {offsets = [0, 0], sizes = [8, 128], strides = [1, 1]} : vector<8x512xf32> to vector<8x128xf32>
    %cst_99 = arith.constant 0.000000e+00 : f32
    %282 = vector.broadcast %cst_99 : f32 to vector<8x128xf32>
    %283 = arith.subf %282, %281 : vector<8x128xf32>
    %284 = math.exp %283 : vector<8x128xf32>
    %cst_100 = arith.constant 1.000000e+00 : f32
    %285 = vector.broadcast %cst_100 : f32 to vector<8x128xf32>
    %286 = arith.addf %285, %284 : vector<8x128xf32>
    %287 = tpu.reciprocal %286 {approx = true} : vector<8x128xf32> -> vector<8x128xf32>
    %288 = vector.extract_strided_slice %280 {offsets = [0, 128], sizes = [8, 128], strides = [1, 1]} : vector<8x512xf32> to vector<8x128xf32>
    %cst_101 = arith.constant 0.000000e+00 : f32
    %289 = vector.broadcast %cst_101 : f32 to vector<8x128xf32>
    %290 = arith.subf %289, %288 : vector<8x128xf32>
    %291 = math.exp %290 : vector<8x128xf32>
    %cst_102 = arith.constant 1.000000e+00 : f32
    %292 = vector.broadcast %cst_102 : f32 to vector<8x128xf32>
    %293 = arith.addf %292, %291 : vector<8x128xf32>
    %294 = tpu.reciprocal %293 {approx = true} : vector<8x128xf32> -> vector<8x128xf32>
    %295 = vector.extract_strided_slice %280 {offsets = [0, 256], sizes = [8, 128], strides = [1, 1]} : vector<8x512xf32> to vector<8x128xf32>
    %296 = math.tanh %295 : vector<8x128xf32>
    %297 = vector.extract_strided_slice %280 {offsets = [0, 384], sizes = [8, 128], strides = [1, 1]} : vector<8x512xf32> to vector<8x128xf32>
    %cst_103 = arith.constant 0.000000e+00 : f32
    %298 = vector.broadcast %cst_103 : f32 to vector<8x128xf32>
    %299 = arith.subf %298, %297 : vector<8x128xf32>
    %300 = math.exp %299 : vector<8x128xf32>
    %cst_104 = arith.constant 1.000000e+00 : f32
    %301 = vector.broadcast %cst_104 : f32 to vector<8x128xf32>
    %302 = arith.addf %301, %300 : vector<8x128xf32>
    %303 = tpu.reciprocal %302 {approx = true} : vector<8x128xf32> -> vector<8x128xf32>
    %304 = arith.mulf %294, %273 : vector<8x128xf32>
    %305 = arith.mulf %287, %296 : vector<8x128xf32>
    %306 = arith.addf %304, %305 : vector<8x128xf32>
    %307 = math.tanh %306 : vector<8x128xf32>
    %308 = arith.mulf %303, %307 : vector<8x128xf32>
    %c0_105 = arith.constant 0 : index
    %c0_106 = arith.constant 0 : index
    %309 = vector.load %arg12[%c0_105, %c0_106] : memref<56x128xf32, #tpu.memory_space<vmem>>, vector<8x128xf32>
    tpu.vector_store %arg12[%c0_105, %c0_106], %308 {strides = array<i32>} : memref<56x128xf32, #tpu.memory_space<vmem>>, vector<8x128xf32>,
    %310 = arith.truncf %308 : vector<8x128xf32> to vector<8x128xbf16>
    %c0_107 = arith.constant 0 : index
    %c0_108 = arith.constant 0 : index
    %311 = vector.load %arg6[%c0_107, %c0_108] : memref<128x512xbf16, #tpu.memory_space<vmem>>, vector<128x512xbf16>
    %cst_109 = arith.constant dense<0.000000e+00> : vector<8x512xf32>
    %312 = tpu.matmul %310, %311, %cst_109 {dimension_numbers = #tpu.dot_dimension_numbers<[1], [0], [0], [1], [0, 0, 1, 1], [], []>} : vector<8x128xbf16>, vector<128x512xbf16>, vector<8x512xf32> -> vector<8x512xf32>
    %313 = vector.broadcast %2 : vector<1x512xf32> to vector<8x512xf32>
    %314 = arith.addf %312, %313 : vector<8x512xf32>
    %315 = vector.extract_strided_slice %314 {offsets = [0, 0], sizes = [8, 128], strides = [1, 1]} : vector<8x512xf32> to vector<8x128xf32>
    %cst_110 = arith.constant 0.000000e+00 : f32
    %316 = vector.broadcast %cst_110 : f32 to vector<8x128xf32>
    %317 = arith.subf %316, %315 : vector<8x128xf32>
    %318 = math.exp %317 : vector<8x128xf32>
    %cst_111 = arith.constant 1.000000e+00 : f32
    %319 = vector.broadcast %cst_111 : f32 to vector<8x128xf32>
    %320 = arith.addf %319, %318 : vector<8x128xf32>
    %321 = tpu.reciprocal %320 {approx = true} : vector<8x128xf32> -> vector<8x128xf32>
    %322 = vector.extract_strided_slice %314 {offsets = [0, 128], sizes = [8, 128], strides = [1, 1]} : vector<8x512xf32> to vector<8x128xf32>
    %cst_112 = arith.constant 0.000000e+00 : f32
    %323 = vector.broadcast %cst_112 : f32 to vector<8x128xf32>
    %324 = arith.subf %323, %322 : vector<8x128xf32>
    %325 = math.exp %324 : vector<8x128xf32>
    %cst_113 = arith.constant 1.000000e+00 : f32
    %326 = vector.broadcast %cst_113 : f32 to vector<8x128xf32>
    %327 = arith.addf %326, %325 : vector<8x128xf32>
    %328 = tpu.reciprocal %327 {approx = true} : vector<8x128xf32> -> vector<8x128xf32>
    %329 = vector.extract_strided_slice %314 {offsets = [0, 256], sizes = [8, 128], strides = [1, 1]} : vector<8x512xf32> to vector<8x128xf32>
    %330 = math.tanh %329 : vector<8x128xf32>
    %331 = vector.extract_strided_slice %314 {offsets = [0, 384], sizes = [8, 128], strides = [1, 1]} : vector<8x512xf32> to vector<8x128xf32>
    %cst_114 = arith.constant 0.000000e+00 : f32
    %332 = vector.broadcast %cst_114 : f32 to vector<8x128xf32>
    %333 = arith.subf %332, %331 : vector<8x128xf32>
    %334 = math.exp %333 : vector<8x128xf32>
    %cst_115 = arith.constant 1.000000e+00 : f32
    %335 = vector.broadcast %cst_115 : f32 to vector<8x128xf32>
    %336 = arith.addf %335, %334 : vector<8x128xf32>
    %337 = tpu.reciprocal %336 {approx = true} : vector<8x128xf32> -> vector<8x128xf32>
    %338 = arith.mulf %328, %306 : vector<8x128xf32>
    %339 = arith.mulf %321, %330 : vector<8x128xf32>
    %340 = arith.addf %338, %339 : vector<8x128xf32>
    %341 = math.tanh %340 : vector<8x128xf32>
    %342 = arith.mulf %337, %341 : vector<8x128xf32>
    %c8_116 = arith.constant 8 : index
    %c0_117 = arith.constant 0 : index
    %343 = vector.load %arg12[%c8_116, %c0_117] : memref<56x128xf32, #tpu.memory_space<vmem>>, vector<8x128xf32>
    tpu.vector_store %arg12[%c8_116, %c0_117], %342 {strides = array<i32>} : memref<56x128xf32, #tpu.memory_space<vmem>>, vector<8x128xf32>,
    %344 = arith.truncf %342 : vector<8x128xf32> to vector<8x128xbf16>
    %c0_118 = arith.constant 0 : index
    %c0_119 = arith.constant 0 : index
    %345 = vector.load %arg6[%c0_118, %c0_119] : memref<128x512xbf16, #tpu.memory_space<vmem>>, vector<128x512xbf16>
    %cst_120 = arith.constant dense<0.000000e+00> : vector<8x512xf32>
    %346 = tpu.matmul %344, %345, %cst_120 {dimension_numbers = #tpu.dot_dimension_numbers<[1], [0], [0], [1], [0, 0, 1, 1], [], []>} : vector<8x128xbf16>, vector<128x512xbf16>, vector<8x512xf32> -> vector<8x512xf32>
    %347 = vector.broadcast %2 : vector<1x512xf32> to vector<8x512xf32>
    %348 = arith.addf %346, %347 : vector<8x512xf32>
    %349 = vector.extract_strided_slice %348 {offsets = [0, 0], sizes = [8, 128], strides = [1, 1]} : vector<8x512xf32> to vector<8x128xf32>
    %cst_121 = arith.constant 0.000000e+00 : f32
    %350 = vector.broadcast %cst_121 : f32 to vector<8x128xf32>
    %351 = arith.subf %350, %349 : vector<8x128xf32>
    %352 = math.exp %351 : vector<8x128xf32>
    %cst_122 = arith.constant 1.000000e+00 : f32
    %353 = vector.broadcast %cst_122 : f32 to vector<8x128xf32>
    %354 = arith.addf %353, %352 : vector<8x128xf32>
    %355 = tpu.reciprocal %354 {approx = true} : vector<8x128xf32> -> vector<8x128xf32>
    %356 = vector.extract_strided_slice %348 {offsets = [0, 128], sizes = [8, 128], strides = [1, 1]} : vector<8x512xf32> to vector<8x128xf32>
    %cst_123 = arith.constant 0.000000e+00 : f32
    %357 = vector.broadcast %cst_123 : f32 to vector<8x128xf32>
    %358 = arith.subf %357, %356 : vector<8x128xf32>
    %359 = math.exp %358 : vector<8x128xf32>
    %cst_124 = arith.constant 1.000000e+00 : f32
    %360 = vector.broadcast %cst_124 : f32 to vector<8x128xf32>
    %361 = arith.addf %360, %359 : vector<8x128xf32>
    %362 = tpu.reciprocal %361 {approx = true} : vector<8x128xf32> -> vector<8x128xf32>
    %363 = vector.extract_strided_slice %348 {offsets = [0, 256], sizes = [8, 128], strides = [1, 1]} : vector<8x512xf32> to vector<8x128xf32>
    %364 = math.tanh %363 : vector<8x128xf32>
    %365 = vector.extract_strided_slice %348 {offsets = [0, 384], sizes = [8, 128], strides = [1, 1]} : vector<8x512xf32> to vector<8x128xf32>
    %cst_125 = arith.constant 0.000000e+00 : f32
    %366 = vector.broadcast %cst_125 : f32 to vector<8x128xf32>
    %367 = arith.subf %366, %365 : vector<8x128xf32>
    %368 = math.exp %367 : vector<8x128xf32>
    %cst_126 = arith.constant 1.000000e+00 : f32
    %369 = vector.broadcast %cst_126 : f32 to vector<8x128xf32>
    %370 = arith.addf %369, %368 : vector<8x128xf32>
    %371 = tpu.reciprocal %370 {approx = true} : vector<8x128xf32> -> vector<8x128xf32>
    %372 = arith.mulf %362, %340 : vector<8x128xf32>
    %373 = arith.mulf %355, %364 : vector<8x128xf32>
    %374 = arith.addf %372, %373 : vector<8x128xf32>
    %375 = math.tanh %374 : vector<8x128xf32>
    %376 = arith.mulf %371, %375 : vector<8x128xf32>
    %c16_127 = arith.constant 16 : index
    %c0_128 = arith.constant 0 : index
    %377 = vector.load %arg12[%c16_127, %c0_128] : memref<56x128xf32, #tpu.memory_space<vmem>>, vector<8x128xf32>
    tpu.vector_store %arg12[%c16_127, %c0_128], %376 {strides = array<i32>} : memref<56x128xf32, #tpu.memory_space<vmem>>, vector<8x128xf32>,
    %378 = arith.truncf %376 : vector<8x128xf32> to vector<8x128xbf16>
    %c0_129 = arith.constant 0 : index
    %c0_130 = arith.constant 0 : index
    %379 = vector.load %arg6[%c0_129, %c0_130] : memref<128x512xbf16, #tpu.memory_space<vmem>>, vector<128x512xbf16>
    %cst_131 = arith.constant dense<0.000000e+00> : vector<8x512xf32>
    %380 = tpu.matmul %378, %379, %cst_131 {dimension_numbers = #tpu.dot_dimension_numbers<[1], [0], [0], [1], [0, 0, 1, 1], [], []>} : vector<8x128xbf16>, vector<128x512xbf16>, vector<8x512xf32> -> vector<8x512xf32>
    %381 = vector.broadcast %2 : vector<1x512xf32> to vector<8x512xf32>
    %382 = arith.addf %380, %381 : vector<8x512xf32>
    %383 = vector.extract_strided_slice %382 {offsets = [0, 0], sizes = [8, 128], strides = [1, 1]} : vector<8x512xf32> to vector<8x128xf32>
    %cst_132 = arith.constant 0.000000e+00 : f32
    %384 = vector.broadcast %cst_132 : f32 to vector<8x128xf32>
    %385 = arith.subf %384, %383 : vector<8x128xf32>
    %386 = math.exp %385 : vector<8x128xf32>
    %cst_133 = arith.constant 1.000000e+00 : f32
    %387 = vector.broadcast %cst_133 : f32 to vector<8x128xf32>
    %388 = arith.addf %387, %386 : vector<8x128xf32>
    %389 = tpu.reciprocal %388 {approx = true} : vector<8x128xf32> -> vector<8x128xf32>
    %390 = vector.extract_strided_slice %382 {offsets = [0, 128], sizes = [8, 128], strides = [1, 1]} : vector<8x512xf32> to vector<8x128xf32>
    %cst_134 = arith.constant 0.000000e+00 : f32
    %391 = vector.broadcast %cst_134 : f32 to vector<8x128xf32>
    %392 = arith.subf %391, %390 : vector<8x128xf32>
    %393 = math.exp %392 : vector<8x128xf32>
    %cst_135 = arith.constant 1.000000e+00 : f32
    %394 = vector.broadcast %cst_135 : f32 to vector<8x128xf32>
    %395 = arith.addf %394, %393 : vector<8x128xf32>
    %396 = tpu.reciprocal %395 {approx = true} : vector<8x128xf32> -> vector<8x128xf32>
    %397 = vector.extract_strided_slice %382 {offsets = [0, 256], sizes = [8, 128], strides = [1, 1]} : vector<8x512xf32> to vector<8x128xf32>
    %398 = math.tanh %397 : vector<8x128xf32>
    %399 = vector.extract_strided_slice %382 {offsets = [0, 384], sizes = [8, 128], strides = [1, 1]} : vector<8x512xf32> to vector<8x128xf32>
    %cst_136 = arith.constant 0.000000e+00 : f32
    %400 = vector.broadcast %cst_136 : f32 to vector<8x128xf32>
    %401 = arith.subf %400, %399 : vector<8x128xf32>
    %402 = math.exp %401 : vector<8x128xf32>
    %cst_137 = arith.constant 1.000000e+00 : f32
    %403 = vector.broadcast %cst_137 : f32 to vector<8x128xf32>
    %404 = arith.addf %403, %402 : vector<8x128xf32>
    %405 = tpu.reciprocal %404 {approx = true} : vector<8x128xf32> -> vector<8x128xf32>
    %406 = arith.mulf %396, %374 : vector<8x128xf32>
    %407 = arith.mulf %389, %398 : vector<8x128xf32>
    %408 = arith.addf %406, %407 : vector<8x128xf32>
    %409 = math.tanh %408 : vector<8x128xf32>
    %410 = arith.mulf %405, %409 : vector<8x128xf32>
    %c24_138 = arith.constant 24 : index
    %c0_139 = arith.constant 0 : index
    %411 = vector.load %arg12[%c24_138, %c0_139] : memref<56x128xf32, #tpu.memory_space<vmem>>, vector<8x128xf32>
    tpu.vector_store %arg12[%c24_138, %c0_139], %410 {strides = array<i32>} : memref<56x128xf32, #tpu.memory_space<vmem>>, vector<8x128xf32>,
    %412 = arith.truncf %410 : vector<8x128xf32> to vector<8x128xbf16>
    %c0_140 = arith.constant 0 : index
    %c0_141 = arith.constant 0 : index
    %413 = vector.load %arg6[%c0_140, %c0_141] : memref<128x512xbf16, #tpu.memory_space<vmem>>, vector<128x512xbf16>
    %cst_142 = arith.constant dense<0.000000e+00> : vector<8x512xf32>
    %414 = tpu.matmul %412, %413, %cst_142 {dimension_numbers = #tpu.dot_dimension_numbers<[1], [0], [0], [1], [0, 0, 1, 1], [], []>} : vector<8x128xbf16>, vector<128x512xbf16>, vector<8x512xf32> -> vector<8x512xf32>
    %415 = vector.broadcast %2 : vector<1x512xf32> to vector<8x512xf32>
    %416 = arith.addf %414, %415 : vector<8x512xf32>
    %417 = vector.extract_strided_slice %416 {offsets = [0, 0], sizes = [8, 128], strides = [1, 1]} : vector<8x512xf32> to vector<8x128xf32>
    %cst_143 = arith.constant 0.000000e+00 : f32
    %418 = vector.broadcast %cst_143 : f32 to vector<8x128xf32>
    %419 = arith.subf %418, %417 : vector<8x128xf32>
    %420 = math.exp %419 : vector<8x128xf32>
    %cst_144 = arith.constant 1.000000e+00 : f32
    %421 = vector.broadcast %cst_144 : f32 to vector<8x128xf32>
    %422 = arith.addf %421, %420 : vector<8x128xf32>
    %423 = tpu.reciprocal %422 {approx = true} : vector<8x128xf32> -> vector<8x128xf32>
    %424 = vector.extract_strided_slice %416 {offsets = [0, 128], sizes = [8, 128], strides = [1, 1]} : vector<8x512xf32> to vector<8x128xf32>
    %cst_145 = arith.constant 0.000000e+00 : f32
    %425 = vector.broadcast %cst_145 : f32 to vector<8x128xf32>
    %426 = arith.subf %425, %424 : vector<8x128xf32>
    %427 = math.exp %426 : vector<8x128xf32>
    %cst_146 = arith.constant 1.000000e+00 : f32
    %428 = vector.broadcast %cst_146 : f32 to vector<8x128xf32>
    %429 = arith.addf %428, %427 : vector<8x128xf32>
    %430 = tpu.reciprocal %429 {approx = true} : vector<8x128xf32> -> vector<8x128xf32>
    %431 = vector.extract_strided_slice %416 {offsets = [0, 256], sizes = [8, 128], strides = [1, 1]} : vector<8x512xf32> to vector<8x128xf32>
    %432 = math.tanh %431 : vector<8x128xf32>
    %433 = vector.extract_strided_slice %416 {offsets = [0, 384], sizes = [8, 128], strides = [1, 1]} : vector<8x512xf32> to vector<8x128xf32>
    %cst_147 = arith.constant 0.000000e+00 : f32
    %434 = vector.broadcast %cst_147 : f32 to vector<8x128xf32>
    %435 = arith.subf %434, %433 : vector<8x128xf32>
    %436 = math.exp %435 : vector<8x128xf32>
    %cst_148 = arith.constant 1.000000e+00 : f32
    %437 = vector.broadcast %cst_148 : f32 to vector<8x128xf32>
    %438 = arith.addf %437, %436 : vector<8x128xf32>
    %439 = tpu.reciprocal %438 {approx = true} : vector<8x128xf32> -> vector<8x128xf32>
    %440 = arith.mulf %430, %408 : vector<8x128xf32>
    %441 = arith.mulf %423, %432 : vector<8x128xf32>
    %442 = arith.addf %440, %441 : vector<8x128xf32>
    %443 = math.tanh %442 : vector<8x128xf32>
    %444 = arith.mulf %439, %443 : vector<8x128xf32>
    %c32_149 = arith.constant 32 : index
    %c0_150 = arith.constant 0 : index
    %445 = vector.load %arg12[%c32_149, %c0_150] : memref<56x128xf32, #tpu.memory_space<vmem>>, vector<8x128xf32>
    tpu.vector_store %arg12[%c32_149, %c0_150], %444 {strides = array<i32>} : memref<56x128xf32, #tpu.memory_space<vmem>>, vector<8x128xf32>,
    %446 = arith.truncf %444 : vector<8x128xf32> to vector<8x128xbf16>
    %c0_151 = arith.constant 0 : index
    %c0_152 = arith.constant 0 : index
    %447 = vector.load %arg6[%c0_151, %c0_152] : memref<128x512xbf16, #tpu.memory_space<vmem>>, vector<128x512xbf16>
    %cst_153 = arith.constant dense<0.000000e+00> : vector<8x512xf32>
    %448 = tpu.matmul %446, %447, %cst_153 {dimension_numbers = #tpu.dot_dimension_numbers<[1], [0], [0], [1], [0, 0, 1, 1], [], []>} : vector<8x128xbf16>, vector<128x512xbf16>, vector<8x512xf32> -> vector<8x512xf32>
    %449 = vector.broadcast %2 : vector<1x512xf32> to vector<8x512xf32>
    %450 = arith.addf %448, %449 : vector<8x512xf32>
    %451 = vector.extract_strided_slice %450 {offsets = [0, 0], sizes = [8, 128], strides = [1, 1]} : vector<8x512xf32> to vector<8x128xf32>
    %cst_154 = arith.constant 0.000000e+00 : f32
    %452 = vector.broadcast %cst_154 : f32 to vector<8x128xf32>
    %453 = arith.subf %452, %451 : vector<8x128xf32>
    %454 = math.exp %453 : vector<8x128xf32>
    %cst_155 = arith.constant 1.000000e+00 : f32
    %455 = vector.broadcast %cst_155 : f32 to vector<8x128xf32>
    %456 = arith.addf %455, %454 : vector<8x128xf32>
    %457 = tpu.reciprocal %456 {approx = true} : vector<8x128xf32> -> vector<8x128xf32>
    %458 = vector.extract_strided_slice %450 {offsets = [0, 128], sizes = [8, 128], strides = [1, 1]} : vector<8x512xf32> to vector<8x128xf32>
    %cst_156 = arith.constant 0.000000e+00 : f32
    %459 = vector.broadcast %cst_156 : f32 to vector<8x128xf32>
    %460 = arith.subf %459, %458 : vector<8x128xf32>
    %461 = math.exp %460 : vector<8x128xf32>
    %cst_157 = arith.constant 1.000000e+00 : f32
    %462 = vector.broadcast %cst_157 : f32 to vector<8x128xf32>
    %463 = arith.addf %462, %461 : vector<8x128xf32>
    %464 = tpu.reciprocal %463 {approx = true} : vector<8x128xf32> -> vector<8x128xf32>
    %465 = vector.extract_strided_slice %450 {offsets = [0, 256], sizes = [8, 128], strides = [1, 1]} : vector<8x512xf32> to vector<8x128xf32>
    %466 = math.tanh %465 : vector<8x128xf32>
    %467 = vector.extract_strided_slice %450 {offsets = [0, 384], sizes = [8, 128], strides = [1, 1]} : vector<8x512xf32> to vector<8x128xf32>
    %cst_158 = arith.constant 0.000000e+00 : f32
    %468 = vector.broadcast %cst_158 : f32 to vector<8x128xf32>
    %469 = arith.subf %468, %467 : vector<8x128xf32>
    %470 = math.exp %469 : vector<8x128xf32>
    %cst_159 = arith.constant 1.000000e+00 : f32
    %471 = vector.broadcast %cst_159 : f32 to vector<8x128xf32>
    %472 = arith.addf %471, %470 : vector<8x128xf32>
    %473 = tpu.reciprocal %472 {approx = true} : vector<8x128xf32> -> vector<8x128xf32>
    %474 = arith.mulf %464, %442 : vector<8x128xf32>
    %475 = arith.mulf %457, %466 : vector<8x128xf32>
    %476 = arith.addf %474, %475 : vector<8x128xf32>
    %477 = math.tanh %476 : vector<8x128xf32>
    %478 = arith.mulf %473, %477 : vector<8x128xf32>
    %c40_160 = arith.constant 40 : index
    %c0_161 = arith.constant 0 : index
    %479 = vector.load %arg12[%c40_160, %c0_161] : memref<56x128xf32, #tpu.memory_space<vmem>>, vector<8x128xf32>
    tpu.vector_store %arg12[%c40_160, %c0_161], %478 {strides = array<i32>} : memref<56x128xf32, #tpu.memory_space<vmem>>, vector<8x128xf32>,
    %480 = arith.truncf %478 : vector<8x128xf32> to vector<8x128xbf16>
    %c0_162 = arith.constant 0 : index
    %c0_163 = arith.constant 0 : index
    %481 = vector.load %arg6[%c0_162, %c0_163] : memref<128x512xbf16, #tpu.memory_space<vmem>>, vector<128x512xbf16>
    %cst_164 = arith.constant dense<0.000000e+00> : vector<8x512xf32>
    %482 = tpu.matmul %480, %481, %cst_164 {dimension_numbers = #tpu.dot_dimension_numbers<[1], [0], [0], [1], [0, 0, 1, 1], [], []>} : vector<8x128xbf16>, vector<128x512xbf16>, vector<8x512xf32> -> vector<8x512xf32>
    %483 = vector.broadcast %2 : vector<1x512xf32> to vector<8x512xf32>
    %484 = arith.addf %482, %483 : vector<8x512xf32>
    %485 = vector.extract_strided_slice %484 {offsets = [0, 0], sizes = [8, 128], strides = [1, 1]} : vector<8x512xf32> to vector<8x128xf32>
    %cst_165 = arith.constant 0.000000e+00 : f32
    %486 = vector.broadcast %cst_165 : f32 to vector<8x128xf32>
    %487 = arith.subf %486, %485 : vector<8x128xf32>
    %488 = math.exp %487 : vector<8x128xf32>
    %cst_166 = arith.constant 1.000000e+00 : f32
    %489 = vector.broadcast %cst_166 : f32 to vector<8x128xf32>
    %490 = arith.addf %489, %488 : vector<8x128xf32>
    %491 = tpu.reciprocal %490 {approx = true} : vector<8x128xf32> -> vector<8x128xf32>
    %492 = vector.extract_strided_slice %484 {offsets = [0, 128], sizes = [8, 128], strides = [1, 1]} : vector<8x512xf32> to vector<8x128xf32>
    %cst_167 = arith.constant 0.000000e+00 : f32
    %493 = vector.broadcast %cst_167 : f32 to vector<8x128xf32>
    %494 = arith.subf %493, %492 : vector<8x128xf32>
    %495 = math.exp %494 : vector<8x128xf32>
    %cst_168 = arith.constant 1.000000e+00 : f32
    %496 = vector.broadcast %cst_168 : f32 to vector<8x128xf32>
    %497 = arith.addf %496, %495 : vector<8x128xf32>
    %498 = tpu.reciprocal %497 {approx = true} : vector<8x128xf32> -> vector<8x128xf32>
    %499 = vector.extract_strided_slice %484 {offsets = [0, 256], sizes = [8, 128], strides = [1, 1]} : vector<8x512xf32> to vector<8x128xf32>
    %500 = math.tanh %499 : vector<8x128xf32>
    %501 = vector.extract_strided_slice %484 {offsets = [0, 384], sizes = [8, 128], strides = [1, 1]} : vector<8x512xf32> to vector<8x128xf32>
    %cst_169 = arith.constant 0.000000e+00 : f32
    %502 = vector.broadcast %cst_169 : f32 to vector<8x128xf32>
    %503 = arith.subf %502, %501 : vector<8x128xf32>
    %504 = math.exp %503 : vector<8x128xf32>
    %cst_170 = arith.constant 1.000000e+00 : f32
    %505 = vector.broadcast %cst_170 : f32 to vector<8x128xf32>
    %506 = arith.addf %505, %504 : vector<8x128xf32>
    %507 = tpu.reciprocal %506 {approx = true} : vector<8x128xf32> -> vector<8x128xf32>
    %508 = arith.mulf %498, %476 : vector<8x128xf32>
    %509 = arith.mulf %491, %500 : vector<8x128xf32>
    %510 = arith.addf %508, %509 : vector<8x128xf32>
    %511 = math.tanh %510 : vector<8x128xf32>
    %512 = arith.mulf %507, %511 : vector<8x128xf32>
    %c48_171 = arith.constant 48 : index
    %c0_172 = arith.constant 0 : index
    %513 = vector.load %arg12[%c48_171, %c0_172] : memref<56x128xf32, #tpu.memory_space<vmem>>, vector<8x128xf32>
    tpu.vector_store %arg12[%c48_171, %c0_172], %512 {strides = array<i32>} : memref<56x128xf32, #tpu.memory_space<vmem>>, vector<8x128xf32>,
    %c0_173 = arith.constant 0 : index
    %c0_174 = arith.constant 0 : index
    %514 = vector.load %arg12[%c0_173, %c0_174] : memref<56x128xf32, #tpu.memory_space<vmem>>, vector<56x128xf32>
    %515 = arith.truncf %514 : vector<56x128xf32> to vector<56x128xbf16>
    %c0_175 = arith.constant 0 : index
    %c0_176 = arith.constant 0 : index
    %516 = vector.load %arg8[%c0_175, %c0_176] : memref<128x24xbf16, #tpu.memory_space<vmem>>, vector<128x24xbf16>
    %cst_177 = arith.constant dense<0.000000e+00> : vector<56x24xf32>
    %517 = tpu.matmul %515, %516, %cst_177 {dimension_numbers = #tpu.dot_dimension_numbers<[1], [0], [0], [1], [0, 0, 1, 1], [], []>} : vector<56x128xbf16>, vector<128x24xbf16>, vector<56x24xf32> -> vector<56x24xf32>
    %518 = vector.broadcast %3 : vector<1x24xf32> to vector<56x24xf32>
    %519 = arith.addf %517, %518 : vector<56x24xf32>
    %cst_178 = arith.constant 0.000000e+00 : f32
    %520 = vector.broadcast %cst_178 : f32 to vector<8x24xf32>
    %c0_179 = arith.constant 0 : index
    %c0_180 = arith.constant 0 : index
    %521 = vector.load %arg10[%c0_179, %c0_180] : memref<64x24xf32, #tpu.memory_space<vmem>>, vector<8x24xf32>
    tpu.vector_store %arg10[%c0_179, %c0_180], %520 {strides = array<i32>} : memref<64x24xf32, #tpu.memory_space<vmem>>, vector<8x24xf32>,
    %c8_181 = arith.constant 8 : index
    %c0_182 = arith.constant 0 : index
    %522 = vector.load %arg10[%c8_181, %c0_182] : memref<64x24xf32, #tpu.memory_space<vmem>>, vector<56x24xf32>
    tpu.vector_store %arg10[%c8_181, %c0_182], %519 {strides = array<i32>} : memref<64x24xf32, #tpu.memory_space<vmem>>, vector<56x24xf32>,
    return
  }
}

</mosaic_0001>

<bundles_post_ra>
// kernel: tpu_custom_call.1
= control target key start
LH: loop header
LB: loop body
LE: loop exit
PB: predicated region body
PF: predicated region fallthrough
CT: control target
= control target key end

     0   :  { %15 = vsyncpa [#allocation5], 0  ;;  %s5750_s0 = inlined_call_operand.vmem [shape: bf16[64,24], index: 0, kind: input, shape index: {}]   ;;  %s5751_s1 = inlined_call_operand.vmem [shape: bf16[24,512], index: 1, kind: input, shape index: {}]   ;;  %s5752_s2 = inlined_call_operand.hbm [shape: bf16[128,512], index: 2, kind: input, shape index: {}]   ;;  %s5753_s3 = inlined_call_operand.vmem [shape: f32[1,512], index: 3, kind: input, shape index: {}]   ;;  %s5754_s4 = inlined_call_operand.hbm [shape: bf16[128,512], index: 4, kind: input, shape index: {}]   ;;  %s5755_s5 = inlined_call_operand.vmem [shape: f32[1,512], index: 5, kind: input, shape index: {}]   ;;  %s5756_s6 = inlined_call_operand.hbm [shape: bf16[128,512], index: 6, kind: input, shape index: {}]   ;;  %s5757_s7 = inlined_call_operand.vmem [shape: f32[1,512], index: 7, kind: input, shape index: {}]   ;;  %s5758_s8 = inlined_call_operand.vmem [shape: bf16[128,24], index: 8, kind: input, shape index: {}]   ;;  %s5759_s9 = inlined_call_operand.vmem [shape: f32[1,24], index: 9, kind: input, shape index: {}]   ;;  %s5760_s10 = inlined_call_operand.vmem [shape: f32[64,24], index: 10, kind: output, shape index: {}]  }
   0x1   :  { %16 = vsyncpa [#allocation7], 0  ;;  %s4617_s13 = smov [#allocation6]   ;;  %s4618_s15 = smov [#allocation4]  }
   0x2   :  { %s40_s14 = sshll.u32 %s4617_s13, 4  ;;  %s26_s16 = sshll.u32 %s4618_s15, 4  ;;  %s41_s14 = int_to_ptr.vmem [resolvable:$true] %s40_s14  ;;  %s27_s16 = int_to_ptr.vmem [resolvable:$true] %s26_s16 }
   0x3   :  { %s4561_s17 = scalar_lea.vmem %s41_s14, 4096  ;;  %p4566_p1 = scmp.lt.s32.totalorder %s41_s14, %s41_s14 }
   0x4   :  { %p4562_p0 = scmp.ne.s32.totalorder %s41_s14, %s4561_s17  ;;  %p4567_p2 = scmp.lt.s32.totalorder %s4561_s17, %s4561_s17 }
   0x6   :  { %p4568_p3 = por %p4567_p2, %p4566_p1 }
   0x8   :  { %p4569_p4 = pnand %p4568_p3, %p4562_p0 }
   0xa   :  { %4572 = shalt.err (!%p4569_p4)
}
   0xb   :  { %s4619_s18 = smov 256   ;;  %s4620_s19 = smov 16  }
   0xc   :  { %46 = dma.hbm_to_vmem [thread:$0]  %s5754_s4, 4096, %s41_s14, [#allocation7], %s4619_s18, %s4619_s18, %s4620_s19  }
   0xd   :  { %s4581_s22 = scalar_lea.vmem %s27_s16, 4096  ;;  %p4586_p6 = scmp.lt.s32.totalorder %s27_s16, %s27_s16 }
   0xe   :  { %p4582_p5 = scmp.ne.s32.totalorder %s27_s16, %s4581_s22  ;;  %p4587_p7 = scmp.lt.s32.totalorder %s4581_s22, %s4581_s22 }
  0x10   :  { %p4588_p8 = por %p4587_p7, %p4586_p6 }
  0x12   :  { %p4589_p9 = pnand %p4588_p8, %p4582_p5 }
  0x14   :  { %4592 = shalt.err (!%p4589_p9)
}
  0x15   :  { %32 = dma.hbm_to_vmem [thread:$0]  %s5752_s2, 4096, %s27_s16, [#allocation5], %s4619_s18, %s4619_s18, %s4620_s19  }
  0x16   :  { %s4621_s25 = smov [#allocation8]  }
  0x17   :  { %s54_s26 = sshll.u32 %s4621_s25, 4  ;;  %s55_s26 = int_to_ptr.vmem [resolvable:$true] %s54_s26 }
  0x18   :  { %s4601_s27 = scalar_lea.vmem %s55_s26, 4096  ;;  %p4606_p11 = scmp.lt.s32.totalorder %s55_s26, %s55_s26 }
  0x19   :  { %p4602_p10 = scmp.ne.s32.totalorder %s55_s26, %s4601_s27  ;;  %p4607_p12 = scmp.lt.s32.totalorder %s4601_s27, %s4601_s27 }
  0x1b   :  { %p4608_p13 = por %p4607_p12, %p4606_p11 }
  0x1d   :  { %p4609_p0 = pnand %p4608_p13, %p4602_p10 }
  0x1f   :  { %4612 = shalt.err (!%p4609_p0)
}
  0x20   :  { %60 = dma.hbm_to_vmem [thread:$0]  %s5756_s6, 4096, %s55_s26, [#allocation7], %s4619_s18, %s4619_s18, %s4620_s19  }
  0x21   :  { %4613 = dma.done.wait [#allocation5], 4096  }
  0x22   :  { %4614 = vsyncadd [#allocation5], 4294963200 }
  0x23   :  { %4615 = dma.done.wait [#allocation7], 8192  }
  0x24   :  { %4616 = vsyncadd [#allocation7], 4294959104  ;;  %vm166_vm0 = vcmask 195584   ;;  %v5761_v0 = vmov 0   ;;  %v4623_v1 = vmov 0.0   ;;  %v93_v2 = vld [vmem:[%s5751_s1 + $0x20] sm:$0xff]  ;;  %v96_v50 = vlaneseq }
  0x25   :  { %224 = vmatprep.mubr.bf16.mxu1 %v5761_v0  ;;  %3723 = vst.msk [vmem:[%s5760_s10] sm:$0xff] %vm166_vm0, %v4623_v1  ;;  %598 = vmatprep.mubr.bf16.mxu0 %v5761_v0  ;;  %vm179_vm1 = vcmask 1043456   ;;  %v3746_v3 = vcombine.high %v93_v2, %v93_v2  ;;  %v4697_v4 = vld [vmem:[#allocation4 + $0xe4] ss:$16 sps:$4 sm:$0xff]   ;;  %v3745_v5 = vcombine.low %v93_v2, %v93_v2  ;;  %v4699_v6 = vld [vmem:[#allocation4 + $0xe0] ss:$16 sps:$4 sm:$0xff]  }
  0x26   :  { %v4072_v7 = vld [vmem:[%s5751_s1 + $0x4] ss:$16 sps:$4 sm:$0xff]   ;;  %566 = vmatprep.subr.bf16.mxu0 %v4697_v4  ;;  %v4076_v10 = vld [vmem:[%s5751_s1] ss:$16 sps:$4 sm:$0xff]   ;;  %v94_v12 = vld [vmem:[%s5751_s1 + $0x28] sm:$0xff]  ;;  %v97_v51 = vshrl.u32 %v96_v50, 7 }
  0x27   :  { %3749 = vmatprep.subr.msk.bf16.mxu1 %vm179_vm1, %v3746_v3  ;;  %v181_v8 = vsel %vm179_vm1, %v3745_v5, 0  ;;  %v4707_v9 = vld [vmem:[#allocation4 + $0xc4] ss:$16 sps:$4 sm:$0xff]   ;;  %567 = vmatpush1.bf16.msra.mxu0 %v4699_v6  ;;  %v4713_v11 = vld [vmem:[#allocation4 + $0xc0] ss:$16 sps:$4 sm:$0xff]   ;;  %v3748_v13 = vcombine.high %v94_v12, %v94_v12  ;;  %v3747_v15 = vcombine.low %v94_v12, %v94_v12  ;;  %v4087_v24 = vld [vmem:[%s5750_s0 + $0x8] sm:$0xff]  }
  0x28   :  { %205 = vmatpush1.bf16.msra.mxu1 %v181_v8  ;;  %568 = vmatprep.subr.bf16.mxu0 %v4707_v9  ;;  %v4719_v14 = vld [vmem:[#allocation4 + $0xa4] ss:$16 sps:$4 sm:$0xff]   ;;  %v4725_v17 = vld [vmem:[#allocation4 + $0xa0] ss:$16 sps:$4 sm:$0xff]   ;;  %v4095_v22 = vld [vmem:[%s5751_s1 + $0x8] ss:$16 sps:$4 sm:$0xff]  }
  0x29   :  { %206 = vmatprep.subr.bf16.mxu1 %v4072_v7  ;;  %v4078_v16 = vld [vmem:[%s5750_s0] sm:$0xff]   ;;  %v187_v19 = vsel %vm179_vm1, %v3747_v15, 0  ;;  %v4097_v23 = vld [vmem:[%s5751_s1 + $0xc] ss:$16 sps:$4 sm:$0xff]   ;;  %v4094_v30 = vld [vmem:[%s5750_s0 + $0x10] sm:$0xff]   ;;  %v4878_v52 = vsub.s32 0, %v97_v51 }
  0x2a   :  { %v4727_v18 = vld [vmem:[#allocation4 + $0x84] ss:$16 sps:$4 sm:$0xff]   ;;  %v4733_v20 = vld [vmem:[#allocation4 + $0x80] ss:$16 sps:$4 sm:$0xff]   ;;  %v4755_v27 = vld [vmem:[#allocation4 + $0xec] ss:$16 sps:$4 sm:$0xff]  }
  0x2b   :  { %569 = vmatpush1.bf16.msra.mxu0 %v4713_v11  ;;  %v4736_v21 = vld [vmem:[#allocation4 + $0x64] ss:$16 sps:$4 sm:$0xff]   ;;  %v4750_v25 = vld [vmem:[#allocation4 + $0x60] ss:$16 sps:$4 sm:$0xff]   ;;  %v4104_v34 = vld [vmem:[%s5750_s0 + $0x18] sm:$0xff]   ;;  %5771 = vst [vmem:[#allocation11_spill] sm:$0xff] %v4878_v52 }
  0x2c   :  { %207 = vmatpush1.bf16.msra.mxu1 %v4076_v10  ;;  %570 = vmatprep.subr.bf16.mxu0 %v4719_v14  ;;  %v4753_v26 = vld [vmem:[#allocation4 + $0x44] ss:$16 sps:$4 sm:$0xff]   ;;  %v4759_v28 = vld [vmem:[#allocation4 + $0x40] ss:$16 sps:$4 sm:$0xff]   ;;  %v4792_v35 = vld [vmem:[#allocation4 + $0xe8] ss:$16 sps:$4 sm:$0xff]  }
  0x2d   :  { %3754 = vmatprep.subr.msk.bf16.mxu1 %vm179_vm1, %v3748_v13  ;;  %v4763_v29 = vld [vmem:[#allocation4 + $0x24] ss:$16 sps:$4 sm:$0xff]   ;;  %v4770_v31 = vld [vmem:[#allocation4 + $0x20] ss:$16 sps:$4 sm:$0xff]   ;;  %v4794_v36 = vld [vmem:[#allocation4 + $0xcc] ss:$16 sps:$4 sm:$0xff]  }
  0x2e   :  { %v4773_v32 = vld [vmem:[#allocation4 + $0x4] ss:$16 sps:$4 sm:$0xff]   ;;  %v4777_v33 = vld [vmem:[#allocation4] ss:$16 sps:$4 sm:$0xff]   ;;  %v4798_v37 = vld [vmem:[#allocation4 + $0xc8] ss:$16 sps:$4 sm:$0xff]  }
  0x2f   :  { %3750 = vmatmul.mubr.msk.bf16.vlgmr.msra.gmra.mxu1 %vm166_vm0, %v4078_v16  ;;  %571 = vmatpush1.bf16.msra.mxu0 %v4725_v17  ;;  %v4801_v38 = vld [vmem:[#allocation4 + $0xac] ss:$16 sps:$4 sm:$0xff]   ;;  %v4807_v39 = vld [vmem:[#allocation4 + $0xa8] ss:$16 sps:$4 sm:$0xff]   ;;  %v77_v53 = vld [vmem:[%s5753_s3] sm:$0xf] }
  0x30   :  { %278 = vmatpush1.bf16.msra.mxu1 %v187_v19  ;;  %572 = vmatprep.subr.bf16.mxu0 %v4727_v18  ;;  %v4810_v40 = vld [vmem:[#allocation4 + $0x8c] ss:$16 sps:$4 sm:$0xff]   ;;  %v4815_v41 = vld [vmem:[#allocation4 + $0x88] ss:$16 sps:$4 sm:$0xff]   ;;  %v4883_v55 = vsub.s32 1, %v97_v51  ;;  %v99_v57 = vrot.slane %v77_v53, %v4878_v52 }
  0x31   :  { %234 = vmatprep.mubr.bf16.mxu1 %v5761_v0  ;;  %279 = vmatprep.subr.bf16.mxu1 %v4097_v23  ;;  %v4819_v42 = vld [vmem:[#allocation4 + $0x6c] ss:$16 sps:$4 sm:$0xff]   ;;  %v4825_v43 = vld [vmem:[#allocation4 + $0x68] ss:$16 sps:$4 sm:$0xff]  }
  0x32   :  { %v4828_v44 = vld [vmem:[#allocation4 + $0x4c] ss:$16 sps:$4 sm:$0xff]   ;;  %v4833_v45 = vld [vmem:[#allocation4 + $0x48] ss:$16 sps:$4 sm:$0xff]   ;;  %5772 = vst [vmem:[#allocation12_spill] sm:$0xff] %v4883_v55  ;;  %v103_v59 = vrot.slane %v77_v53, %v4883_v55  ;;  %v4915_v55 = vsub.s32 2, %v97_v51 }
  0x33   :  { %573 = vmatpush1.bf16.msra.mxu0 %v4733_v20  ;;  %v4837_v46 = vld [vmem:[#allocation4 + $0x2c] ss:$16 sps:$4 sm:$0xff]   ;;  %v4843_v47 = vld [vmem:[#allocation4 + $0x28] ss:$16 sps:$4 sm:$0xff]  }
  0x34   :  { %574 = vmatprep.subr.bf16.mxu0 %v4736_v21  ;;  %280 = vmatpush1.bf16.msra.mxu1 %v4095_v22  ;;  %v4846_v48 = vld [vmem:[#allocation4 + $0xc] ss:$16 sps:$4 sm:$0xff]   ;;  %v4854_v49 = vld [vmem:[#allocation4 + $0x8] ss:$16 sps:$4 sm:$0xff]   ;;  %5781 = vst [vmem:[#allocation21_spill] sm:$0xff] %v4915_v55 }
  0x35   :  { %607 = vmatprep.subr.bf16.mxu1 %v4755_v27 }
  0x37   :  { %3751 = vmatmul.mubr.msk.bf16.gmra.mxu1 %vm166_vm0, %v4087_v24  ;;  %575 = vmatpush1.bf16.msra.mxu0 %v4750_v25 }
  0x38   :  { %244 = vmatprep.mubr.bf16.mxu1 %v5761_v0  ;;  %576 = vmatprep.subr.bf16.mxu0 %v4753_v26 }
  0x3b   :  { %577 = vmatpush1.bf16.msra.mxu0 %v4759_v28 }
  0x3c   :  { %578 = vmatprep.subr.bf16.mxu0 %v4763_v29 }
  0x3f   :  { %3752 = vmatmul.mubr.msk.bf16.gmra.mxu1 %vm166_vm0, %v4094_v30  ;;  %579 = vmatpush1.bf16.msra.mxu0 %v4770_v31 }
  0x40   :  { %254 = vmatprep.mubr.bf16.mxu1 %v5761_v0  ;;  %580 = vmatprep.subr.bf16.mxu0 %v4773_v32 }
  0x43   :  { %581 = vmatpush1.bf16.msra.mxu0 %v4777_v33 }
  0x44   :  { %678 = vmatprep.subr.bf16.mxu0 %v4697_v4 }
  0x46   :  { %599 = vmatmul.mubr.bf16.vlgmr.msra.gmra.mxu0 %v5761_v0 }
  0x47   :  { %3753 = vmatmul.mubr.msk.bf16.gmra.mxu1 %vm166_vm0, %v4104_v34  ;;  %679 = vmatpush1.bf16.msra.mxu0 %v4699_v6 }
  0x48   :  { %297 = vmatprep.mubr.bf16.mxu1 %v5761_v0  ;;  %680 = vmatprep.subr.bf16.mxu0 %v4707_v9 }
  0x49   :  { %710 = vmatprep.mubr.bf16.mxu0 %v5761_v0 }
  0x4b   :  { %681 = vmatpush1.bf16.msra.mxu0 %v4713_v11 }
  0x4c   :  { %682 = vmatprep.subr.bf16.mxu0 %v4719_v14 }
  0x4f   :  { %3755 = vmatmul.mubr.msk.bf16.vlgmr.msra.gmra.mxu1 %vm166_vm0, %v4078_v16  ;;  %683 = vmatpush1.bf16.msra.mxu0 %v4725_v17 }
  0x50   :  { %608 = vmatpush1.bf16.msra.mxu1 %v4792_v35  ;;  %307 = vmatprep.mubr.bf16.mxu1 %v5761_v0 }
  0x51   :  { %609 = vmatprep.subr.bf16.mxu1 %v4794_v36  ;;  %684 = vmatprep.subr.bf16.mxu0 %v4727_v18 }
  0x53   :  { %685 = vmatpush1.bf16.msra.mxu0 %v4733_v20 }
  0x54   :  { %610 = vmatpush1.bf16.msra.mxu1 %v4798_v37  ;;  %686 = vmatprep.subr.bf16.mxu0 %v4736_v21 }
  0x55   :  { %611 = vmatprep.subr.bf16.mxu1 %v4801_v38 }
  0x57   :  { %3756 = vmatmul.mubr.msk.bf16.gmra.mxu1 %vm166_vm0, %v4087_v24  ;;  %687 = vmatpush1.bf16.msra.mxu0 %v4750_v25 }
  0x58   :  { %612 = vmatpush1.bf16.msra.mxu1 %v4807_v39  ;;  %317 = vmatprep.mubr.bf16.mxu1 %v5761_v0 }
  0x59   :  { %613 = vmatprep.subr.bf16.mxu1 %v4810_v40  ;;  %688 = vmatprep.subr.bf16.mxu0 %v4753_v26 }
  0x5b   :  { %689 = vmatpush1.bf16.msra.mxu0 %v4759_v28 }
  0x5c   :  { %614 = vmatpush1.bf16.msra.mxu1 %v4815_v41  ;;  %690 = vmatprep.subr.bf16.mxu0 %v4763_v29 }
  0x5d   :  { %615 = vmatprep.subr.bf16.mxu1 %v4819_v42 }
  0x5f   :  { %3757 = vmatmul.mubr.msk.bf16.gmra.mxu1 %vm166_vm0, %v4094_v30  ;;  %691 = vmatpush1.bf16.msra.mxu0 %v4770_v31 }
  0x60   :  { %616 = vmatpush1.bf16.msra.mxu1 %v4825_v43  ;;  %327 = vmatprep.mubr.bf16.mxu1 %v5761_v0 }
  0x61   :  { %617 = vmatprep.subr.bf16.mxu1 %v4828_v44  ;;  %692 = vmatprep.subr.bf16.mxu0 %v4773_v32 }
  0x63   :  { %693 = vmatpush1.bf16.msra.mxu0 %v4777_v33 }
  0x64   :  { %618 = vmatpush1.bf16.msra.mxu1 %v4833_v45  ;;  %790 = vmatprep.subr.bf16.mxu0 %v4697_v4 }
  0x65   :  { %619 = vmatprep.subr.bf16.mxu1 %v4837_v46 }
  0x67   :  { %3758 = vmatmul.mubr.msk.bf16.gmra.mxu1 %vm166_vm0, %v4104_v34 }
  0x68   :  { %620 = vmatpush1.bf16.msra.mxu1 %v4843_v47  ;;  %639 = vmatprep.mubr.bf16.mxu1 %v5761_v0 }
  0x69   :  { %621 = vmatprep.subr.bf16.mxu1 %v4846_v48 }
  0x6c   :  { %622 = vmatpush1.bf16.msra.mxu1 %v4854_v49 }
  0x6d   :  { %719 = vmatprep.subr.bf16.mxu1 %v4755_v27 }
  0x6f   :  { %640 = vmatmul.mubr.bf16.vlgmr.msra.gmra.mxu1 %v5761_v0 }
  0x70   :  { %720 = vmatpush1.bf16.msra.mxu1 %v4792_v35  ;;  %751 = vmatprep.mubr.bf16.mxu1 %v5761_v0 }
  0x71   :  { %721 = vmatprep.subr.bf16.mxu1 %v4794_v36 }
  0x74   :  { %722 = vmatpush1.bf16.msra.mxu1 %v4798_v37 }
  0x75   :  { %723 = vmatprep.subr.bf16.mxu1 %v4801_v38 }
  0x78   :  { %724 = vmatpush1.bf16.msra.mxu1 %v4807_v39 }
  0x79   :  { %725 = vmatprep.subr.bf16.mxu1 %v4810_v40 }
  0x7c   :  { %726 = vmatpush1.bf16.msra.mxu1 %v4815_v41 }
  0x7d   :  { %727 = vmatprep.subr.bf16.mxu1 %v4819_v42 }
  0x80   :  { %728 = vmatpush1.bf16.msra.mxu1 %v4825_v43 }
  0x81   :  { %729 = vmatprep.subr.bf16.mxu1 %v4828_v44 }
  0x84   :  { %730 = vmatpush1.bf16.msra.mxu1 %v4833_v45 }
  0x85   :  { %731 = vmatprep.subr.bf16.mxu1 %v4837_v46 }
  0x88   :  { %732 = vmatpush1.bf16.msra.mxu1 %v4843_v47 }
  0x89   :  { %733 = vmatprep.subr.bf16.mxu1 %v4846_v48 }
  0x8c   :  { %734 = vmatpush1.bf16.msra.mxu1 %v4854_v49 }
  0x8d   :  { %831 = vmatprep.subr.bf16.mxu1 %v4755_v27 }
  0xef   :  { %v226_v54 = vpop.f32.mrf.mxu1 }
  0xf0   :  { %v227_v0 = vadd.f32 %v226_v54, %v99_v57 }
  0xf1   :  { %v228_v56 = vpop.f32.mrf.mxu1 }
  0xf3   :  { %v230_v58 = vpop.f32.mrf.mxu1 }
  0xf4   :  { %v4887_v60 = vadd.f32 %v230_v58, %v99_v57 }
  0xf5   :  { %v232_v61 = vpop.f32.mrf.mxu1 }
  0xf6   :  { %v4889_v62 = vadd.f32 %v232_v61, %v103_v59 }
  0xf7   :  { %v236_v63 = vpop.f32.mrf.mxu1 }
  0xf8   :  { %v4891_v1 = vadd.f32 %v236_v63, %v99_v57 }
  0xf9   :  { %v238_v2 = vpop.f32.mrf.mxu1 }
  0xfa   :  { %v4893_v3 = vadd.f32 %v238_v2, %v103_v59 }
  0xfb   :  { %v240_v5 = vpop.f32.mrf.mxu1 }
  0xfc   :  { %v4895_v7 = vadd.f32 %v240_v5, %v99_v57 }
  0xfd   :  { %v242_v8 = vpop.f32.mrf.mxu1 }
  0xfe   :  { %v4897_v10 = vadd.f32 %v242_v8, %v103_v59 }
  0xff   :  { %v246_v12 = vpop.f32.mrf.mxu1 }
 0x100   :  { %v4899_v13 = vadd.f32 %v246_v12, %v99_v57 }
 0x101   :  { %v248_v15 = vpop.f32.mrf.mxu1 }
 0x102   :  { %5773 = vst [vmem:[#allocation13_spill] sm:$0xff] %v4899_v13  ;;  %v4901_v16 = vadd.f32 %v248_v15, %v103_v59 }
 0x103   :  { %v250_v19 = vpop.f32.mrf.mxu1 }
 0x104   :  { %5774 = vst [vmem:[#allocation14_spill] sm:$0xff] %v4901_v16  ;;  %v4903_v22 = vadd.f32 %v250_v19, %v99_v57 }
 0x105   :  { %v252_v23 = vpop.f32.mrf.mxu1 }
 0x106   :  { %5775 = vst [vmem:[#allocation15_spill] sm:$0xff] %v4903_v22  ;;  %v4905_v24 = vadd.f32 %v252_v23, %v103_v59  ;;  %v600_v34 = vpop.f32.mrf.mxu0  ;;  %v229_v23 = vadd.f32 %v228_v56, %v103_v59 }
 0x107   :  { %v256_v30 = vpop.f32.mrf.mxu1 }
 0x108   :  { %5776 = vst [vmem:[#allocation16_spill] sm:$0xff] %v4905_v24  ;;  %v4907_v50 = vadd.f32 %v256_v30, %v99_v57  ;;  %v602_v61 = vpop.f32.mrf.mxu0  ;;  %v648_v24 = vadd.f32 %v600_v34, %v227_v0  ;;  %v4917_v30 = vsub.s32 3, %v97_v51 }
 0x109   :  { %v258_v58 = vpop.f32.mrf.mxu1 }
 0x10a   :  { %5777 = vst [vmem:[#allocation17_spill] sm:$0xff] %v4907_v50  ;;  %v4909_v63 = vadd.f32 %v258_v58, %v103_v59  ;;  %v604_v5 = vpop.f32.mrf.mxu0  ;;  %5782 = vst [vmem:[#allocation22_spill] sm:$0xff] %v4917_v30  ;;  %v649_v50 = vadd.f32 %v602_v61, %v229_v23  ;;  %v107_v58 = vrot.slane %v77_v53, %v4915_v55 }
 0x10b   :  { %v260_v2 = vpop.f32.mrf.mxu1  ;;  %v652_v5 = vsub.f32 0.0, %v648_v24 }
 0x10c   :  { %5778 = vst [vmem:[#allocation18_spill] sm:$0xff] %v4909_v63  ;;  %v4911_v8 = vadd.f32 %v260_v2, %v99_v57  ;;  %v605_v15 = vpop.f32.mrf.mxu0  ;;  %v111_v2 = vrot.slane %v77_v53, %v4917_v30  ;;  %v657_v54 = vsub.f32 0.0, %v649_v50 }
 0x10d   :  { %v262_v12 = vpop.f32.mrf.mxu1  ;;  %v653_v56 = vmul.f32 1.442695, %v652_v5 }
 0x10e   :  { %5779 = vst [vmem:[#allocation19_spill] sm:$0xff] %v4911_v8  ;;  %v4913_v19 = vadd.f32 %v262_v12, %v103_v59  ;;  %v658_v0 = vmul.f32 1.442695, %v657_v54 }
 0x10f   :  { %v299_v52 = vpop.f32.mrf.mxu1  ;;  %4281 = vpow2.f32 %v653_v56 }
 0x110   :  { %5780 = vst [vmem:[#allocation20_spill] sm:$0xff] %v4913_v19  ;;  %4283 = vpow2.f32 %v658_v0  ;;  %v300_v13 = vadd.f32 %v299_v52, %v107_v58 }
 0x111   :  { %v301_v22 = vpop.f32.mrf.mxu1 }
 0x113   :  { %v303_v63 = vpop.f32.mrf.mxu1 }
 0x114   :  { %v4921_v8 = vadd.f32 %v303_v63, %v107_v58 }
 0x115   :  { %v305_v57 = vpop.f32.mrf.mxu1 }
 0x116   :  { %v4923_v12 = vadd.f32 %v305_v57, %v111_v2 }
 0x117   :  { %v309_v15 = vpop.f32.mrf.mxu1 }
 0x118   :  { %v4925_v59 = vadd.f32 %v309_v15, %v107_v58 }
 0x119   :  { %v311_v51 = vpop.f32.mrf.mxu1 }
 0x11a   :  { %v4927_v34 = vadd.f32 %v311_v51, %v111_v2 }
 0x11b   :  { %v313_v61 = vpop.f32.mrf.mxu1 }
 0x11c   :  { %v4929_v23 = vadd.f32 %v313_v61, %v107_v58  ;;  %v4282_v61 = vpop.eup %4281 }
 0x11d   :  { %v315_v53 = vpop.f32.mrf.mxu1  ;;  %v4284_v19 = vpop.eup %4283 }
 0x11e   :  { %5783 = vst [vmem:[#allocation23_spill] sm:$0xff] %v4929_v23  ;;  %v4931_v24 = vadd.f32 %v315_v53, %v111_v2 }
 0x11f   :  { %v319_v50 = vpop.f32.mrf.mxu1 }
 0x120   :  { %5784 = vst [vmem:[#allocation24_spill] sm:$0xff] %v4931_v24  ;;  %v4933_v63 = vadd.f32 %v319_v50, %v107_v58  ;;  %v655_v50 = vadd.f32 1.0, %v4282_v61 }
 0x121   :  { %v321_v57 = vpop.f32.mrf.mxu1 }
 0x122   :  { %5785 = vst [vmem:[#allocation25_spill] sm:$0xff] %v4933_v63  ;;  %v4935_v55 = vadd.f32 %v321_v57, %v111_v2  ;;  %v660_v57 = vadd.f32 1.0, %v4284_v19  ;;  %4285 = vrcp.f32 %v655_v50 }
 0x123   :  { %v323_v5 = vpop.f32.mrf.mxu1 }
 0x124   :  { %5786 = vst [vmem:[#allocation26_spill] sm:$0xff] %v4935_v55  ;;  %v4937_v15 = vadd.f32 %v323_v5, %v107_v58  ;;  %4287 = vrcp.f32 %v660_v57 }
 0x125   :  { %v325_v54 = vpop.f32.mrf.mxu1 }
 0x126   :  { %5787 = vst [vmem:[#allocation27_spill] sm:$0xff] %v4937_v15  ;;  %v4939_v51 = vadd.f32 %v325_v54, %v111_v2  ;;  %v302_v54 = vadd.f32 %v301_v22, %v111_v2 }
 0x127   :  { %v329_v30 = vpop.f32.mrf.mxu1 }
 0x128   :  { %5788 = vst [vmem:[#allocation28_spill] sm:$0xff] %v4939_v51  ;;  %v4941_v56 = vadd.f32 %v329_v30, %v107_v58 }
 0x129   :  { %v331_v0 = vpop.f32.mrf.mxu1 }
 0x12a   :  { %5789 = vst [vmem:[#allocation29_spill] sm:$0xff] %v4941_v56  ;;  %v4943_v53 = vadd.f32 %v331_v0, %v111_v2 }
 0x12b   :  { %v333_v16 = vpop.f32.mrf.mxu1 }
 0x12c   :  { %5790 = vst [vmem:[#allocation30_spill] sm:$0xff] %v4943_v53  ;;  %v4945_v63 = vadd.f32 %v333_v16, %v107_v58 }
 0x12d   :  { %v335_v55 = vpop.f32.mrf.mxu1 }
 0x12e   :  { %5791 = vst [vmem:[#allocation31_spill] sm:$0xff] %v4945_v63  ;;  %v4947_v5 = vadd.f32 %v335_v55, %v111_v2 }
 0x12f   :  { %v641_v15 = vpop.f32.mrf.mxu1  ;;  %v4286_v16 = vpop.eup %4285 }
 0x130   :  { %v650_v51 = vadd.f32 %v641_v15, %v300_v13 }
 0x131   :  { %v643_v30 = vpop.f32.mrf.mxu1  ;;  %v4288_v61 = vpop.eup %4287 }
 0x132   :  { %4289 = vtanh.f32 %v650_v51  ;;  %v651_v56 = vadd.f32 %v643_v30, %v302_v54  ;;  %v668_v52 = vmul.f32 0.0, %v4288_v61 }
 0x133   :  { %v645_v23 = vpop.f32.mrf.mxu1 }
 0x134   :  { %v663_v0 = vsub.f32 0.0, %v651_v56 }
 0x135   :  { %v646_v53 = vpop.f32.mrf.mxu1 }
 0x136   :  { %v664_v24 = vmul.f32 1.442695, %v663_v0 }
 0x138   :  { %4291 = vpow2.f32 %v664_v24  ;;  %v5792_v24 = vmov 0  }
 0x13f   :  { %v4290_v19 = vpop.eup %4289 }
 0x140   :  { %v669_v63 = vmul.f32 %v4290_v19, %v4286_v16 }
 0x142   :  { %v4949_v55 = vadd.f32 %v669_v63, %v668_v52 }
 0x144   :  { %4293 = vtanh.f32 %v4949_v55 }
 0x145   :  { %v4292_v58 = vpop.eup %4291 }
 0x146   :  { %v666_v50 = vadd.f32 1.0, %v4292_v58 }
 0x148   :  { %4295 = vrcp.f32 %v666_v50 }
 0x151   :  { %v4294_v13 = vpop.eup %4293 }
 0x155   :  { %v4296_v22 = vpop.eup %4295 }
 0x156   :  { %v672_v2 = vmul.f32 %v4296_v22, %v4294_v13 }
 0x158   :  { %v677_v23 = vpack.c.bf16 %v672_v2, %v672_v2 }
 0x15a   :  { %711 = vmatmul.mubr.bf16.vlgmr.msra.gmra.mxu0 %v677_v23  ;;  %752 = vmatmul.mubr.bf16.vlgmr.msra.gmra.mxu1 %v677_v23 }
 0x15b   :  { %791 = vmatpush1.bf16.msra.mxu0 %v4699_v6  ;;  %832 = vmatpush1.bf16.msra.mxu1 %v4792_v35 }
 0x15c   :  { %792 = vmatprep.subr.bf16.mxu0 %v4707_v9  ;;  %833 = vmatprep.subr.bf16.mxu1 %v4794_v36 }
 0x15d   :  { %822 = vmatprep.mubr.bf16.mxu0 %v5792_v24  ;;  %863 = vmatprep.mubr.bf16.mxu1 %v5792_v24 }
 0x15f   :  { %793 = vmatpush1.bf16.msra.mxu0 %v4713_v11  ;;  %834 = vmatpush1.bf16.msra.mxu1 %v4798_v37 }
 0x160   :  { %794 = vmatprep.subr.bf16.mxu0 %v4719_v14  ;;  %835 = vmatprep.subr.bf16.mxu1 %v4801_v38 }
 0x163   :  { %795 = vmatpush1.bf16.msra.mxu0 %v4725_v17  ;;  %836 = vmatpush1.bf16.msra.mxu1 %v4807_v39 }
 0x164   :  { %796 = vmatprep.subr.bf16.mxu0 %v4727_v18  ;;  %837 = vmatprep.subr.bf16.mxu1 %v4810_v40 }
 0x167   :  { %797 = vmatpush1.bf16.msra.mxu0 %v4733_v20  ;;  %838 = vmatpush1.bf16.msra.mxu1 %v4815_v41 }
 0x168   :  { %798 = vmatprep.subr.bf16.mxu0 %v4736_v21  ;;  %839 = vmatprep.subr.bf16.mxu1 %v4819_v42 }
 0x16b   :  { %799 = vmatpush1.bf16.msra.mxu0 %v4750_v25  ;;  %840 = vmatpush1.bf16.msra.mxu1 %v4825_v43 }
 0x16c   :  { %800 = vmatprep.subr.bf16.mxu0 %v4753_v26  ;;  %841 = vmatprep.subr.bf16.mxu1 %v4828_v44 }
 0x16f   :  { %801 = vmatpush1.bf16.msra.mxu0 %v4759_v28  ;;  %842 = vmatpush1.bf16.msra.mxu1 %v4833_v45 }
 0x170   :  { %802 = vmatprep.subr.bf16.mxu0 %v4763_v29  ;;  %843 = vmatprep.subr.bf16.mxu1 %v4837_v46 }
 0x173   :  { %803 = vmatpush1.bf16.msra.mxu0 %v4770_v31  ;;  %844 = vmatpush1.bf16.msra.mxu1 %v4843_v47 }
 0x174   :  { %804 = vmatprep.subr.bf16.mxu0 %v4773_v32  ;;  %845 = vmatprep.subr.bf16.mxu1 %v4846_v48 }
 0x177   :  { %805 = vmatpush1.bf16.msra.mxu0 %v4777_v33  ;;  %846 = vmatpush1.bf16.msra.mxu1 %v4854_v49 }
 0x178   :  { %902 = vmatprep.subr.bf16.mxu0 %v4697_v4  ;;  %943 = vmatprep.subr.bf16.mxu1 %v4755_v27 }
 0x21a   :  { %v712_v63 = vpop.f32.mrf.mxu0  ;;  %v753_v15 = vpop.f32.mrf.mxu1 }
 0x21b   :  { %v760_v51 = vadd.f32 %v712_v63, %v4887_v60  ;;  %v762_v13 = vadd.f32 %v753_v15, %v4921_v8 }
 0x21c   :  { %v714_v56 = vpop.f32.mrf.mxu0  ;;  %v755_v53 = vpop.f32.mrf.mxu1 }
 0x21d   :  { %v764_v57 = vsub.f32 0.0, %v760_v51  ;;  %v761_v54 = vadd.f32 %v714_v56, %v4889_v62  ;;  %v763_v4 = vadd.f32 %v755_v53, %v4923_v12 }
 0x21e   :  { %v716_v30 = vpop.f32.mrf.mxu0  ;;  %v757_v0 = vpop.f32.mrf.mxu1 }
 0x21f   :  { %v765_v16 = vmul.f32 1.442695, %v764_v57  ;;  %v769_v61 = vsub.f32 0.0, %v761_v54  ;;  %v775_v50 = vsub.f32 0.0, %v763_v4 }
 0x220   :  { %v717_v19 = vpop.f32.mrf.mxu0  ;;  %v758_v52 = vpop.f32.mrf.mxu1 }
 0x221   :  { %4297 = vpow2.f32 %v765_v16  ;;  %v770_v58 = vmul.f32 1.442695, %v769_v61  ;;  %v776_v60 = vmul.f32 1.442695, %v775_v50 }
 0x223   :  { %4299 = vpow2.f32 %v770_v58 }
 0x224   :  { %4301 = vtanh.f32 %v762_v13 }
 0x225   :  { %4303 = vpow2.f32 %v776_v60 }
 0x22e   :  { %v4298_v22 = vpop.eup %4297 }
 0x22f   :  { %v767_v2 = vadd.f32 1.0, %v4298_v22 }
 0x230   :  { %v4300_v23 = vpop.eup %4299 }
 0x231   :  { %4305 = vrcp.f32 %v767_v2  ;;  %v772_v62 = vadd.f32 1.0, %v4300_v23  ;;  %v4302_v63 = vpop.eup %4301 }
 0x232   :  { %v4304_v51 = vpop.eup %4303 }
 0x233   :  { %4307 = vrcp.f32 %v772_v62  ;;  %v778_v30 = vadd.f32 1.0, %v4304_v51 }
 0x235   :  { %4309 = vrcp.f32 %v778_v30  ;;  %v5038_v30 = vld [vmem:[#allocation4 + $0xe0] ss:$16 sps:$4 sm:$0xff]  }
 0x23e   :  { %v4306_v56 = vpop.eup %4305 }
 0x23f   :  { %v781_v57 = vmul.f32 %v4306_v56, %v4302_v63 }
 0x240   :  { %v4308_v54 = vpop.eup %4307 }
 0x241   :  { %v780_v12 = vmul.f32 %v4308_v54, %v4949_v55 }
 0x242   :  { %v4310_v8 = vpop.eup %4309 }
 0x243   :  { %v4991_v53 = vadd.f32 %v781_v57, %v780_v12  ;;  %v5042_v12 = vld [vmem:[#allocation4 + $0xc4] ss:$16 sps:$4 sm:$0xff]  }
 0x245   :  { %4311 = vtanh.f32 %v4991_v53 }
 0x252   :  { %v4312_v15 = vpop.eup %4311 }
 0x253   :  { %v784_v0 = vmul.f32 %v4312_v15, %v4310_v8  ;;  %v5052_v8 = vld [vmem:[#allocation4 + $0xa4] ss:$16 sps:$4 sm:$0xff]   ;;  %v5056_v15 = vld [vmem:[#allocation4 + $0xa0] ss:$16 sps:$4 sm:$0xff]  }
 0x255   :  { %v789_v16 = vpack.c.bf16 %v784_v0, %v784_v0  ;;  %v5060_v0 = vld [vmem:[#allocation4 + $0x84] ss:$16 sps:$4 sm:$0xff]  }
 0x257   :  { %823 = vmatmul.mubr.bf16.vlgmr.msra.gmra.mxu0 %v789_v16  ;;  %864 = vmatmul.mubr.bf16.vlgmr.msra.gmra.mxu1 %v789_v16  ;;  %v5064_v16 = vld [vmem:[#allocation4 + $0x80] ss:$16 sps:$4 sm:$0xff]  }
 0x258   :  { %903 = vmatpush1.bf16.msra.mxu0 %v4699_v6  ;;  %944 = vmatpush1.bf16.msra.mxu1 %v4792_v35  ;;  %v5026_v6 = vld [vmem:[#allocation4 + $0xe4] ss:$16 sps:$4 sm:$0xff]  }
 0x259   :  { %904 = vmatprep.subr.bf16.mxu0 %v4707_v9  ;;  %945 = vmatprep.subr.bf16.mxu1 %v4794_v36 }
 0x25a   :  { %934 = vmatprep.mubr.bf16.mxu0 %v5792_v24  ;;  %975 = vmatprep.mubr.bf16.mxu1 %v5792_v24 }
 0x25c   :  { %905 = vmatpush1.bf16.msra.mxu0 %v4713_v11  ;;  %946 = vmatpush1.bf16.msra.mxu1 %v4798_v37 }
 0x25d   :  { %906 = vmatprep.subr.bf16.mxu0 %v4719_v14  ;;  %947 = vmatprep.subr.bf16.mxu1 %v4801_v38 }
 0x260   :  { %907 = vmatpush1.bf16.msra.mxu0 %v4725_v17  ;;  %948 = vmatpush1.bf16.msra.mxu1 %v4807_v39 }
 0x261   :  { %908 = vmatprep.subr.bf16.mxu0 %v4727_v18  ;;  %949 = vmatprep.subr.bf16.mxu1 %v4810_v40 }
 0x264   :  { %909 = vmatpush1.bf16.msra.mxu0 %v4733_v20  ;;  %950 = vmatpush1.bf16.msra.mxu1 %v4815_v41 }
 0x265   :  { %910 = vmatprep.subr.bf16.mxu0 %v4736_v21  ;;  %951 = vmatprep.subr.bf16.mxu1 %v4819_v42 }
 0x268   :  { %911 = vmatpush1.bf16.msra.mxu0 %v4750_v25  ;;  %952 = vmatpush1.bf16.msra.mxu1 %v4825_v43 }
 0x269   :  { %912 = vmatprep.subr.bf16.mxu0 %v4753_v26  ;;  %953 = vmatprep.subr.bf16.mxu1 %v4828_v44 }
 0x26c   :  { %913 = vmatpush1.bf16.msra.mxu0 %v4759_v28  ;;  %954 = vmatpush1.bf16.msra.mxu1 %v4833_v45 }
 0x26d   :  { %914 = vmatprep.subr.bf16.mxu0 %v4763_v29  ;;  %955 = vmatprep.subr.bf16.mxu1 %v4837_v46 }
 0x270   :  { %915 = vmatpush1.bf16.msra.mxu0 %v4770_v31  ;;  %956 = vmatpush1.bf16.msra.mxu1 %v4843_v47 }
 0x271   :  { %916 = vmatprep.subr.bf16.mxu0 %v4773_v32  ;;  %957 = vmatprep.subr.bf16.mxu1 %v4846_v48 }
 0x274   :  { %917 = vmatpush1.bf16.msra.mxu0 %v4777_v33  ;;  %958 = vmatpush1.bf16.msra.mxu1 %v4854_v49 }
 0x275   :  { %1014 = vmatprep.subr.bf16.mxu0 %v5026_v6  ;;  %1055 = vmatprep.subr.bf16.mxu1 %v4755_v27 }
 0x317   :  { %v824_v9 = vpop.f32.mrf.mxu0  ;;  %v865_v11 = vpop.f32.mrf.mxu1 }
 0x318   :  { %v872_v14 = vadd.f32 %v824_v9, %v4891_v1  ;;  %v874_v58 = vadd.f32 %v865_v11, %v4925_v59  ;;  %v5068_v9 = vld [vmem:[#allocation4 + $0x64] ss:$16 sps:$4 sm:$0xff]   ;;  %v5072_v11 = vld [vmem:[#allocation4 + $0x60] ss:$16 sps:$4 sm:$0xff]  }
 0x319   :  { %v826_v17 = vpop.f32.mrf.mxu0  ;;  %v867_v18 = vpop.f32.mrf.mxu1 }
 0x31a   :  { %v876_v20 = vsub.f32 0.0, %v872_v14  ;;  %v873_v21 = vadd.f32 %v826_v17, %v4893_v3  ;;  %v875_v27 = vadd.f32 %v867_v18, %v4927_v34  ;;  %v5076_v14 = vld [vmem:[#allocation4 + $0x44] ss:$16 sps:$4 sm:$0xff]   ;;  %v5080_v17 = vld [vmem:[#allocation4 + $0x40] ss:$16 sps:$4 sm:$0xff]  }
 0x31b   :  { %v828_v25 = vpop.f32.mrf.mxu0  ;;  %v869_v26 = vpop.f32.mrf.mxu1  ;;  %v5084_v18 = vld [vmem:[#allocation4 + $0x24] ss:$16 sps:$4 sm:$0xff]  }
 0x31c   :  { %v877_v28 = vmul.f32 1.442695, %v876_v20  ;;  %v881_v29 = vsub.f32 0.0, %v873_v21  ;;  %v887_v52 = vsub.f32 0.0, %v875_v27  ;;  %v5095_v20 = vld [vmem:[#allocation4 + $0xec] ss:$16 sps:$4 sm:$0xff]  }
 0x31d   :  { %v829_v55 = vpop.f32.mrf.mxu0  ;;  %v870_v61 = vpop.f32.mrf.mxu1 }
 0x31e   :  { %4313 = vpow2.f32 %v877_v28  ;;  %v882_v19 = vmul.f32 1.442695, %v881_v29  ;;  %v888_v1 = vmul.f32 1.442695, %v887_v52 }
 0x320   :  { %4315 = vpow2.f32 %v882_v19 }
 0x321   :  { %4317 = vtanh.f32 %v874_v58 }
 0x322   :  { %4319 = vpow2.f32 %v888_v1  ;;  %v5793_v1 = vld [vmem:[#allocation24_spill] sm:$0xff] }
 0x32b   :  { %v4314_v4 = vpop.eup %4313 }
 0x32c   :  { %v879_v50 = vadd.f32 1.0, %v4314_v4 }
 0x32d   :  { %v4316_v13 = vpop.eup %4315 }
 0x32e   :  { %4321 = vrcp.f32 %v879_v50  ;;  %v884_v3 = vadd.f32 1.0, %v4316_v13  ;;  %v4318_v60 = vpop.eup %4317  ;;  %v5794_v13 = vld [vmem:[#allocation23_spill] sm:$0xff] }
 0x32f   :  { %v4320_v22 = vpop.eup %4319 }
 0x330   :  { %4323 = vrcp.f32 %v884_v3  ;;  %v890_v63 = vadd.f32 1.0, %v4320_v22 }
 0x332   :  { %4325 = vrcp.f32 %v890_v63 }
 0x33b   :  { %v4322_v2 = vpop.eup %4321 }
 0x33c   :  { %v893_v23 = vmul.f32 %v4322_v2, %v4318_v60 }
 0x33d   :  { %v4324_v62 = vpop.eup %4323 }
 0x33e   :  { %v892_v34 = vmul.f32 %v4324_v62, %v4991_v53  ;;  %v5048_v53 = vld [vmem:[#allocation4 + $0xc0] ss:$16 sps:$4 sm:$0xff]  }
 0x33f   :  { %v4326_v59 = vpop.eup %4325 }
 0x340   :  { %v5035_v51 = vadd.f32 %v893_v23, %v892_v34 }
 0x342   :  { %4327 = vtanh.f32 %v5035_v51 }
 0x34f   :  { %v4328_v56 = vpop.eup %4327 }
 0x350   :  { %v896_v57 = vmul.f32 %v4328_v56, %v4326_v59 }
 0x352   :  { %v901_v54 = vpack.c.bf16 %v896_v57, %v896_v57 }
 0x354   :  { %935 = vmatmul.mubr.bf16.vlgmr.msra.gmra.mxu0 %v901_v54  ;;  %976 = vmatmul.mubr.bf16.vlgmr.msra.gmra.mxu1 %v901_v54 }
 0x355   :  { %1015 = vmatpush1.bf16.msra.mxu0 %v5038_v30  ;;  %1056 = vmatpush1.bf16.msra.mxu1 %v4792_v35 }
 0x356   :  { %1016 = vmatprep.subr.bf16.mxu0 %v5042_v12  ;;  %1057 = vmatprep.subr.bf16.mxu1 %v4794_v36 }
 0x357   :  { %1046 = vmatprep.mubr.bf16.mxu0 %v5792_v24  ;;  %1087 = vmatprep.mubr.bf16.mxu1 %v5792_v24 }
 0x359   :  { %1017 = vmatpush1.bf16.msra.mxu0 %v5048_v53  ;;  %1058 = vmatpush1.bf16.msra.mxu1 %v4798_v37 }
 0x35a   :  { %1018 = vmatprep.subr.bf16.mxu0 %v5052_v8  ;;  %1059 = vmatprep.subr.bf16.mxu1 %v4801_v38 }
 0x35d   :  { %1019 = vmatpush1.bf16.msra.mxu0 %v5056_v15  ;;  %1060 = vmatpush1.bf16.msra.mxu1 %v4807_v39 }
 0x35e   :  { %1020 = vmatprep.subr.bf16.mxu0 %v5060_v0  ;;  %1061 = vmatprep.subr.bf16.mxu1 %v4810_v40 }
 0x361   :  { %1021 = vmatpush1.bf16.msra.mxu0 %v5064_v16  ;;  %1062 = vmatpush1.bf16.msra.mxu1 %v4815_v41 }
 0x362   :  { %1022 = vmatprep.subr.bf16.mxu0 %v5068_v9  ;;  %1063 = vmatprep.subr.bf16.mxu1 %v4819_v42 }
 0x365   :  { %1023 = vmatpush1.bf16.msra.mxu0 %v5072_v11  ;;  %1064 = vmatpush1.bf16.msra.mxu1 %v4825_v43 }
 0x366   :  { %1024 = vmatprep.subr.bf16.mxu0 %v5076_v14  ;;  %1065 = vmatprep.subr.bf16.mxu1 %v4828_v44 }
 0x369   :  { %1025 = vmatpush1.bf16.msra.mxu0 %v5080_v17  ;;  %1066 = vmatpush1.bf16.msra.mxu1 %v4833_v45 }
 0x36a   :  { %1026 = vmatprep.subr.bf16.mxu0 %v5084_v18  ;;  %1067 = vmatprep.subr.bf16.mxu1 %v4837_v46 }
 0x36d   :  { %1027 = vmatpush1.bf16.msra.mxu0 %v4770_v31  ;;  %1068 = vmatpush1.bf16.msra.mxu1 %v4843_v47 }
 0x36e   :  { %1028 = vmatprep.subr.bf16.mxu0 %v4773_v32  ;;  %1069 = vmatprep.subr.bf16.mxu1 %v4846_v48 }
 0x371   :  { %1029 = vmatpush1.bf16.msra.mxu0 %v4777_v33  ;;  %1070 = vmatpush1.bf16.msra.mxu1 %v4854_v49 }
 0x372   :  { %1126 = vmatprep.subr.bf16.mxu0 %v5026_v6  ;;  %1167 = vmatprep.subr.bf16.mxu1 %v5095_v20 }
 0x414   :  { %v936_v21 = vpop.f32.mrf.mxu0  ;;  %v977_v25 = vpop.f32.mrf.mxu1 }
 0x415   :  { %v984_v31 = vadd.f32 %v936_v21, %v4895_v7  ;;  %v986_v3 = vadd.f32 %v977_v25, %v5794_v13 }
 0x416   :  { %v938_v26 = vpop.f32.mrf.mxu0  ;;  %v979_v28 = vpop.f32.mrf.mxu1 }
 0x417   :  { %v988_v29 = vsub.f32 0.0, %v984_v31  ;;  %v985_v32 = vadd.f32 %v938_v26, %v4897_v10  ;;  %v987_v4 = vadd.f32 %v979_v28, %v5793_v1 }
 0x418   :  { %v940_v55 = vpop.f32.mrf.mxu0  ;;  %v981_v61 = vpop.f32.mrf.mxu1 }
 0x419   :  { %v989_v33 = vmul.f32 1.442695, %v988_v29  ;;  %v993_v19 = vsub.f32 0.0, %v985_v32  ;;  %v999_v50 = vsub.f32 0.0, %v987_v4 }
 0x41a   :  { %v941_v27 = vpop.f32.mrf.mxu0  ;;  %v982_v52 = vpop.f32.mrf.mxu1 }
 0x41b   :  { %4329 = vpow2.f32 %v989_v33  ;;  %v994_v58 = vmul.f32 1.442695, %v993_v19  ;;  %v1000_v7 = vmul.f32 1.442695, %v999_v50  ;;  %v5797_v19 = vld [vmem:[#allocation26_spill] sm:$0xff] }
 0x41d   :  { %4331 = vpow2.f32 %v994_v58  ;;  %v5798_v58 = vld [vmem:[#allocation25_spill] sm:$0xff] }
 0x41e   :  { %4333 = vtanh.f32 %v986_v3 }
 0x41f   :  { %4335 = vpow2.f32 %v1000_v7 }
 0x428   :  { %v4330_v60 = vpop.eup %4329 }
 0x429   :  { %v991_v22 = vadd.f32 1.0, %v4330_v60 }
 0x42a   :  { %v4332_v2 = vpop.eup %4331 }
 0x42b   :  { %4337 = vrcp.f32 %v991_v22  ;;  %v996_v10 = vadd.f32 1.0, %v4332_v2  ;;  %v4334_v23 = vpop.eup %4333 }
 0x42c   :  { %v4336_v62 = vpop.eup %4335 }
 0x42d   :  { %4339 = vrcp.f32 %v996_v10  ;;  %v1002_v56 = vadd.f32 1.0, %v4336_v62 }
 0x42f   :  { %4341 = vrcp.f32 %v1002_v56 }
 0x438   :  { %v4338_v63 = vpop.eup %4337 }
 0x439   :  { %v1005_v34 = vmul.f32 %v4338_v63, %v4334_v23 }
 0x43a   :  { %v4340_v59 = vpop.eup %4339 }
 0x43b   :  { %v1004_v57 = vmul.f32 %v4340_v59, %v5035_v51 }
 0x43c   :  { %v4342_v21 = vpop.eup %4341 }
 0x43d   :  { %v5103_v54 = vadd.f32 %v1005_v34, %v1004_v57 }
 0x43f   :  { %4343 = vtanh.f32 %v5103_v54 }
 0x44c   :  { %v4344_v25 = vpop.eup %4343 }
 0x44d   :  { %v1008_v31 = vmul.f32 %v4344_v25, %v4342_v21  ;;  %v5155_v25 = vld [vmem:[#allocation4 + $0xe8] ss:$16 sps:$4 sm:$0xff]  }
 0x44f   :  { %v1013_v26 = vpack.c.bf16 %v1008_v31, %v1008_v31  ;;  %v5165_v31 = vld [vmem:[#allocation4 + $0xc8] ss:$16 sps:$4 sm:$0xff]  }
 0x451   :  { %1047 = vmatmul.mubr.bf16.vlgmr.msra.gmra.mxu0 %v1013_v26  ;;  %1088 = vmatmul.mubr.bf16.vlgmr.msra.gmra.mxu1 %v1013_v26  ;;  %v5169_v26 = vld [vmem:[#allocation4 + $0xac] ss:$16 sps:$4 sm:$0xff]  }
 0x452   :  { %1127 = vmatpush1.bf16.msra.mxu0 %v5038_v30  ;;  %1168 = vmatpush1.bf16.msra.mxu1 %v4792_v35  ;;  %v5132_v35 = vld [vmem:[#allocation4 + $0x20] ss:$16 sps:$4 sm:$0xff]  }
 0x453   :  { %1128 = vmatprep.subr.bf16.mxu0 %v5042_v12  ;;  %1169 = vmatprep.subr.bf16.mxu1 %v4794_v36  ;;  %v5136_v36 = vld [vmem:[#allocation4 + $0x4] ss:$16 sps:$4 sm:$0xff]  }
 0x454   :  { %1158 = vmatprep.mubr.bf16.mxu0 %v5792_v24  ;;  %1199 = vmatprep.mubr.bf16.mxu1 %v5792_v24 }
 0x456   :  { %1129 = vmatpush1.bf16.msra.mxu0 %v5048_v53  ;;  %1170 = vmatpush1.bf16.msra.mxu1 %v4798_v37  ;;  %v5140_v37 = vld [vmem:[#allocation4] ss:$16 sps:$4 sm:$0xff]  }
 0x457   :  { %1130 = vmatprep.subr.bf16.mxu0 %v5052_v8  ;;  %1171 = vmatprep.subr.bf16.mxu1 %v4801_v38 }
 0x45a   :  { %1131 = vmatpush1.bf16.msra.mxu0 %v5056_v15  ;;  %1172 = vmatpush1.bf16.msra.mxu1 %v4807_v39 }
 0x45b   :  { %1132 = vmatprep.subr.bf16.mxu0 %v5060_v0  ;;  %1173 = vmatprep.subr.bf16.mxu1 %v4810_v40  ;;  %v5795_v40 = vld [vmem:[#allocation13_spill] sm:$0xff] }
 0x45e   :  { %1133 = vmatpush1.bf16.msra.mxu0 %v5064_v16  ;;  %1174 = vmatpush1.bf16.msra.mxu1 %v4815_v41 }
 0x45f   :  { %1134 = vmatprep.subr.bf16.mxu0 %v5068_v9  ;;  %1175 = vmatprep.subr.bf16.mxu1 %v4819_v42 }
 0x462   :  { %1135 = vmatpush1.bf16.msra.mxu0 %v5072_v11  ;;  %1176 = vmatpush1.bf16.msra.mxu1 %v4825_v43 }
 0x463   :  { %1136 = vmatprep.subr.bf16.mxu0 %v5076_v14  ;;  %1177 = vmatprep.subr.bf16.mxu1 %v4828_v44 }
 0x466   :  { %1137 = vmatpush1.bf16.msra.mxu0 %v5080_v17  ;;  %1178 = vmatpush1.bf16.msra.mxu1 %v4833_v45  ;;  %v5796_v45 = vld [vmem:[#allocation14_spill] sm:$0xff] }
 0x467   :  { %1138 = vmatprep.subr.bf16.mxu0 %v5084_v18  ;;  %1179 = vmatprep.subr.bf16.mxu1 %v4837_v46 }
 0x46a   :  { %1139 = vmatpush1.bf16.msra.mxu0 %v5132_v35  ;;  %1180 = vmatpush1.bf16.msra.mxu1 %v4843_v47 }
 0x46b   :  { %1140 = vmatprep.subr.bf16.mxu0 %v5136_v36  ;;  %1181 = vmatprep.subr.bf16.mxu1 %v4846_v48 }
 0x46e   :  { %1141 = vmatpush1.bf16.msra.mxu0 %v5140_v37  ;;  %1182 = vmatpush1.bf16.msra.mxu1 %v4854_v49 }
 0x46f   :  { %1238 = vmatprep.subr.bf16.mxu0 %v5026_v6  ;;  %1279 = vmatprep.subr.bf16.mxu1 %v5095_v20 }
 0x511   :  { %v1048_v38 = vpop.f32.mrf.mxu0  ;;  %v1089_v39 = vpop.f32.mrf.mxu1 }
 0x512   :  { %v1096_v41 = vadd.f32 %v1048_v38, %v5795_v40  ;;  %v1098_v1 = vadd.f32 %v1089_v39, %v5798_v58  ;;  %v5173_v38 = vld [vmem:[#allocation4 + $0xa8] ss:$16 sps:$4 sm:$0xff]   ;;  %v5177_v39 = vld [vmem:[#allocation4 + $0x8c] ss:$16 sps:$4 sm:$0xff]  }
 0x513   :  { %v1050_v42 = vpop.f32.mrf.mxu0  ;;  %v1091_v43 = vpop.f32.mrf.mxu1  ;;  %v5181_v40 = vld [vmem:[#allocation4 + $0x88] ss:$16 sps:$4 sm:$0xff]  }
 0x514   :  { %v1100_v44 = vsub.f32 0.0, %v1096_v41  ;;  %v1097_v46 = vadd.f32 %v1050_v42, %v5796_v45  ;;  %v1099_v27 = vadd.f32 %v1091_v43, %v5797_v19  ;;  %v5185_v41 = vld [vmem:[#allocation4 + $0x6c] ss:$16 sps:$4 sm:$0xff]   ;;  %v5189_v42 = vld [vmem:[#allocation4 + $0x68] ss:$16 sps:$4 sm:$0xff]  }
 0x515   :  { %v1052_v51 = vpop.f32.mrf.mxu0  ;;  %v1093_v28 = vpop.f32.mrf.mxu1  ;;  %v5193_v43 = vld [vmem:[#allocation4 + $0x4c] ss:$16 sps:$4 sm:$0xff]  }
 0x516   :  { %v1101_v29 = vmul.f32 1.442695, %v1100_v44  ;;  %v1105_v32 = vsub.f32 0.0, %v1097_v46  ;;  %v1111_v52 = vsub.f32 0.0, %v1099_v27  ;;  %v5197_v44 = vld [vmem:[#allocation4 + $0x48] ss:$16 sps:$4 sm:$0xff]  }
 0x517   :  { %v1053_v55 = vpop.f32.mrf.mxu0  ;;  %v1094_v61 = vpop.f32.mrf.mxu1  ;;  %v5201_v45 = vld [vmem:[#allocation4 + $0x2c] ss:$16 sps:$4 sm:$0xff]   ;;  %v5799_v28 = vld [vmem:[#allocation15_spill] sm:$0xff] }
 0x518   :  { %4345 = vpow2.f32 %v1101_v29  ;;  %v1106_v33 = vmul.f32 1.442695, %v1105_v32  ;;  %v1112_v4 = vmul.f32 1.442695, %v1111_v52 }
 0x51a   :  { %4347 = vpow2.f32 %v1106_v33 }
 0x51b   :  { %4349 = vtanh.f32 %v1098_v1 }
 0x51c   :  { %4351 = vpow2.f32 %v1112_v4 }
 0x525   :  { %v4346_v50 = vpop.eup %4345 }
 0x526   :  { %v1103_v13 = vadd.f32 1.0, %v4346_v50  ;;  %v5802_v50 = vld [vmem:[#allocation27_spill] sm:$0xff] }
 0x527   :  { %v4348_v3 = vpop.eup %4347 }
 0x528   :  { %4353 = vrcp.f32 %v1103_v13  ;;  %v1108_v7 = vadd.f32 1.0, %v4348_v3  ;;  %v4350_v60 = vpop.eup %4349 }
 0x529   :  { %v4352_v22 = vpop.eup %4351 }
 0x52a   :  { %4355 = vrcp.f32 %v1108_v7  ;;  %v1114_v62 = vadd.f32 1.0, %v4352_v22 }
 0x52c   :  { %4357 = vrcp.f32 %v1114_v62 }
 0x535   :  { %v4354_v2 = vpop.eup %4353 }
 0x536   :  { %v1117_v10 = vmul.f32 %v4354_v2, %v4350_v60 }
 0x537   :  { %v4356_v23 = vpop.eup %4355 }
 0x538   :  { %v1116_v63 = vmul.f32 %v4356_v23, %v5103_v54  ;;  %v5159_v54 = vld [vmem:[#allocation4 + $0xcc] ss:$16 sps:$4 sm:$0xff]  }
 0x539   :  { %v4358_v59 = vpop.eup %4357 }
 0x53a   :  { %v5151_v34 = vadd.f32 %v1117_v10, %v1116_v63 }
 0x53c   :  { %4359 = vtanh.f32 %v5151_v34 }
 0x549   :  { %v4360_v56 = vpop.eup %4359 }
 0x54a   :  { %v1120_v57 = vmul.f32 %v4360_v56, %v4358_v59 }
 0x54c   :  { %v1125_v21 = vpack.c.bf16 %v1120_v57, %v1120_v57 }
 0x54e   :  { %1159 = vmatmul.mubr.bf16.vlgmr.msra.gmra.mxu0 %v1125_v21  ;;  %1200 = vmatmul.mubr.bf16.vlgmr.msra.gmra.mxu1 %v1125_v21 }
 0x54f   :  { %1239 = vmatpush1.bf16.msra.mxu0 %v5038_v30  ;;  %1280 = vmatpush1.bf16.msra.mxu1 %v5155_v25 }
 0x550   :  { %1240 = vmatprep.subr.bf16.mxu0 %v5042_v12  ;;  %1281 = vmatprep.subr.bf16.mxu1 %v5159_v54 }
 0x551   :  { %1270 = vmatprep.mubr.bf16.mxu0 %v5792_v24  ;;  %1311 = vmatprep.mubr.bf16.mxu1 %v5792_v24 }
 0x553   :  { %1241 = vmatpush1.bf16.msra.mxu0 %v5048_v53  ;;  %1282 = vmatpush1.bf16.msra.mxu1 %v5165_v31 }
 0x554   :  { %1242 = vmatprep.subr.bf16.mxu0 %v5052_v8  ;;  %1283 = vmatprep.subr.bf16.mxu1 %v5169_v26 }
 0x557   :  { %1243 = vmatpush1.bf16.msra.mxu0 %v5056_v15  ;;  %1284 = vmatpush1.bf16.msra.mxu1 %v5173_v38 }
 0x558   :  { %1244 = vmatprep.subr.bf16.mxu0 %v5060_v0  ;;  %1285 = vmatprep.subr.bf16.mxu1 %v5177_v39 }
 0x55b   :  { %1245 = vmatpush1.bf16.msra.mxu0 %v5064_v16  ;;  %1286 = vmatpush1.bf16.msra.mxu1 %v5181_v40 }
 0x55c   :  { %1246 = vmatprep.subr.bf16.mxu0 %v5068_v9  ;;  %1287 = vmatprep.subr.bf16.mxu1 %v5185_v41 }
 0x55f   :  { %1247 = vmatpush1.bf16.msra.mxu0 %v5072_v11  ;;  %1288 = vmatpush1.bf16.msra.mxu1 %v5189_v42 }
 0x560   :  { %1248 = vmatprep.subr.bf16.mxu0 %v5076_v14  ;;  %1289 = vmatprep.subr.bf16.mxu1 %v5193_v43 }
 0x563   :  { %1249 = vmatpush1.bf16.msra.mxu0 %v5080_v17  ;;  %1290 = vmatpush1.bf16.msra.mxu1 %v5197_v44 }
 0x564   :  { %1250 = vmatprep.subr.bf16.mxu0 %v5084_v18  ;;  %1291 = vmatprep.subr.bf16.mxu1 %v5201_v45 }
 0x567   :  { %1251 = vmatpush1.bf16.msra.mxu0 %v5132_v35  ;;  %1292 = vmatpush1.bf16.msra.mxu1 %v4843_v47  ;;  %v5800_v47 = vld [vmem:[#allocation16_spill] sm:$0xff] }
 0x568   :  { %1252 = vmatprep.subr.bf16.mxu0 %v5136_v36  ;;  %1293 = vmatprep.subr.bf16.mxu1 %v4846_v48 }
 0x56b   :  { %1253 = vmatpush1.bf16.msra.mxu0 %v5140_v37  ;;  %1294 = vmatpush1.bf16.msra.mxu1 %v4854_v49 }
 0x56c   :  { %1350 = vmatprep.subr.bf16.mxu0 %v5026_v6  ;;  %1391 = vmatprep.subr.bf16.mxu1 %v5095_v20  ;;  %v5801_v6 = vld [vmem:[#allocation28_spill] sm:$0xff] }
 0x60e   :  { %v1160_v46 = vpop.f32.mrf.mxu0  ;;  %v1201_v51 = vpop.f32.mrf.mxu1 }
 0x60f   :  { %v1208_v29 = vadd.f32 %v1160_v46, %v5799_v28  ;;  %v1210_v13 = vadd.f32 %v1201_v51, %v5802_v50  ;;  %v4129_v50 = vld [vmem:[#allocation6 + $0xe0] ss:$16 sps:$4 sm:$0xff]  }
 0x610   :  { %v1162_v32 = vpop.f32.mrf.mxu0  ;;  %v1203_v55 = vpop.f32.mrf.mxu1 }
 0x611   :  { %v1212_v61 = vsub.f32 0.0, %v1208_v29  ;;  %v1209_v33 = vadd.f32 %v1162_v32, %v5800_v47  ;;  %v1211_v20 = vadd.f32 %v1203_v55, %v5801_v6 }
 0x612   :  { %v1164_v19 = vpop.f32.mrf.mxu0  ;;  %v1205_v27 = vpop.f32.mrf.mxu1 }
 0x613   :  { %v1213_v48 = vmul.f32 1.442695, %v1212_v61  ;;  %v1217_v52 = vsub.f32 0.0, %v1209_v33  ;;  %v1223_v4 = vsub.f32 0.0, %v1211_v20  ;;  %v4131_v20 = vld [vmem:[#allocation6 + $0xe4] ss:$16 sps:$4 sm:$0xff]  }
 0x614   :  { %v1165_v58 = vpop.f32.mrf.mxu0  ;;  %v1206_v1 = vpop.f32.mrf.mxu1 }
 0x615   :  { %4361 = vpow2.f32 %v1213_v48  ;;  %v1218_v49 = vmul.f32 1.442695, %v1217_v52  ;;  %v1224_v3 = vmul.f32 1.442695, %v1223_v4  ;;  %v4134_v4 = vld [vmem:[#allocation6 + $0xec] ss:$16 sps:$4 sm:$0xff]  }
 0x617   :  { %4363 = vpow2.f32 %v1218_v49 }
 0x618   :  { %4365 = vtanh.f32 %v1210_v13  ;;  %v4132_v13 = vld [vmem:[#allocation6 + $0xe8] ss:$16 sps:$4 sm:$0xff]  }
 0x619   :  { %4367 = vpow2.f32 %v1224_v3  ;;  %v4137_v3 = vld [vmem:[#allocation6 + $0xc4] ss:$16 sps:$4 sm:$0xff]  }
 0x622   :  { %v4362_v7 = vpop.eup %4361 }
 0x623   :  { %v1215_v60 = vadd.f32 1.0, %v4362_v7  ;;  %v4140_v7 = vld [vmem:[#allocation6 + $0xcc] ss:$16 sps:$4 sm:$0xff]  }
 0x624   :  { %v4364_v22 = vpop.eup %4363 }
 0x625   :  { %4369 = vrcp.f32 %v1215_v60  ;;  %v1220_v2 = vadd.f32 1.0, %v4364_v22  ;;  %v4366_v10 = vpop.eup %4365  ;;  %v4135_v60 = vld [vmem:[#allocation6 + $0xc0] ss:$16 sps:$4 sm:$0xff]   ;;  %v4138_v22 = vld [vmem:[#allocation6 + $0xc8] ss:$16 sps:$4 sm:$0xff]  }
 0x626   :  { %v4368_v23 = vpop.eup %4367 }
 0x627   :  { %4371 = vrcp.f32 %v1220_v2  ;;  %v1226_v56 = vadd.f32 1.0, %v4368_v23  ;;  %v4143_v2 = vld [vmem:[#allocation6 + $0xa4] ss:$16 sps:$4 sm:$0xff]   ;;  %v4141_v23 = vld [vmem:[#allocation6 + $0xa0] ss:$16 sps:$4 sm:$0xff]  }
 0x629   :  { %4373 = vrcp.f32 %v1226_v56  ;;  %v4147_v56 = vld [vmem:[#allocation6 + $0x80] ss:$16 sps:$4 sm:$0xff]  }
 0x632   :  { %v4370_v62 = vpop.eup %4369 }
 0x633   :  { %v1229_v63 = vmul.f32 %v4370_v62, %v4366_v10  ;;  %v4146_v10 = vld [vmem:[#allocation6 + $0xac] ss:$16 sps:$4 sm:$0xff]   ;;  %v4144_v62 = vld [vmem:[#allocation6 + $0xa8] ss:$16 sps:$4 sm:$0xff]  }
 0x634   :  { %v4372_v59 = vpop.eup %4371 }
 0x635   :  { %v1228_v57 = vmul.f32 %v4372_v59, %v5151_v34  ;;  %v4152_v59 = vld [vmem:[#allocation6 + $0x8c] ss:$16 sps:$4 sm:$0xff]  }
 0x636   :  { %v4374_v46 = vpop.eup %4373 }
 0x637   :  { %v5217_v21 = vadd.f32 %v1229_v63, %v1228_v57  ;;  %v4149_v63 = vld [vmem:[#allocation6 + $0x84] ss:$16 sps:$4 sm:$0xff]   ;;  %v4150_v57 = vld [vmem:[#allocation6 + $0x88] ss:$16 sps:$4 sm:$0xff]  }
 0x639   :  { %4375 = vtanh.f32 %v5217_v21 }
 0x646   :  { %v4376_v51 = vpop.eup %4375 }
 0x647   :  { %v1232_v28 = vmul.f32 %v4376_v51, %v4374_v46  ;;  %v4158_v46 = vld [vmem:[#allocation6 + $0x6c] ss:$16 sps:$4 sm:$0xff]   ;;  %v4153_v51 = vld [vmem:[#allocation6 + $0x60] ss:$16 sps:$4 sm:$0xff]  }
 0x649   :  { %v1237_v29 = vpack.c.bf16 %v1232_v28, %v1232_v28  ;;  %v4156_v28 = vld [vmem:[#allocation6 + $0x68] ss:$16 sps:$4 sm:$0xff]  }
 0x64b   :  { %1271 = vmatmul.mubr.bf16.vlgmr.msra.gmra.mxu0 %v1237_v29  ;;  %1312 = vmatmul.mubr.bf16.vlgmr.msra.gmra.mxu1 %v1237_v29  ;;  %v4161_v29 = vld [vmem:[#allocation6 + $0x44] ss:$16 sps:$4 sm:$0xff]  }
 0x64c   :  { %1351 = vmatpush1.bf16.msra.mxu0 %v5038_v30  ;;  %1392 = vmatpush1.bf16.msra.mxu1 %v5155_v25  ;;  %v4550_v30 = vld [vmem:[#allocation4 + $0x28] ss:$16 sps:$4 sm:$0xff]  }
 0x64d   :  { %1352 = vmatprep.subr.bf16.mxu0 %v5042_v12  ;;  %1393 = vmatprep.subr.bf16.mxu1 %v5159_v54  ;;  %v4551_v12 = vld [vmem:[#allocation4 + $0xc] ss:$16 sps:$4 sm:$0xff]  }
 0x64e   :  { %1382 = vmatprep.mubr.bf16.mxu0 %v5792_v24  ;;  %1423 = vmatprep.mubr.bf16.mxu1 %v5792_v24 }
 0x650   :  { %1353 = vmatpush1.bf16.msra.mxu0 %v5048_v53  ;;  %1394 = vmatpush1.bf16.msra.mxu1 %v5165_v31  ;;  %v4552_v53 = vld [vmem:[#allocation4 + $0x8] ss:$16 sps:$4 sm:$0xff]  }
 0x651   :  { %1354 = vmatprep.subr.bf16.mxu0 %v5052_v8  ;;  %1395 = vmatprep.subr.bf16.mxu1 %v5169_v26 }
 0x654   :  { %1355 = vmatpush1.bf16.msra.mxu0 %v5056_v15  ;;  %1396 = vmatpush1.bf16.msra.mxu1 %v5173_v38 }
 0x655   :  { %1356 = vmatprep.subr.bf16.mxu0 %v5060_v0  ;;  %1397 = vmatprep.subr.bf16.mxu1 %v5177_v39  ;;  %v5803_v0 = vld [vmem:[#allocation17_spill] sm:$0xff] }
 0x658   :  { %1357 = vmatpush1.bf16.msra.mxu0 %v5064_v16  ;;  %1398 = vmatpush1.bf16.msra.mxu1 %v5181_v40  ;;  %v5806_v40 = vld [vmem:[#allocation29_spill] sm:$0xff] }
 0x659   :  { %1358 = vmatprep.subr.bf16.mxu0 %v5068_v9  ;;  %1399 = vmatprep.subr.bf16.mxu1 %v5185_v41 }
 0x65c   :  { %1359 = vmatpush1.bf16.msra.mxu0 %v5072_v11  ;;  %1400 = vmatpush1.bf16.msra.mxu1 %v5189_v42 }
 0x65d   :  { %1360 = vmatprep.subr.bf16.mxu0 %v5076_v14  ;;  %1401 = vmatprep.subr.bf16.mxu1 %v5193_v43 }
 0x660   :  { %1361 = vmatpush1.bf16.msra.mxu0 %v5080_v17  ;;  %1402 = vmatpush1.bf16.msra.mxu1 %v5197_v44  ;;  %v5804_v17 = vld [vmem:[#allocation18_spill] sm:$0xff] }
 0x661   :  { %1362 = vmatprep.subr.bf16.mxu0 %v5084_v18  ;;  %1403 = vmatprep.subr.bf16.mxu1 %v5201_v45 }
 0x664   :  { %1363 = vmatpush1.bf16.msra.mxu0 %v5132_v35  ;;  %1404 = vmatpush1.bf16.msra.mxu1 %v4550_v30  ;;  %v4164_v30 = vld [vmem:[#allocation6 + $0x4c] ss:$16 sps:$4 sm:$0xff]  }
 0x665   :  { %1364 = vmatprep.subr.bf16.mxu0 %v5136_v36  ;;  %1405 = vmatprep.subr.bf16.mxu1 %v4551_v12  ;;  %v4159_v12 = vld [vmem:[#allocation6 + $0x40] ss:$16 sps:$4 sm:$0xff]  }
 0x668   :  { %1365 = vmatpush1.bf16.msra.mxu0 %v5140_v37  ;;  %1406 = vmatpush1.bf16.msra.mxu1 %v4552_v53  ;;  %v5805_v37 = vld [vmem:[#allocation30_spill] sm:$0xff] }
 0x669   :  { %1671 = vmatprep.subr.bf16.mxu0 %v4131_v20  ;;  %1712 = vmatprep.subr.bf16.mxu1 %v4134_v4  ;;  %v4162_v53 = vld [vmem:[#allocation6 + $0x48] ss:$16 sps:$4 sm:$0xff]  }
 0x70b   :  { %v1272_v8 = vpop.f32.mrf.mxu0  ;;  %v1313_v15 = vpop.f32.mrf.mxu1 }
 0x70c   :  { %v1320_v16 = vadd.f32 %v1272_v8, %v5803_v0  ;;  %v1322_v41 = vadd.f32 %v1313_v15, %v5806_v40  ;;  %v4167_v8 = vld [vmem:[#allocation6 + $0x24] ss:$16 sps:$4 sm:$0xff]   ;;  %v4170_v15 = vld [vmem:[#allocation6 + $0x2c] ss:$16 sps:$4 sm:$0xff]   ;;  %v4165_v0 = vld [vmem:[#allocation6 + $0x20] ss:$16 sps:$4 sm:$0xff]  }
 0x70d   :  { %v1274_v9 = vpop.f32.mrf.mxu0  ;;  %v1315_v11 = vpop.f32.mrf.mxu1 }
 0x70e   :  { %v1324_v14 = vsub.f32 0.0, %v1320_v16  ;;  %v1321_v18 = vadd.f32 %v1274_v9, %v5804_v17  ;;  %v1323_v38 = vadd.f32 %v1315_v11, %v5805_v37  ;;  %v4168_v16 = vld [vmem:[#allocation6 + $0x28] ss:$16 sps:$4 sm:$0xff]   ;;  %v4173_v9 = vld [vmem:[#allocation6 + $0x4] ss:$16 sps:$4 sm:$0xff]  }
 0x70f   :  { %v1276_v35 = vpop.f32.mrf.mxu0  ;;  %v1317_v34 = vpop.f32.mrf.mxu1  ;;  %v4176_v11 = vld [vmem:[#allocation6 + $0xc] ss:$16 sps:$4 sm:$0xff]   ;;  %v4174_v17 = vld [vmem:[#allocation6 + $0x8] ss:$16 sps:$4 sm:$0xff]  }
 0x710   :  { %v1325_v25 = vmul.f32 1.442695, %v1324_v14  ;;  %v1329_v54 = vsub.f32 0.0, %v1321_v18  ;;  %v1335_v39 = vsub.f32 0.0, %v1323_v38  ;;  %v4171_v14 = vld [vmem:[#allocation6] ss:$16 sps:$4 sm:$0xff]  }
 0x711   :  { %v1277_v36 = vpop.f32.mrf.mxu0  ;;  %v1318_v31 = vpop.f32.mrf.mxu1  ;;  %v5807_v34 = vld [vmem:[#allocation19_spill] sm:$0xff] }
 0x712   :  { %4377 = vpow2.f32 %v1325_v25  ;;  %v1330_v26 = vmul.f32 1.442695, %v1329_v54  ;;  %v1336_v42 = vmul.f32 1.442695, %v1335_v39 }
 0x714   :  { %4379 = vpow2.f32 %v1330_v26  ;;  %v5808_v26 = vld [vmem:[#allocation20_spill] sm:$0xff] }
 0x715   :  { %4381 = vtanh.f32 %v1322_v41 }
 0x716   :  { %4383 = vpow2.f32 %v1336_v42 }
 0x71f   :  { %v4378_v43 = vpop.eup %4377 }
 0x720   :  { %v1327_v44 = vadd.f32 1.0, %v4378_v43 }
 0x721   :  { %v4380_v45 = vpop.eup %4379 }
 0x722   :  { %4385 = vrcp.f32 %v1327_v44  ;;  %v1332_v32 = vadd.f32 1.0, %v4380_v45  ;;  %v4382_v55 = vpop.eup %4381 }
 0x723   :  { %v4384_v61 = vpop.eup %4383 }
 0x724   :  { %4387 = vrcp.f32 %v1332_v32  ;;  %v1338_v27 = vadd.f32 1.0, %v4384_v61 }
 0x726   :  { %4389 = vrcp.f32 %v1338_v27 }
 0x72f   :  { %v4386_v47 = vpop.eup %4385 }
 0x730   :  { %v1341_v33 = vmul.f32 %v4386_v47, %v4382_v55  ;;  %v5809_v55 = vld [vmem:[#allocation31_spill] sm:$0xff] }
 0x731   :  { %v4388_v19 = vpop.eup %4387 }
 0x732   :  { %v1340_v48 = vmul.f32 %v4388_v19, %v5217_v21  ;;  %v4155_v21 = vld [vmem:[#allocation6 + $0x64] ss:$16 sps:$4 sm:$0xff]  }
 0x733   :  { %v4390_v58 = vpop.eup %4389 }
 0x734   :  { %v5254_v52 = vadd.f32 %v1341_v33, %v1340_v48 }
 0x736   :  { %4391 = vtanh.f32 %v5254_v52 }
 0x743   :  { %v4392_v1 = vpop.eup %4391 }
 0x744   :  { %v1344_v49 = vmul.f32 %v4392_v1, %v4390_v58 }
 0x746   :  { %v1349_v6 = vpack.c.bf16 %v1344_v49, %v1344_v49 }
 0x748   :  { %1383 = vmatmul.mubr.bf16.vlgmr.msra.gmra.mxu0 %v1349_v6  ;;  %1424 = vmatmul.mubr.bf16.vlgmr.msra.gmra.mxu1 %v1349_v6 }
 0x749   :  { %1703 = vmatprep.mubr.bf16.mxu0 %v5792_v24  ;;  %1744 = vmatprep.mubr.bf16.mxu1 %v5792_v24 }
 0x74a   :  { %1672 = vmatpush1.bf16.msra.mxu0 %v4129_v50  ;;  %1713 = vmatpush1.bf16.msra.mxu1 %v4132_v13 }
 0x74b   :  { %1673 = vmatprep.subr.bf16.mxu0 %v4137_v3  ;;  %1714 = vmatprep.subr.bf16.mxu1 %v4140_v7 }
 0x74e   :  { %1674 = vmatpush1.bf16.msra.mxu0 %v4135_v60  ;;  %1715 = vmatpush1.bf16.msra.mxu1 %v4138_v22  ;;  %v5269_v22 = vld [vmem:[#allocation8 + $0xe4] ss:$16 sps:$4 sm:$0xff]  }
 0x74f   :  { %1675 = vmatprep.subr.bf16.mxu0 %v4143_v2  ;;  %1716 = vmatprep.subr.bf16.mxu1 %v4146_v10  ;;  %v5271_v2 = vld [vmem:[#allocation8 + $0xec] ss:$16 sps:$4 sm:$0xff]   ;;  %v5275_v10 = vld [vmem:[#allocation8 + $0xe8] ss:$16 sps:$4 sm:$0xff]  }
 0x752   :  { %1676 = vmatpush1.bf16.msra.mxu0 %v4141_v23  ;;  %1717 = vmatpush1.bf16.msra.mxu1 %v4144_v62  ;;  %v5281_v23 = vld [vmem:[#allocation8 + $0xc4] ss:$16 sps:$4 sm:$0xff]   ;;  %v5283_v62 = vld [vmem:[#allocation8 + $0xcc] ss:$16 sps:$4 sm:$0xff]  }
 0x753   :  { %1677 = vmatprep.subr.bf16.mxu0 %v4149_v63  ;;  %1718 = vmatprep.subr.bf16.mxu1 %v4152_v59  ;;  %v5285_v63 = vld [vmem:[#allocation8 + $0xc0] ss:$16 sps:$4 sm:$0xff]   ;;  %v5287_v59 = vld [vmem:[#allocation8 + $0xc8] ss:$16 sps:$4 sm:$0xff]  }
 0x756   :  { %1678 = vmatpush1.bf16.msra.mxu0 %v4147_v56  ;;  %1719 = vmatpush1.bf16.msra.mxu1 %v4150_v57  ;;  %v5293_v56 = vld [vmem:[#allocation8 + $0xa4] ss:$16 sps:$4 sm:$0xff]   ;;  %v5295_v57 = vld [vmem:[#allocation8 + $0xac] ss:$16 sps:$4 sm:$0xff]  }
 0x757   :  { %1679 = vmatprep.subr.bf16.mxu0 %v4155_v21  ;;  %1720 = vmatprep.subr.bf16.mxu1 %v4158_v46  ;;  %v5297_v21 = vld [vmem:[#allocation8 + $0xa0] ss:$16 sps:$4 sm:$0xff]   ;;  %v5299_v46 = vld [vmem:[#allocation8 + $0xa8] ss:$16 sps:$4 sm:$0xff]  }
 0x75a   :  { %1680 = vmatpush1.bf16.msra.mxu0 %v4153_v51  ;;  %1721 = vmatpush1.bf16.msra.mxu1 %v4156_v28  ;;  %v5305_v51 = vld [vmem:[#allocation8 + $0x84] ss:$16 sps:$4 sm:$0xff]   ;;  %v5307_v28 = vld [vmem:[#allocation8 + $0x8c] ss:$16 sps:$4 sm:$0xff]  }
 0x75b   :  { %1681 = vmatprep.subr.bf16.mxu0 %v4161_v29  ;;  %1722 = vmatprep.subr.bf16.mxu1 %v4164_v30  ;;  %v5309_v29 = vld [vmem:[#allocation8 + $0x80] ss:$16 sps:$4 sm:$0xff]   ;;  %v5311_v30 = vld [vmem:[#allocation8 + $0x88] ss:$16 sps:$4 sm:$0xff]  }
 0x75e   :  { %1682 = vmatpush1.bf16.msra.mxu0 %v4159_v12  ;;  %1723 = vmatpush1.bf16.msra.mxu1 %v4162_v53  ;;  %v5315_v12 = vld [vmem:[#allocation8 + $0x64] ss:$16 sps:$4 sm:$0xff]   ;;  %v5317_v53 = vld [vmem:[#allocation8 + $0x6c] ss:$16 sps:$4 sm:$0xff]  }
 0x75f   :  { %1683 = vmatprep.subr.bf16.mxu0 %v4167_v8  ;;  %1724 = vmatprep.subr.bf16.mxu1 %v4170_v15  ;;  %v5321_v8 = vld [vmem:[#allocation8 + $0x60] ss:$16 sps:$4 sm:$0xff]   ;;  %v5323_v15 = vld [vmem:[#allocation8 + $0x68] ss:$16 sps:$4 sm:$0xff]  }
 0x762   :  { %1684 = vmatpush1.bf16.msra.mxu0 %v4165_v0  ;;  %1725 = vmatpush1.bf16.msra.mxu1 %v4168_v16  ;;  %v5327_v0 = vld [vmem:[#allocation8 + $0x44] ss:$16 sps:$4 sm:$0xff]   ;;  %v5329_v16 = vld [vmem:[#allocation8 + $0x4c] ss:$16 sps:$4 sm:$0xff]  }
 0x763   :  { %1685 = vmatprep.subr.bf16.mxu0 %v4173_v9  ;;  %1726 = vmatprep.subr.bf16.mxu1 %v4176_v11  ;;  %v5333_v9 = vld [vmem:[#allocation8 + $0x40] ss:$16 sps:$4 sm:$0xff]   ;;  %v5335_v11 = vld [vmem:[#allocation8 + $0x48] ss:$16 sps:$4 sm:$0xff]  }
 0x766   :  { %1686 = vmatpush1.bf16.msra.mxu0 %v4171_v14  ;;  %1727 = vmatpush1.bf16.msra.mxu1 %v4174_v17  ;;  %v5339_v14 = vld [vmem:[#allocation8 + $0x24] ss:$16 sps:$4 sm:$0xff]   ;;  %v5341_v17 = vld [vmem:[#allocation8 + $0x2c] ss:$16 sps:$4 sm:$0xff]  }
 0x767   :  { %1989 = vmatprep.subr.bf16.mxu0 %v5269_v22  ;;  %2030 = vmatprep.subr.bf16.mxu1 %v5271_v2 }
 0x808   :  { %v1384_v18 = vpop.f32.mrf.mxu0  ;;  %v1425_v35 = vpop.f32.mrf.mxu1 }
 0x809   :  { %v1432_v25 = vadd.f32 %v1384_v18, %v5807_v34  ;;  %v1434_v61 = vadd.f32 %v1425_v35, %v5809_v55  ;;  %v5345_v18 = vld [vmem:[#allocation8 + $0x20] ss:$16 sps:$4 sm:$0xff]   ;;  %v5347_v35 = vld [vmem:[#allocation8 + $0x28] ss:$16 sps:$4 sm:$0xff]   ;;  %v5351_v34 = vld [vmem:[#allocation8 + $0x4] ss:$16 sps:$4 sm:$0xff]  }
 0x80a   :  { %v1386_v54 = vpop.f32.mrf.mxu0  ;;  %v1427_v36 = vpop.f32.mrf.mxu1 }
 0x80b   :  { %v1436_v31 = vsub.f32 0.0, %v1432_v25  ;;  %v1433_v37 = vadd.f32 %v1386_v54, %v5808_v26  ;;  %v1435_v45 = vadd.f32 %v1427_v36, %v4947_v5  ;;  %v5353_v25 = vld [vmem:[#allocation8 + $0xc] ss:$16 sps:$4 sm:$0xff]   ;;  %v5357_v54 = vld [vmem:[#allocation8] ss:$16 sps:$4 sm:$0xff]  }
 0x80c   :  { %v1388_v38 = vpop.f32.mrf.mxu0  ;;  %v1429_v39 = vpop.f32.mrf.mxu1  ;;  %v5359_v36 = vld [vmem:[#allocation8 + $0x8] ss:$16 sps:$4 sm:$0xff]   ;;  %v5810_v26 = vld [vmem:[#allocation11_spill] sm:$0xff] }
 0x80d   :  { %v1437_v40 = vmul.f32 1.442695, %v1436_v31  ;;  %v1441_v41 = vsub.f32 0.0, %v1433_v37  ;;  %v1447_v32 = vsub.f32 0.0, %v1435_v45  ;;  %v78_v31 = vld [vmem:[%s5755_s5] sm:$0xf] }
 0x80e   :  { %v1389_v42 = vpop.f32.mrf.mxu0  ;;  %v1430_v43 = vpop.f32.mrf.mxu1  ;;  %v1494_v37 = vrot.slane %v78_v31, %v5810_v26  ;;  %v5811_v38 = vld [vmem:[#allocation12_spill] sm:$0xff] }
 0x80f   :  { %4393 = vpow2.f32 %v1437_v40  ;;  %v1442_v44 = vmul.f32 1.442695, %v1441_v41  ;;  %v1448_v47 = vmul.f32 1.442695, %v1447_v32  ;;  %v1498_v39 = vrot.slane %v78_v31, %v5811_v38 }
 0x811   :  { %4395 = vpow2.f32 %v1442_v44 }
 0x812   :  { %4397 = vtanh.f32 %v1434_v61 }
 0x813   :  { %4399 = vpow2.f32 %v1448_v47 }
 0x81c   :  { %v4394_v33 = vpop.eup %4393 }
 0x81d   :  { %v1439_v19 = vadd.f32 1.0, %v4394_v33 }
 0x81e   :  { %v4396_v27 = vpop.eup %4395 }
 0x81f   :  { %4401 = vrcp.f32 %v1439_v19  ;;  %v1444_v48 = vadd.f32 1.0, %v4396_v27  ;;  %v4398_v58 = vpop.eup %4397  ;;  %v5812_v19 = vld [vmem:[#allocation22_spill] sm:$0xff] }
 0x820   :  { %v4400_v1 = vpop.eup %4399  ;;  %v1506_v27 = vrot.slane %v78_v31, %v5812_v19 }
 0x821   :  { %4403 = vrcp.f32 %v1444_v48  ;;  %v1450_v4 = vadd.f32 1.0, %v4400_v1 }
 0x823   :  { %4405 = vrcp.f32 %v1450_v4 }
 0x82c   :  { %v4402_v49 = vpop.eup %4401 }
 0x82d   :  { %v1453_v6 = vmul.f32 %v4402_v49, %v4398_v58 }
 0x82e   :  { %v4404_v20 = vpop.eup %4403 }
 0x82f   :  { %v1452_v5 = vmul.f32 %v4404_v20, %v5254_v52  ;;  %v5273_v52 = vld [vmem:[#allocation8 + $0xe0] ss:$16 sps:$4 sm:$0xff]  }
 0x830   :  { %v4406_v13 = vpop.eup %4405  ;;  %v5813_v20 = vld [vmem:[#allocation21_spill] sm:$0xff] }
 0x831   :  { %v5264_v50 = vadd.f32 %v1453_v6, %v1452_v5  ;;  %v1502_v4 = vrot.slane %v78_v31, %v5813_v20 }
 0x833   :  { %4407 = vtanh.f32 %v5264_v50 }
 0x840   :  { %v4408_v3 = vpop.eup %4407 }
 0x841   :  { %v1456_v7 = vmul.f32 %v4408_v3, %v4406_v13 }
 0x843   :  { %v1457_v60 = vpack.c.bf16 %v1456_v7, %v1456_v7 }
 0x845   :  { %1704 = vmatmul.mubr.bf16.vlgmr.msra.gmra.mxu0 %v1457_v60  ;;  %1745 = vmatmul.mubr.bf16.vlgmr.msra.gmra.mxu1 %v1457_v60 }
 0x846   :  { %2021 = vmatprep.mubr.bf16.mxu0 %v5792_v24  ;;  %2062 = vmatprep.mubr.bf16.mxu1 %v5792_v24 }
 0x847   :  { %1990 = vmatpush1.bf16.msra.mxu0 %v5273_v52  ;;  %2031 = vmatpush1.bf16.msra.mxu1 %v5275_v10 }
 0x848   :  { %1991 = vmatprep.subr.bf16.mxu0 %v5281_v23  ;;  %2032 = vmatprep.subr.bf16.mxu1 %v5283_v62 }
 0x84b   :  { %1992 = vmatpush1.bf16.msra.mxu0 %v5285_v63  ;;  %2033 = vmatpush1.bf16.msra.mxu1 %v5287_v59 }
 0x84c   :  { %1993 = vmatprep.subr.bf16.mxu0 %v5293_v56  ;;  %2034 = vmatprep.subr.bf16.mxu1 %v5295_v57 }
 0x84f   :  { %1994 = vmatpush1.bf16.msra.mxu0 %v5297_v21  ;;  %2035 = vmatpush1.bf16.msra.mxu1 %v5299_v46 }
 0x850   :  { %1995 = vmatprep.subr.bf16.mxu0 %v5305_v51  ;;  %2036 = vmatprep.subr.bf16.mxu1 %v5307_v28 }
 0x853   :  { %1996 = vmatpush1.bf16.msra.mxu0 %v5309_v29  ;;  %2037 = vmatpush1.bf16.msra.mxu1 %v5311_v30 }
 0x854   :  { %1997 = vmatprep.subr.bf16.mxu0 %v5315_v12  ;;  %2038 = vmatprep.subr.bf16.mxu1 %v5317_v53 }
 0x857   :  { %1998 = vmatpush1.bf16.msra.mxu0 %v5321_v8  ;;  %2039 = vmatpush1.bf16.msra.mxu1 %v5323_v15 }
 0x858   :  { %1999 = vmatprep.subr.bf16.mxu0 %v5327_v0  ;;  %2040 = vmatprep.subr.bf16.mxu1 %v5329_v16 }
 0x85b   :  { %2000 = vmatpush1.bf16.msra.mxu0 %v5333_v9  ;;  %2041 = vmatpush1.bf16.msra.mxu1 %v5335_v11 }
 0x85c   :  { %2001 = vmatprep.subr.bf16.mxu0 %v5339_v14  ;;  %2042 = vmatprep.subr.bf16.mxu1 %v5341_v17 }
 0x85f   :  { %2002 = vmatpush1.bf16.msra.mxu0 %v5345_v18  ;;  %2043 = vmatpush1.bf16.msra.mxu1 %v5347_v35 }
 0x860   :  { %2003 = vmatprep.subr.bf16.mxu0 %v5351_v34  ;;  %2044 = vmatprep.subr.bf16.mxu1 %v5353_v25 }
 0x863   :  { %2004 = vmatpush1.bf16.msra.mxu0 %v5357_v54  ;;  %2045 = vmatpush1.bf16.msra.mxu1 %v5359_v36 }
 0x864   :  { %2286 = vmatprep.subr.bf16.mxu0 %v5269_v22  ;;  %2327 = vmatprep.subr.bf16.mxu1 %v5271_v2 }
 0x905   :  { %v1705_v40 = vpop.f32.mrf.mxu0  ;;  %v1746_v41 = vpop.f32.mrf.mxu1 }
 0x906   :  { %v1706_v42 = vadd.f32 %v1705_v40, %v1494_v37  ;;  %v1747_v3 = vadd.f32 %v1746_v41, %v1502_v4 }
 0x907   :  { %v1707_v43 = vpop.f32.mrf.mxu0  ;;  %v1748_v44 = vpop.f32.mrf.mxu1 }
 0x908   :  { %v1753_v45 = vsub.f32 0.0, %v1706_v42  ;;  %v1708_v32 = vadd.f32 %v1707_v43, %v1498_v39  ;;  %v1749_v49 = vadd.f32 %v1748_v44, %v1506_v27 }
 0x909   :  { %v1709_v55 = vpop.f32.mrf.mxu0  ;;  %v1750_v61 = vpop.f32.mrf.mxu1 }
 0x90a   :  { %v1754_v47 = vmul.f32 1.442695, %v1753_v45  ;;  %v1758_v33 = vsub.f32 0.0, %v1708_v32  ;;  %v1764_v6 = vsub.f32 0.0, %v1749_v49 }
 0x90b   :  { %v1710_v48 = vpop.f32.mrf.mxu0  ;;  %v1751_v58 = vpop.f32.mrf.mxu1 }
 0x90c   :  { %4409 = vpow2.f32 %v1754_v47  ;;  %v1759_v1 = vmul.f32 1.442695, %v1758_v33  ;;  %v1765_v5 = vmul.f32 1.442695, %v1764_v6 }
 0x90e   :  { %4411 = vpow2.f32 %v1759_v1 }
 0x90f   :  { %4413 = vpow2.f32 %v1765_v5 }
 0x919   :  { %v4410_v13 = vpop.eup %4409 }
 0x91a   :  { %v1756_v7 = vadd.f32 1.0, %v4410_v13 }
 0x91b   :  { %v4412_v60 = vpop.eup %4411 }
 0x91c   :  { %4415 = vrcp.f32 %v1756_v7  ;;  %v1761_v37 = vadd.f32 1.0, %v4412_v60  ;;  %v4414_v39 = vpop.eup %4413 }
 0x91d   :  { %4417 = vtanh.f32 %v1747_v3  ;;  %v1767_v45 = vadd.f32 1.0, %v4414_v39 }
 0x91e   :  { %4419 = vrcp.f32 %v1761_v37 }
 0x91f   :  { %4421 = vrcp.f32 %v1767_v45 }
 0x929   :  { %v4416_v40 = vpop.eup %4415 }
 0x92a   :  { %v4418_v42 = vpop.eup %4417 }
 0x92b   :  { %v4420_v43 = vpop.eup %4419  ;;  %v1770_v32 = vmul.f32 %v4418_v42, %v4416_v40 }
 0x92c   :  { %v1769_v44 = vmul.f32 %v4420_v43, %v5264_v50  ;;  %v4422_v31 = vpop.eup %4421  ;;  %v79_v50 = vld [vmem:[%s5757_s7] sm:$0xf] }
 0x92d   :  { %v5420_v33 = vrot.slane %v79_v50, %v5810_v26  ;;  %v5423_v27 = vrot.slane %v79_v50, %v5811_v38  ;;  %v5428_v37 = vrot.slane %v79_v50, %v5812_v19  ;;  %v5432_v43 = vrot.slane %v79_v50, %v5813_v20 }
 0x92e   :  { %v5375_v55 = vadd.f32 %v1770_v32, %v1769_v44 }
 0x930   :  { %4423 = vtanh.f32 %v5375_v55 }
 0x93d   :  { %v4424_v41 = vpop.eup %4423 }
 0x93e   :  { %v5378_v61 = vmul.f32 %v4424_v41, %v4422_v31 }
 0x940   :  { %v1775_v47 = vpack.c.bf16 %v5378_v61, %v5378_v61 }
 0x942   :  { %2022 = vmatmul.mubr.bf16.vlgmr.msra.gmra.mxu0 %v1775_v47  ;;  %2063 = vmatmul.mubr.bf16.vlgmr.msra.gmra.mxu1 %v1775_v47 }
 0x943   :  { %2287 = vmatpush1.bf16.msra.mxu0 %v5273_v52  ;;  %2328 = vmatpush1.bf16.msra.mxu1 %v5275_v10 }
 0x944   :  { %2288 = vmatprep.subr.bf16.mxu0 %v5281_v23  ;;  %2329 = vmatprep.subr.bf16.mxu1 %v5283_v62 }
 0x945   :  { %2318 = vmatprep.mubr.bf16.mxu0 %v5792_v24  ;;  %2359 = vmatprep.mubr.bf16.mxu1 %v5792_v24 }
 0x947   :  { %2289 = vmatpush1.bf16.msra.mxu0 %v5285_v63  ;;  %2330 = vmatpush1.bf16.msra.mxu1 %v5287_v59 }
 0x948   :  { %2290 = vmatprep.subr.bf16.mxu0 %v5293_v56  ;;  %2331 = vmatprep.subr.bf16.mxu1 %v5295_v57 }
 0x94b   :  { %2291 = vmatpush1.bf16.msra.mxu0 %v5297_v21  ;;  %2332 = vmatpush1.bf16.msra.mxu1 %v5299_v46 }
 0x94c   :  { %2292 = vmatprep.subr.bf16.mxu0 %v5305_v51  ;;  %2333 = vmatprep.subr.bf16.mxu1 %v5307_v28 }
 0x94f   :  { %2293 = vmatpush1.bf16.msra.mxu0 %v5309_v29  ;;  %2334 = vmatpush1.bf16.msra.mxu1 %v5311_v30 }
 0x950   :  { %2294 = vmatprep.subr.bf16.mxu0 %v5315_v12  ;;  %2335 = vmatprep.subr.bf16.mxu1 %v5317_v53 }
 0x953   :  { %2295 = vmatpush1.bf16.msra.mxu0 %v5321_v8  ;;  %2336 = vmatpush1.bf16.msra.mxu1 %v5323_v15 }
 0x954   :  { %2296 = vmatprep.subr.bf16.mxu0 %v5327_v0  ;;  %2337 = vmatprep.subr.bf16.mxu1 %v5329_v16 }
 0x957   :  { %2297 = vmatpush1.bf16.msra.mxu0 %v5333_v9  ;;  %2338 = vmatpush1.bf16.msra.mxu1 %v5335_v11 }
 0x958   :  { %2298 = vmatprep.subr.bf16.mxu0 %v5339_v14  ;;  %2339 = vmatprep.subr.bf16.mxu1 %v5341_v17 }
 0x95b   :  { %2299 = vmatpush1.bf16.msra.mxu0 %v5345_v18  ;;  %2340 = vmatpush1.bf16.msra.mxu1 %v5347_v35 }
 0x95c   :  { %2300 = vmatprep.subr.bf16.mxu0 %v5351_v34  ;;  %2341 = vmatprep.subr.bf16.mxu1 %v5353_v25 }
 0x95f   :  { %2301 = vmatpush1.bf16.msra.mxu0 %v5357_v54  ;;  %2342 = vmatpush1.bf16.msra.mxu1 %v5359_v36 }
 0x960   :  { %2583 = vmatprep.subr.bf16.mxu0 %v5269_v22  ;;  %2624 = vmatprep.subr.bf16.mxu1 %v5271_v2 }
 0xa02   :  { %v2023_v48 = vpop.f32.mrf.mxu0  ;;  %v2064_v58 = vpop.f32.mrf.mxu1 }
 0xa03   :  { %v2024_v1 = vadd.f32 %v2023_v48, %v5420_v33  ;;  %v2065_v44 = vadd.f32 %v2064_v58, %v5432_v43 }
 0xa04   :  { %v2025_v49 = vpop.f32.mrf.mxu0  ;;  %v2066_v6 = vpop.f32.mrf.mxu1 }
 0xa05   :  { %v2071_v4 = vsub.f32 0.0, %v2024_v1  ;;  %v2026_v5 = vadd.f32 %v2025_v49, %v5423_v27  ;;  %v2067_v40 = vadd.f32 %v2066_v6, %v5428_v37 }
 0xa06   :  { %v2027_v13 = vpop.f32.mrf.mxu0  ;;  %v2068_v3 = vpop.f32.mrf.mxu1 }
 0xa07   :  { %v2072_v7 = vmul.f32 1.442695, %v2071_v4  ;;  %v2076_v60 = vsub.f32 0.0, %v2026_v5  ;;  %v2082_v42 = vsub.f32 0.0, %v2067_v40 }
 0xa08   :  { %v2028_v26 = vpop.f32.mrf.mxu0  ;;  %v2069_v39 = vpop.f32.mrf.mxu1 }
 0xa09   :  { %4425 = vpow2.f32 %v2072_v7  ;;  %v2077_v38 = vmul.f32 1.442695, %v2076_v60  ;;  %v2083_v45 = vmul.f32 1.442695, %v2082_v42 }
 0xa0b   :  { %4427 = vpow2.f32 %v2077_v38 }
 0xa0c   :  { %4429 = vpow2.f32 %v2083_v45 }
 0xa16   :  { %v4426_v32 = vpop.eup %4425 }
 0xa17   :  { %v2074_v31 = vadd.f32 1.0, %v4426_v32 }
 0xa18   :  { %v4428_v41 = vpop.eup %4427 }
 0xa19   :  { %4431 = vrcp.f32 %v2074_v31  ;;  %v2079_v19 = vadd.f32 1.0, %v4428_v41  ;;  %v4430_v47 = vpop.eup %4429 }
 0xa1a   :  { %4433 = vtanh.f32 %v2065_v44  ;;  %v2085_v6 = vadd.f32 1.0, %v4430_v47 }
 0xa1b   :  { %4435 = vrcp.f32 %v2079_v19 }
 0xa1c   :  { %4437 = vrcp.f32 %v2085_v6 }
 0xa26   :  { %v4432_v48 = vpop.eup %4431 }
 0xa27   :  { %v4434_v1 = vpop.eup %4433 }
 0xa28   :  { %v4436_v49 = vpop.eup %4435  ;;  %v2088_v4 = vmul.f32 %v4434_v1, %v4432_v48 }
 0xa29   :  { %v2087_v20 = vmul.f32 %v4436_v49, %v5375_v55  ;;  %v4438_v58 = vpop.eup %4437 }
 0xa2b   :  { %v5436_v50 = vadd.f32 %v2088_v4, %v2087_v20 }
 0xa2d   :  { %4439 = vtanh.f32 %v5436_v50 }
 0xa3a   :  { %v4440_v5 = vpop.eup %4439 }
 0xa3b   :  { %v5439_v13 = vmul.f32 %v4440_v5, %v4438_v58 }
 0xa3d   :  { %v2093_v3 = vpack.c.bf16 %v5439_v13, %v5439_v13 }
 0xa3f   :  { %2319 = vmatmul.mubr.bf16.vlgmr.msra.gmra.mxu0 %v2093_v3  ;;  %2360 = vmatmul.mubr.bf16.vlgmr.msra.gmra.mxu1 %v2093_v3 }
 0xa40   :  { %2584 = vmatpush1.bf16.msra.mxu0 %v5273_v52  ;;  %2625 = vmatpush1.bf16.msra.mxu1 %v5275_v10 }
 0xa41   :  { %2585 = vmatprep.subr.bf16.mxu0 %v5281_v23  ;;  %2626 = vmatprep.subr.bf16.mxu1 %v5283_v62 }
 0xa42   :  { %2615 = vmatprep.mubr.bf16.mxu0 %v5792_v24  ;;  %2656 = vmatprep.mubr.bf16.mxu1 %v5792_v24 }
 0xa44   :  { %2586 = vmatpush1.bf16.msra.mxu0 %v5285_v63  ;;  %2627 = vmatpush1.bf16.msra.mxu1 %v5287_v59 }
 0xa45   :  { %2587 = vmatprep.subr.bf16.mxu0 %v5293_v56  ;;  %2628 = vmatprep.subr.bf16.mxu1 %v5295_v57 }
 0xa48   :  { %2588 = vmatpush1.bf16.msra.mxu0 %v5297_v21  ;;  %2629 = vmatpush1.bf16.msra.mxu1 %v5299_v46 }
 0xa49   :  { %2589 = vmatprep.subr.bf16.mxu0 %v5305_v51  ;;  %2630 = vmatprep.subr.bf16.mxu1 %v5307_v28 }
 0xa4c   :  { %2590 = vmatpush1.bf16.msra.mxu0 %v5309_v29  ;;  %2631 = vmatpush1.bf16.msra.mxu1 %v5311_v30 }
 0xa4d   :  { %2591 = vmatprep.subr.bf16.mxu0 %v5315_v12  ;;  %2632 = vmatprep.subr.bf16.mxu1 %v5317_v53 }
 0xa50   :  { %2592 = vmatpush1.bf16.msra.mxu0 %v5321_v8  ;;  %2633 = vmatpush1.bf16.msra.mxu1 %v5323_v15 }
 0xa51   :  { %2593 = vmatprep.subr.bf16.mxu0 %v5327_v0  ;;  %2634 = vmatprep.subr.bf16.mxu1 %v5329_v16 }
 0xa54   :  { %2594 = vmatpush1.bf16.msra.mxu0 %v5333_v9  ;;  %2635 = vmatpush1.bf16.msra.mxu1 %v5335_v11 }
 0xa55   :  { %2595 = vmatprep.subr.bf16.mxu0 %v5339_v14  ;;  %2636 = vmatprep.subr.bf16.mxu1 %v5341_v17 }
 0xa58   :  { %2596 = vmatpush1.bf16.msra.mxu0 %v5345_v18  ;;  %2637 = vmatpush1.bf16.msra.mxu1 %v5347_v35 }
 0xa59   :  { %2597 = vmatprep.subr.bf16.mxu0 %v5351_v34  ;;  %2638 = vmatprep.subr.bf16.mxu1 %v5353_v25 }
 0xa5c   :  { %2598 = vmatpush1.bf16.msra.mxu0 %v5357_v54  ;;  %2639 = vmatpush1.bf16.msra.mxu1 %v5359_v36 }
 0xa5d   :  { %2880 = vmatprep.subr.bf16.mxu0 %v5269_v22  ;;  %2921 = vmatprep.subr.bf16.mxu1 %v5271_v2 }
 0xaff   :  { %v2320_v55 = vpop.f32.mrf.mxu0  ;;  %v2361_v7 = vpop.f32.mrf.mxu1 }
 0xb00   :  { %v2321_v60 = vadd.f32 %v2320_v55, %v5420_v33  ;;  %v2362_v1 = vadd.f32 %v2361_v7, %v5432_v43 }
 0xb01   :  { %v2322_v26 = vpop.f32.mrf.mxu0  ;;  %v2363_v39 = vpop.f32.mrf.mxu1 }
 0xb02   :  { %v2368_v38 = vsub.f32 0.0, %v2321_v60  ;;  %v2323_v40 = vadd.f32 %v2322_v26, %v5423_v27  ;;  %v2364_v22 = vadd.f32 %v2363_v39, %v5428_v37 }
 0xb03   :  { %v2324_v42 = vpop.f32.mrf.mxu0  ;;  %v2365_v45 = vpop.f32.mrf.mxu1 }
 0xb04   :  { %v2369_v32 = vmul.f32 1.442695, %v2368_v38  ;;  %v2373_v44 = vsub.f32 0.0, %v2323_v40  ;;  %v2379_v2 = vsub.f32 0.0, %v2364_v22  ;;  %v5541_v22 = vld [vmem:[#allocation8 + $0xe8] ss:$16 sps:$4 sm:$0xff]  }
 0xb05   :  { %v2325_v31 = vpop.f32.mrf.mxu0  ;;  %v2366_v41 = vpop.f32.mrf.mxu1 }
 0xb06   :  { %4441 = vpow2.f32 %v2369_v32  ;;  %v2374_v19 = vmul.f32 1.442695, %v2373_v44  ;;  %v2380_v47 = vmul.f32 1.442695, %v2379_v2  ;;  %v5535_v31 = vld [vmem:[#allocation8 + $0xe4] ss:$16 sps:$4 sm:$0xff]  }
 0xb07   :  { %v5537_v41 = vld [vmem:[#allocation8 + $0xec] ss:$16 sps:$4 sm:$0xff]   ;;  %v5547_v2 = vld [vmem:[#allocation8 + $0xc4] ss:$16 sps:$4 sm:$0xff]  }
 0xb08   :  { %4443 = vpow2.f32 %v2374_v19  ;;  %v5539_v19 = vld [vmem:[#allocation8 + $0xe0] ss:$16 sps:$4 sm:$0xff]  }
 0xb09   :  { %4445 = vpow2.f32 %v2380_v47  ;;  %v5549_v47 = vld [vmem:[#allocation8 + $0xcc] ss:$16 sps:$4 sm:$0xff]  }
 0xb13   :  { %v4442_v48 = vpop.eup %4441 }
 0xb14   :  { %v2371_v49 = vadd.f32 1.0, %v4442_v48  ;;  %v5551_v48 = vld [vmem:[#allocation8 + $0xc0] ss:$16 sps:$4 sm:$0xff]  }
 0xb15   :  { %v4444_v6 = vpop.eup %4443 }
 0xb16   :  { %4447 = vrcp.f32 %v2371_v49  ;;  %v2376_v4 = vadd.f32 1.0, %v4444_v6  ;;  %v4446_v20 = vpop.eup %4445  ;;  %v5559_v49 = vld [vmem:[#allocation8 + $0xa4] ss:$16 sps:$4 sm:$0xff]   ;;  %v5561_v6 = vld [vmem:[#allocation8 + $0xac] ss:$16 sps:$4 sm:$0xff]  }
 0xb17   :  { %4449 = vtanh.f32 %v2362_v1  ;;  %v2382_v55 = vadd.f32 1.0, %v4446_v20  ;;  %v5553_v1 = vld [vmem:[#allocation8 + $0xc8] ss:$16 sps:$4 sm:$0xff]  }
 0xb18   :  { %4451 = vrcp.f32 %v2376_v4  ;;  %v5563_v4 = vld [vmem:[#allocation8 + $0xa0] ss:$16 sps:$4 sm:$0xff]   ;;  %v5565_v20 = vld [vmem:[#allocation8 + $0xa8] ss:$16 sps:$4 sm:$0xff]  }
 0xb19   :  { %4453 = vrcp.f32 %v2382_v55  ;;  %v5577_v55 = vld [vmem:[#allocation8 + $0x88] ss:$16 sps:$4 sm:$0xff]  }
 0xb23   :  { %v4448_v58 = vpop.eup %4447 }
 0xb24   :  { %v4450_v5 = vpop.eup %4449 }
 0xb25   :  { %v4452_v3 = vpop.eup %4451  ;;  %v2385_v60 = vmul.f32 %v4450_v5, %v4448_v58  ;;  %v5571_v58 = vld [vmem:[#allocation8 + $0x84] ss:$16 sps:$4 sm:$0xff]   ;;  %v5573_v5 = vld [vmem:[#allocation8 + $0x8c] ss:$16 sps:$4 sm:$0xff]  }
 0xb26   :  { %v2384_v26 = vmul.f32 %v4452_v3, %v5436_v50  ;;  %v4454_v7 = vpop.eup %4453  ;;  %v5575_v3 = vld [vmem:[#allocation8 + $0x80] ss:$16 sps:$4 sm:$0xff]  }
 0xb28   :  { %v5482_v39 = vadd.f32 %v2385_v60, %v2384_v26  ;;  %v5581_v60 = vld [vmem:[#allocation8 + $0x64] ss:$16 sps:$4 sm:$0xff]   ;;  %v5583_v26 = vld [vmem:[#allocation8 + $0x6c] ss:$16 sps:$4 sm:$0xff]  }
 0xb2a   :  { %4455 = vtanh.f32 %v5482_v39 }
 0xb37   :  { %v4456_v38 = vpop.eup %4455 }
 0xb38   :  { %v5485_v40 = vmul.f32 %v4456_v38, %v4454_v7  ;;  %v5589_v7 = vld [vmem:[#allocation8 + $0x68] ss:$16 sps:$4 sm:$0xff]   ;;  %v5593_v38 = vld [vmem:[#allocation8 + $0x44] ss:$16 sps:$4 sm:$0xff]  }
 0xb3a   :  { %v2390_v42 = vpack.c.bf16 %v5485_v40, %v5485_v40 }
 0xb3c   :  { %2616 = vmatmul.mubr.bf16.vlgmr.msra.gmra.mxu0 %v2390_v42  ;;  %2657 = vmatmul.mubr.bf16.vlgmr.msra.gmra.mxu1 %v2390_v42  ;;  %v5595_v42 = vld [vmem:[#allocation8 + $0x4c] ss:$16 sps:$4 sm:$0xff]  }
 0xb3d   :  { %2881 = vmatpush1.bf16.msra.mxu0 %v5273_v52  ;;  %2922 = vmatpush1.bf16.msra.mxu1 %v5275_v10 }
 0xb3e   :  { %2882 = vmatprep.subr.bf16.mxu0 %v5281_v23  ;;  %2923 = vmatprep.subr.bf16.mxu1 %v5283_v62 }
 0xb3f   :  { %2912 = vmatprep.mubr.bf16.mxu0 %v5792_v24  ;;  %2953 = vmatprep.mubr.bf16.mxu1 %v5792_v24 }
 0xb41   :  { %2883 = vmatpush1.bf16.msra.mxu0 %v5285_v63  ;;  %2924 = vmatpush1.bf16.msra.mxu1 %v5287_v59 }
 0xb42   :  { %2884 = vmatprep.subr.bf16.mxu0 %v5293_v56  ;;  %2925 = vmatprep.subr.bf16.mxu1 %v5295_v57 }
 0xb45   :  { %2885 = vmatpush1.bf16.msra.mxu0 %v5297_v21  ;;  %2926 = vmatpush1.bf16.msra.mxu1 %v5299_v46 }
 0xb46   :  { %2886 = vmatprep.subr.bf16.mxu0 %v5305_v51  ;;  %2927 = vmatprep.subr.bf16.mxu1 %v5307_v28 }
 0xb49   :  { %2887 = vmatpush1.bf16.msra.mxu0 %v5309_v29  ;;  %2928 = vmatpush1.bf16.msra.mxu1 %v5311_v30 }
 0xb4a   :  { %2888 = vmatprep.subr.bf16.mxu0 %v5315_v12  ;;  %2929 = vmatprep.subr.bf16.mxu1 %v5317_v53 }
 0xb4d   :  { %2889 = vmatpush1.bf16.msra.mxu0 %v5321_v8  ;;  %2930 = vmatpush1.bf16.msra.mxu1 %v5323_v15 }
 0xb4e   :  { %2890 = vmatprep.subr.bf16.mxu0 %v5327_v0  ;;  %2931 = vmatprep.subr.bf16.mxu1 %v5329_v16 }
 0xb51   :  { %2891 = vmatpush1.bf16.msra.mxu0 %v5333_v9  ;;  %2932 = vmatpush1.bf16.msra.mxu1 %v5335_v11 }
 0xb52   :  { %2892 = vmatprep.subr.bf16.mxu0 %v5339_v14  ;;  %2933 = vmatprep.subr.bf16.mxu1 %v5341_v17 }
 0xb55   :  { %2893 = vmatpush1.bf16.msra.mxu0 %v5345_v18  ;;  %2934 = vmatpush1.bf16.msra.mxu1 %v5347_v35 }
 0xb56   :  { %2894 = vmatprep.subr.bf16.mxu0 %v5351_v34  ;;  %2935 = vmatprep.subr.bf16.mxu1 %v5353_v25 }
 0xb59   :  { %2895 = vmatpush1.bf16.msra.mxu0 %v5357_v54  ;;  %2936 = vmatpush1.bf16.msra.mxu1 %v5359_v36 }
 0xb5a   :  { %3177 = vmatprep.subr.bf16.mxu0 %v5535_v31  ;;  %3218 = vmatprep.subr.bf16.mxu1 %v5537_v41 }
 0xbfc   :  { %v2617_v52 = vpop.f32.mrf.mxu0  ;;  %v2658_v10 = vpop.f32.mrf.mxu1 }
 0xbfd   :  { %v2618_v23 = vadd.f32 %v2617_v52, %v5420_v33  ;;  %v2659_v0 = vadd.f32 %v2658_v10, %v5432_v43  ;;  %v5599_v52 = vld [vmem:[#allocation8 + $0x40] ss:$16 sps:$4 sm:$0xff]   ;;  %v5601_v10 = vld [vmem:[#allocation8 + $0x48] ss:$16 sps:$4 sm:$0xff]  }
 0xbfe   :  { %v2619_v62 = vpop.f32.mrf.mxu0  ;;  %v2660_v63 = vpop.f32.mrf.mxu1 }
 0xbff   :  { %v2665_v59 = vsub.f32 0.0, %v2618_v23  ;;  %v2620_v56 = vadd.f32 %v2619_v62, %v5423_v27  ;;  %v2661_v12 = vadd.f32 %v2660_v63, %v5428_v37  ;;  %v5605_v23 = vld [vmem:[#allocation8 + $0x24] ss:$16 sps:$4 sm:$0xff]   ;;  %v5607_v62 = vld [vmem:[#allocation8 + $0x2c] ss:$16 sps:$4 sm:$0xff]  }
 0xc00   :  { %v2621_v57 = vpop.f32.mrf.mxu0  ;;  %v2662_v21 = vpop.f32.mrf.mxu1  ;;  %v5611_v63 = vld [vmem:[#allocation8 + $0x20] ss:$16 sps:$4 sm:$0xff]  }
 0xc01   :  { %v2666_v46 = vmul.f32 1.442695, %v2665_v59  ;;  %v2670_v51 = vsub.f32 0.0, %v2620_v56  ;;  %v2676_v53 = vsub.f32 0.0, %v2661_v12  ;;  %v5613_v59 = vld [vmem:[#allocation8 + $0x28] ss:$16 sps:$4 sm:$0xff]  }
 0xc02   :  { %v2622_v28 = vpop.f32.mrf.mxu0  ;;  %v2663_v29 = vpop.f32.mrf.mxu1  ;;  %v5617_v56 = vld [vmem:[#allocation8 + $0x4] ss:$16 sps:$4 sm:$0xff]   ;;  %v5619_v57 = vld [vmem:[#allocation8 + $0xc] ss:$16 sps:$4 sm:$0xff]   ;;  %v5623_v21 = vld [vmem:[#allocation8] ss:$16 sps:$4 sm:$0xff]  }
 0xc03   :  { %4457 = vpow2.f32 %v2666_v46  ;;  %v2671_v30 = vmul.f32 1.442695, %v2670_v51  ;;  %v2677_v8 = vmul.f32 1.442695, %v2676_v53  ;;  %v5625_v46 = vld [vmem:[#allocation8 + $0x8] ss:$16 sps:$4 sm:$0xff]  }
 0xc05   :  { %4459 = vpow2.f32 %v2671_v30 }
 0xc06   :  { %4461 = vpow2.f32 %v2677_v8 }
 0xc10   :  { %v4458_v15 = vpop.eup %4457 }
 0xc11   :  { %v2668_v16 = vadd.f32 1.0, %v4458_v15 }
 0xc12   :  { %v4460_v9 = vpop.eup %4459 }
 0xc13   :  { %4463 = vrcp.f32 %v2668_v16  ;;  %v2673_v11 = vadd.f32 1.0, %v4460_v9  ;;  %v4462_v14 = vpop.eup %4461 }
 0xc14   :  { %4465 = vtanh.f32 %v2659_v0  ;;  %v2679_v34 = vadd.f32 1.0, %v4462_v14 }
 0xc15   :  { %4467 = vrcp.f32 %v2673_v11 }
 0xc16   :  { %4469 = vrcp.f32 %v2679_v34 }
 0xc20   :  { %v4464_v17 = vpop.eup %4463 }
 0xc21   :  { %v4466_v18 = vpop.eup %4465 }
 0xc22   :  { %v4468_v35 = vpop.eup %4467  ;;  %v2682_v25 = vmul.f32 %v4466_v18, %v4464_v17 }
 0xc23   :  { %v2681_v54 = vmul.f32 %v4468_v35, %v5482_v39  ;;  %v4470_v50 = vpop.eup %4469  ;;  %v5587_v39 = vld [vmem:[#allocation8 + $0x60] ss:$16 sps:$4 sm:$0xff]  }
 0xc25   :  { %v5526_v36 = vadd.f32 %v2682_v25, %v2681_v54 }
 0xc27   :  { %4471 = vtanh.f32 %v5526_v36 }
 0xc34   :  { %v4472_v45 = vpop.eup %4471 }
 0xc35   :  { %v5529_v32 = vmul.f32 %v4472_v45, %v4470_v50 }
 0xc37   :  { %v2687_v44 = vpack.c.bf16 %v5529_v32, %v5529_v32 }
 0xc39   :  { %2913 = vmatmul.mubr.bf16.vlgmr.msra.gmra.mxu0 %v2687_v44  ;;  %2954 = vmatmul.mubr.bf16.vlgmr.msra.gmra.mxu1 %v2687_v44 }
 0xc3a   :  { %3209 = vmatprep.mubr.bf16.mxu0 %v5792_v24  ;;  %3250 = vmatprep.mubr.bf16.mxu1 %v5792_v24 }
 0xc3b   :  { %3178 = vmatpush1.bf16.msra.mxu0 %v5539_v19  ;;  %3219 = vmatpush1.bf16.msra.mxu1 %v5541_v22 }
 0xc3c   :  { %3179 = vmatprep.subr.bf16.mxu0 %v5547_v2  ;;  %3220 = vmatprep.subr.bf16.mxu1 %v5549_v47 }
 0xc3f   :  { %3180 = vmatpush1.bf16.msra.mxu0 %v5551_v48  ;;  %3221 = vmatpush1.bf16.msra.mxu1 %v5553_v1 }
 0xc40   :  { %3181 = vmatprep.subr.bf16.mxu0 %v5559_v49  ;;  %3222 = vmatprep.subr.bf16.mxu1 %v5561_v6 }
 0xc43   :  { %3182 = vmatpush1.bf16.msra.mxu0 %v5563_v4  ;;  %3223 = vmatpush1.bf16.msra.mxu1 %v5565_v20 }
 0xc44   :  { %3183 = vmatprep.subr.bf16.mxu0 %v5571_v58  ;;  %3224 = vmatprep.subr.bf16.mxu1 %v5573_v5 }
 0xc47   :  { %3184 = vmatpush1.bf16.msra.mxu0 %v5575_v3  ;;  %3225 = vmatpush1.bf16.msra.mxu1 %v5577_v55 }
 0xc48   :  { %3185 = vmatprep.subr.bf16.mxu0 %v5581_v60  ;;  %3226 = vmatprep.subr.bf16.mxu1 %v5583_v26 }
 0xc4b   :  { %3186 = vmatpush1.bf16.msra.mxu0 %v5587_v39  ;;  %3227 = vmatpush1.bf16.msra.mxu1 %v5589_v7 }
 0xc4c   :  { %3187 = vmatprep.subr.bf16.mxu0 %v5593_v38  ;;  %3228 = vmatprep.subr.bf16.mxu1 %v5595_v42 }
 0xc4f   :  { %3188 = vmatpush1.bf16.msra.mxu0 %v5599_v52  ;;  %3229 = vmatpush1.bf16.msra.mxu1 %v5601_v10 }
 0xc50   :  { %3189 = vmatprep.subr.bf16.mxu0 %v5605_v23  ;;  %3230 = vmatprep.subr.bf16.mxu1 %v5607_v62 }
 0xc53   :  { %3190 = vmatpush1.bf16.msra.mxu0 %v5611_v63  ;;  %3231 = vmatpush1.bf16.msra.mxu1 %v5613_v59 }
 0xc54   :  { %3191 = vmatprep.subr.bf16.mxu0 %v5617_v56  ;;  %3232 = vmatprep.subr.bf16.mxu1 %v5619_v57 }
 0xc57   :  { %3192 = vmatpush1.bf16.msra.mxu0 %v5623_v21  ;;  %3233 = vmatpush1.bf16.msra.mxu1 %v5625_v46 }
 0xc58   :  { %3474 = vmatprep.subr.bf16.mxu0 %v5535_v31  ;;  %3515 = vmatprep.subr.bf16.mxu1 %v5537_v41 }
 0xcf9   :  { %v2914_v51 = vpop.f32.mrf.mxu0  ;;  %v2955_v28 = vpop.f32.mrf.mxu1 }
 0xcfa   :  { %v2915_v29 = vadd.f32 %v2914_v51, %v5420_v33  ;;  %v2956_v54 = vadd.f32 %v2955_v28, %v5432_v43 }
 0xcfb   :  { %v2916_v30 = vpop.f32.mrf.mxu0  ;;  %v2957_v12 = vpop.f32.mrf.mxu1 }
 0xcfc   :  { %v2962_v53 = vsub.f32 0.0, %v2915_v29  ;;  %v2917_v8 = vadd.f32 %v2916_v30, %v5423_v27  ;;  %v2958_v18 = vadd.f32 %v2957_v12, %v5428_v37 }
 0xcfd   :  { %v2918_v15 = vpop.f32.mrf.mxu0  ;;  %v2959_v0 = vpop.f32.mrf.mxu1 }
 0xcfe   :  { %v2963_v16 = vmul.f32 1.442695, %v2962_v53  ;;  %v2967_v9 = vsub.f32 0.0, %v2917_v8  ;;  %v2973_v35 = vsub.f32 0.0, %v2958_v18  ;;  %v3585_v18 = vpack.c.bf16 %v5439_v13, %v5378_v61  ;;  %v4277_v61 = vld [vmem:[%s5758_s8 + $0x18] sm:$0xff]   ;;  %v4278_v13 = vld [vmem:[%s5758_s8 + $0x10] sm:$0xff]  }
 0xcff   :  { %v2919_v11 = vpop.f32.mrf.mxu0  ;;  %v2960_v14 = vpop.f32.mrf.mxu1 }
 0xd00   :  { %4473 = vpow2.f32 %v2963_v16  ;;  %v2968_v17 = vmul.f32 1.442695, %v2967_v9  ;;  %v2974_v34 = vmul.f32 1.442695, %v2973_v35  ;;  %v4275_v35 = vld [vmem:[%s5758_s8 + $0x28] sm:$0xff]  }
 0xd02   :  { %4475 = vpow2.f32 %v2968_v17  ;;  %v4274_v17 = vld [vmem:[%s5758_s8 + $0x30] sm:$0xff]  }
 0xd03   :  { %4477 = vpow2.f32 %v2974_v34  ;;  %v4276_v34 = vld [vmem:[%s5758_s8 + $0x20] sm:$0xff]  }
 0xd0d   :  { %v4474_v25 = vpop.eup %4473 }
 0xd0e   :  { %v2965_v50 = vadd.f32 1.0, %v4474_v25  ;;  %v4279_v25 = vld [vmem:[%s5758_s8 + $0x8] sm:$0xff]  }
 0xd0f   :  { %v4476_v45 = vpop.eup %4475 }
 0xd10   :  { %4479 = vrcp.f32 %v2965_v50  ;;  %v2970_v44 = vadd.f32 1.0, %v4476_v45  ;;  %v4478_v31 = vpop.eup %4477  ;;  %v3586_v50 = vpack.c.bf16 %v5529_v32, %v5485_v40 }
 0xd11   :  { %4481 = vtanh.f32 %v2956_v54  ;;  %v2976_v30 = vadd.f32 1.0, %v4478_v31  ;;  %v4280_v54 = vld [vmem:[%s5758_s8] sm:$0xff]  }
 0xd12   :  { %4483 = vrcp.f32 %v2970_v44 }
 0xd13   :  { %4485 = vrcp.f32 %v2976_v30 }
 0xd1d   :  { %v4480_v41 = vpop.eup %4479 }
 0xd1e   :  { %v4482_v51 = vpop.eup %4481 }
 0xd1f   :  { %v4484_v29 = vpop.eup %4483  ;;  %v2979_v53 = vmul.f32 %v4482_v51, %v4480_v41 }
 0xd20   :  { %v2978_v12 = vmul.f32 %v4484_v29, %v5526_v36  ;;  %v4486_v28 = vpop.eup %4485 }
 0xd22   :  { %v5638_v8 = vadd.f32 %v2979_v53, %v2978_v12 }
 0xd24   :  { %4487 = vtanh.f32 %v5638_v8 }
 0xd31   :  { %v4488_v15 = vpop.eup %4487 }
 0xd32   :  { %v5641_v0 = vmul.f32 %v4488_v15, %v4486_v28 }
 0xd34   :  { %v2984_v16 = vpack.c.bf16 %v5641_v0, %v5641_v0 }
 0xd36   :  { %3210 = vmatmul.mubr.bf16.vlgmr.msra.gmra.mxu0 %v2984_v16  ;;  %3251 = vmatmul.mubr.bf16.vlgmr.msra.gmra.mxu1 %v2984_v16 }
 0xd37   :  { %3475 = vmatpush1.bf16.msra.mxu0 %v5539_v19  ;;  %3516 = vmatpush1.bf16.msra.mxu1 %v5541_v22 }
 0xd38   :  { %3476 = vmatprep.subr.bf16.mxu0 %v5547_v2  ;;  %3517 = vmatprep.subr.bf16.mxu1 %v5549_v47 }
 0xd39   :  { %3506 = vmatprep.mubr.bf16.mxu0 %v5792_v24  ;;  %3547 = vmatprep.mubr.bf16.mxu1 %v5792_v24  ;;  %v4273_v24 = vld [vmem:[%s5758_s8 + $0x38] sm:$0xff]  }
 0xd3b   :  { %3477 = vmatpush1.bf16.msra.mxu0 %v5551_v48  ;;  %3518 = vmatpush1.bf16.msra.mxu1 %v5553_v1 }
 0xd3c   :  { %3478 = vmatprep.subr.bf16.mxu0 %v5559_v49  ;;  %3519 = vmatprep.subr.bf16.mxu1 %v5561_v6 }
 0xd3f   :  { %3479 = vmatpush1.bf16.msra.mxu0 %v5563_v4  ;;  %3520 = vmatpush1.bf16.msra.mxu1 %v5565_v20 }
 0xd40   :  { %3480 = vmatprep.subr.bf16.mxu0 %v5571_v58  ;;  %3521 = vmatprep.subr.bf16.mxu1 %v5573_v5 }
 0xd43   :  { %3481 = vmatpush1.bf16.msra.mxu0 %v5575_v3  ;;  %3522 = vmatpush1.bf16.msra.mxu1 %v5577_v55 }
 0xd44   :  { %3482 = vmatprep.subr.bf16.mxu0 %v5581_v60  ;;  %3523 = vmatprep.subr.bf16.mxu1 %v5583_v26 }
 0xd47   :  { %3483 = vmatpush1.bf16.msra.mxu0 %v5587_v39  ;;  %3524 = vmatpush1.bf16.msra.mxu1 %v5589_v7 }
 0xd48   :  { %3484 = vmatprep.subr.bf16.mxu0 %v5593_v38  ;;  %3525 = vmatprep.subr.bf16.mxu1 %v5595_v42 }
 0xd4b   :  { %3485 = vmatpush1.bf16.msra.mxu0 %v5599_v52  ;;  %3526 = vmatpush1.bf16.msra.mxu1 %v5601_v10 }
 0xd4c   :  { %3486 = vmatprep.subr.bf16.mxu0 %v5605_v23  ;;  %3527 = vmatprep.subr.bf16.mxu1 %v5607_v62 }
 0xd4f   :  { %3487 = vmatpush1.bf16.msra.mxu0 %v5611_v63  ;;  %3528 = vmatpush1.bf16.msra.mxu1 %v5613_v59 }
 0xd50   :  { %3488 = vmatprep.subr.bf16.mxu0 %v5617_v56  ;;  %3529 = vmatprep.subr.bf16.mxu1 %v5619_v57 }
 0xd53   :  { %3489 = vmatpush1.bf16.msra.mxu0 %v5623_v21  ;;  %3530 = vmatpush1.bf16.msra.mxu1 %v5625_v46 }
 0xd54   :  { %4036 = vmatprep.subr.bf16.mxu0 %v4273_v24 }
 0xdf6   :  { %v3211_v36 = vpop.f32.mrf.mxu0  ;;  %v3252_v19 = vpop.f32.mrf.mxu1 }
 0xdf7   :  { %v3212_v22 = vadd.f32 %v3211_v36, %v5420_v33  ;;  %v3253_v7 = vadd.f32 %v3252_v19, %v5432_v43 }
 0xdf8   :  { %v3213_v2 = vpop.f32.mrf.mxu0  ;;  %v3254_v47 = vpop.f32.mrf.mxu1 }
 0xdf9   :  { %v3259_v48 = vsub.f32 0.0, %v3212_v22  ;;  %v3214_v1 = vadd.f32 %v3213_v2, %v5423_v27  ;;  %v3255_v55 = vadd.f32 %v3254_v47, %v5428_v37  ;;  %v4015_v47 = vld [vmem:[%s5759_s9] ss:$0 sm:$0xff] }
 0xdfa   :  { %v3215_v49 = vpop.f32.mrf.mxu0  ;;  %v3256_v6 = vpop.f32.mrf.mxu1 }
 0xdfb   :  { %v3260_v4 = vmul.f32 1.442695, %v3259_v48  ;;  %v3264_v20 = vsub.f32 0.0, %v3214_v1  ;;  %v3270_v60 = vsub.f32 0.0, %v3255_v55 }
 0xdfc   :  { %v3216_v58 = vpop.f32.mrf.mxu0  ;;  %v3257_v5 = vpop.f32.mrf.mxu1 }
 0xdfd   :  { %4489 = vpow2.f32 %v3260_v4  ;;  %v3265_v3 = vmul.f32 1.442695, %v3264_v20  ;;  %v3271_v26 = vmul.f32 1.442695, %v3270_v60 }
 0xdff   :  { %4491 = vpow2.f32 %v3265_v3 }
 0xe00   :  { %4493 = vpow2.f32 %v3271_v26 }
 0xe0a   :  { %v4490_v39 = vpop.eup %4489 }
 0xe0b   :  { %v3262_v38 = vadd.f32 1.0, %v4490_v39 }
 0xe0c   :  { %v4492_v42 = vpop.eup %4491 }
 0xe0d   :  { %4495 = vrcp.f32 %v3262_v38  ;;  %v3267_v52 = vadd.f32 1.0, %v4492_v42  ;;  %v4494_v10 = vpop.eup %4493 }
 0xe0e   :  { %4497 = vtanh.f32 %v3253_v7  ;;  %v3273_v59 = vadd.f32 1.0, %v4494_v10 }
 0xe0f   :  { %4499 = vrcp.f32 %v3267_v52 }
 0xe10   :  { %4501 = vrcp.f32 %v3273_v59 }
 0xe1a   :  { %v4496_v23 = vpop.eup %4495 }
 0xe1b   :  { %v4498_v62 = vpop.eup %4497 }
 0xe1c   :  { %v4500_v63 = vpop.eup %4499  ;;  %v3276_v56 = vmul.f32 %v4498_v62, %v4496_v23 }
 0xe1d   :  { %v3275_v57 = vmul.f32 %v4500_v63, %v5638_v8  ;;  %v4502_v46 = vpop.eup %4501 }
 0xe1f   :  { %v5685_v21 = vadd.f32 %v3276_v56, %v3275_v57 }
 0xe21   :  { %4503 = vtanh.f32 %v5685_v21 }
 0xe2e   :  { %v4504_v9 = vpop.eup %4503 }
 0xe2f   :  { %v3279_v11 = vmul.f32 %v4504_v9, %v4502_v46 }
 0xe31   :  { %v3281_v14 = vpack.c.bf16 %v3279_v11, %v3279_v11  ;;  %v3587_v45 = vpack.c.bf16 %v3279_v11, %v5641_v0 }
 0xe33   :  { %3507 = vmatmul.mubr.bf16.vlgmr.msra.gmra.mxu0 %v3281_v14  ;;  %3548 = vmatmul.mubr.bf16.vlgmr.msra.gmra.mxu1 %v3281_v14 }
 0xe34   :  { %4037 = vmatpush3.bf16.msra.mxu0 %v4273_v24  ;;  %4052 = vmatprep.mubr.bf16.mxu0 %v3585_v18 }
 0xe35   :  { %4038 = vmatprep.subr.bf16.mxu0 %v4274_v17 }
 0xe38   :  { %4039 = vmatpush3.bf16.msra.mxu0 %v4274_v17 }
 0xe39   :  { %4040 = vmatprep.subr.bf16.mxu0 %v4275_v35 }
 0xe3c   :  { %4041 = vmatpush3.bf16.msra.mxu0 %v4275_v35 }
 0xe3d   :  { %4042 = vmatprep.subr.bf16.mxu0 %v4276_v34 }
 0xe40   :  { %4043 = vmatpush3.bf16.msra.mxu0 %v4276_v34 }
 0xe41   :  { %4044 = vmatprep.subr.bf16.mxu0 %v4277_v61 }
 0xe44   :  { %4045 = vmatpush3.bf16.msra.mxu0 %v4277_v61 }
 0xe45   :  { %4046 = vmatprep.subr.bf16.mxu0 %v4278_v13 }
 0xe48   :  { %4047 = vmatpush3.bf16.msra.mxu0 %v4278_v13 }
 0xe49   :  { %4048 = vmatprep.subr.bf16.mxu0 %v4279_v25 }
 0xe4c   :  { %4049 = vmatpush3.bf16.msra.mxu0 %v4279_v25 }
 0xe4d   :  { %4050 = vmatprep.subr.bf16.mxu0 %v4280_v54 }
 0xe50   :  { %4051 = vmatpush3.bf16.msra.mxu0 %v4280_v54 }
 0xe53   :  { %4053 = vmatmul.mubr.bf16.vlgmr.msra.gmra.mxu0 %v3586_v50 }
 0xe54   :  { %4056 = vmatprep.mubr.bf16.mxu0 %v3587_v45 }
 0xef3   :  { %v3508_v44 = vpop.f32.mrf.mxu0  ;;  %v3549_v31 = vpop.f32.mrf.mxu1 }
 0xef4   :  { %v3509_v41 = vadd.f32 %v3508_v44, %v5420_v33  ;;  %v3550_v33 = vadd.f32 %v3549_v31, %v5432_v43 }
 0xef5   :  { %v3510_v51 = vpop.f32.mrf.mxu0  ;;  %v3551_v29 = vpop.f32.mrf.mxu1 }
 0xef6   :  { %v3556_v30 = vsub.f32 0.0, %v3509_v41  ;;  %v3511_v53 = vadd.f32 %v3510_v51, %v5423_v27  ;;  %v3552_v32 = vadd.f32 %v3551_v29, %v5428_v37 }
 0xef7   :  { %v3512_v12 = vpop.f32.mrf.mxu0  ;;  %v3553_v8 = vpop.f32.mrf.mxu1 }
 0xef8   :  { %v3557_v28 = vmul.f32 1.442695, %v3556_v30  ;;  %v3561_v15 = vsub.f32 0.0, %v3511_v53  ;;  %v3567_v0 = vsub.f32 0.0, %v3552_v32 }
 0xef9   :  { %v3513_v16 = vpop.f32.mrf.mxu0  ;;  %v3554_v24 = vpop.f32.mrf.mxu1 }
 0xefa   :  { %4505 = vpow2.f32 %v3557_v28  ;;  %v3562_v40 = vmul.f32 1.442695, %v3561_v15  ;;  %v3568_v36 = vmul.f32 1.442695, %v3567_v0 }
 0xefc   :  { %4507 = vpow2.f32 %v3562_v40 }
 0xefd   :  { %4509 = vpow2.f32 %v3568_v36 }
 0xf07   :  { %v4506_v19 = vpop.eup %4505 }
 0xf08   :  { %v3559_v22 = vadd.f32 1.0, %v4506_v19 }
 0xf09   :  { %v4508_v2 = vpop.eup %4507 }
 0xf0a   :  { %4511 = vrcp.f32 %v3559_v22  ;;  %v3564_v27 = vadd.f32 1.0, %v4508_v2  ;;  %v4510_v37 = vpop.eup %4509 }
 0xf0b   :  { %4513 = vtanh.f32 %v3550_v33  ;;  %v3570_v3 = vadd.f32 1.0, %v4510_v37 }
 0xf0c   :  { %4515 = vrcp.f32 %v3564_v27 }
 0xf0d   :  { %4517 = vrcp.f32 %v3570_v3 }
 0xf13   :  { %v4054_v48 = vpop.f32.mrf.mxu0 }
 0xf14   :  { %v3702_v1 = vadd.f32 %v4054_v48, %v4015_v47 }
 0xf15   :  { %v3693_v49 = vpop.f32.mrf.mxu0 }
 0xf16   :  { %3726 = vst.msk [vmem:[%s5760_s10 + $0x18] sm:$0xff] %vm166_vm0, %v3702_v1  ;;  %v3694_v43 = vadd.f32 %v4015_v47, %v3693_v49 }
 0xf17   :  { %v4512_v6 = vpop.eup %4511  ;;  %v4055_v4 = vpop.f32.mrf.mxu0 }
 0xf18   :  { %v4514_v20 = vpop.eup %4513  ;;  %3724 = vst.msk [vmem:[%s5760_s10 + $0x8] sm:$0xff] %vm166_vm0, %v3694_v43  ;;  %v3705_v58 = vadd.f32 %v4055_v4, %v4015_v47 }
 0xf19   :  { %v4516_v5 = vpop.eup %4515  ;;  %v3696_v55 = vpop.f32.mrf.mxu0  ;;  %v3573_v60 = vmul.f32 %v4514_v20, %v4512_v6 }
 0xf1a   :  { %v3572_v26 = vmul.f32 %v4516_v5, %v5685_v21  ;;  %3727 = vst.msk [vmem:[%s5760_s10 + $0x20] sm:$0xff] %vm166_vm0, %v3705_v58  ;;  %v3697_v39 = vadd.f32 %v4015_v47, %v3696_v55  ;;  %v4518_v38 = vpop.eup %4517 }
 0xf1c   :  { %3725 = vst.msk [vmem:[%s5760_s10 + $0x10] sm:$0xff] %vm166_vm0, %v3697_v39  ;;  %v3574_v7 = vadd.f32 %v3573_v60, %v3572_v26 }
 0xf1e   :  { %4519 = vtanh.f32 %v3574_v7 }
 0xf2b   :  { %v4520_v42 = vpop.eup %4519 }
 0xf2c   :  { %v3576_v52 = vmul.f32 %v4520_v42, %v4518_v38 }
 0xf2e   :  { %v3588_v10 = vpack.c.bf16 %v3576_v52, %v3576_v52 }
 0xf30   :  { %4057 = vmatmul.mubr.bf16.gmra.mxu0 %v3588_v10 }
 0xff0   :  { %v4058_v23 = vpop.f32.mrf.mxu0 }
 0xff1   :  { %v3718_v62 = vadd.f32 %v4058_v23, %v4015_v47 }
 0xff2   :  { %v3709_v63 = vpop.f32.mrf.mxu0 }
 0xff3   :  { %3730 = vst.msk [vmem:[%s5760_s10 + $0x38] sm:$0xff] %vm166_vm0, %v3718_v62  ;;  %v3710_v59 = vadd.f32 %v4015_v47, %v3709_v63 }
 0xff4   :  { %v4059_v56 = vpop.f32.mrf.mxu0 }
 0xff5   :  { %3728 = vst.msk [vmem:[%s5760_s10 + $0x28] sm:$0xff] %vm166_vm0, %v3710_v59 }
 0xff6   :  { %v3712_v57 = vpop.f32.mrf.mxu0 }
 0xff7   :  { %v3713_v21 = vadd.f32 %v4015_v47, %v3712_v57 }
 0xff9   :  { %3729 = vst.msk [vmem:[%s5760_s10 + $0x30] sm:$0xff] %vm166_vm0, %v3713_v21 }
 0xffa   :  { %3735 = vsyncpa [#allocation5], 1 }
 0xffb   :  { %3736 = vsyncpa [#allocation7], 1 }

</bundles_post_ra>
